<compile_context>
chip_gen: v6e
topology: v6e:2x2x1
jax: 0.10.0
libtpu: 0.0.40
codegen_flags: <defaults>
</compile_context>

<pallas_src>
import math
from collections import deque

import numpy as np
import jax
import jax.numpy as jnp
from jax.experimental import pallas as pl
from jax.experimental.pallas import tpu as pltpu

# ------------------------- hyper-params consistent with the module -------------------------------
N_NODES = 8
N_LAYERS = 2
N_HEADS = 4
EMBED_DIM = 32
DIM_FFN = 64
BATCH = 8                      # total graphs
B_TILE = 4                     # graphs packed per grid step (B_TILE*N_NODES = 32-row slab)
LN_EPS = 1e-5
D_HEAD = EMBED_DIM // N_HEADS
M_TILE = B_TILE * N_NODES      # 32 rows per grid step
MASK_NEG = -1e9                # cross-graph attention mask

_SQRT_2_OVER_PI = math.sqrt(2.0 / math.pi)

# ------------------------- packed weight slab layout (static offsets) ----------------------------
# Slab A: lane width = EMBED_DIM (32).  Per layer (all offsets multiples of 8 sublanes):
OFF_WQ = 0                       # (D, D)  (pre-scaled by 1/sqrt(d_head))
OFF_WK = EMBED_DIM               # (D, D)
OFF_WV = 2 * EMBED_DIM           # (D, D)
OFF_WO = 3 * EMBED_DIM           # (D, D)
OFF_W2 = 4 * EMBED_DIM           # (F, D)
OFF_MISC = 4 * EMBED_DIM + DIM_FFN   # 16 rows: ln1_g, ln1_b, bq, bk, bv, bo, ln2_g, ln2_b, b2, pad
MISC_ROWS = 16
LAYER_ROWS_A = OFF_MISC + MISC_ROWS              # 208
REG_ROWS = 8                                     # rows 0..3 = regressor_w^T, row 4 = rb (lanes 0..3)
REG_OFF = N_LAYERS * LAYER_ROWS_A                # 416
ROWS_A = REG_OFF + REG_ROWS                      # 424

# Slab B: lane width = DIM_FFN (64).  Per layer: w1 (D rows) + b1 (1 row) + pad -> 40 rows.
LAYER_ROWS_B = EMBED_DIM + 8                     # 40
ROWS_B = N_LAYERS * LAYER_ROWS_B                 # 80

# misc-block row indices
MI_LN1_G, MI_LN1_B, MI_BQ, MI_BK, MI_BV, MI_BO, MI_LN2_G, MI_LN2_B, MI_B2 = range(9)


# ----------------------------------- in-kernel helpers -------------------------------------------
def _gelu_tanh(x):
    # TODO(synk): tanh-approximate GELU (single EUP tanh) instead of torch's exact-erf nn.GELU();
    #             max abs deviation ~3e-4.
    return 0.5 * x * (1.0 + jnp.tanh(_SQRT_2_OVER_PI * (x + 0.044715 * x * x * x)))


def _layernorm(v, g, b):
    mu = jnp.mean(v, axis=-1, keepdims=True)
    var = jnp.mean((v - mu) ** 2, axis=-1, keepdims=True)
    return (v - mu) * jax.lax.rsqrt(var + LN_EPS) * g + b


# ----------------------------------- fused Pallas kernel -----------------------------------------
def graphormer_fused_kernel(x_ref, bias_ref, wa_ref, wb_ref, out_ref, attn_ref):
    """Whole Graphormer forward for B_TILE graphs (one grid step): all layers + regressor.

    x:(1, M, D) packed node slab (M = B_TILE*N); bias:(1, H, M, M) block-diagonal spatial+edge
    bias with -1e9 cross-graph mask; wa/wb: packed weight slabs (constant across the grid).
    outputs: out:(1, B_TILE, 4) pooled regressor; attn:(1, L, M, H*M) lane-dense probabilities.
    """
    m = x_ref.shape[1]                      # B_TILE * N
    d = x_ref.shape[2]                      # EMBED_DIM
    n = N_NODES
    n_heads = bias_ref.shape[1]
    dh = d // n_heads
    n_layers = attn_ref.shape[1]
    f = wb_ref.shape[1]                     # DIM_FFN
    bt = out_ref.shape[1]                   # B_TILE

    x = x_ref[0]                            # (M, D) f32

    for layer in range(n_layers):           # static unroll over layers
        a0 = layer * LAYER_ROWS_A
        b0 = layer * LAYER_ROWS_B

        misc = wa_ref[a0 + OFF_MISC: a0 + OFF_MISC + MISC_ROWS, :]       # (16, D)
        ln1_g, ln1_b = misc[MI_LN1_G:MI_LN1_G + 1], misc[MI_LN1_B:MI_LN1_B + 1]
        bq, bk = misc[MI_BQ:MI_BQ + 1], misc[MI_BK:MI_BK + 1]
        bv, bo = misc[MI_BV:MI_BV + 1], misc[MI_BO:MI_BO + 1]
        ln2_g, ln2_b = misc[MI_LN2_G:MI_LN2_G + 1], misc[MI_LN2_B:MI_LN2_B + 1]
        b2 = misc[MI_B2:MI_B2 + 1]

        # ---- pre-LN multi-head attention with (spatial + edge) block-diagonal bias ----
        h = _layernorm(x, ln1_g, ln1_b)
        wq = wa_ref[a0 + OFF_WQ: a0 + OFF_WQ + d, :]
        wk = wa_ref[a0 + OFF_WK: a0 + OFF_WK + d, :]
        wv = wa_ref[a0 + OFF_WV: a0 + OFF_WV + d, :]
        q = jnp.dot(h, wq, preferred_element_type=jnp.float32) + bq      # scale folded into wq/bq
        k = jnp.dot(h, wk, preferred_element_type=jnp.float32) + bk
        v = jnp.dot(h, wv, preferred_element_type=jnp.float32) + bv

        acc = jnp.zeros((m, d), jnp.float32)
        for hh in range(n_heads):           # static unroll over heads
            sl = slice(hh * dh, (hh + 1) * dh)
            s = jax.lax.dot_general(q[:, sl], k[:, sl], (((1,), (1,)), ((), ())),
                                    preferred_element_type=jnp.float32)  # (M, M)
            s = s + bias_ref[0, hh]          # per-graph bias on diag blocks, -1e9 off-blocks
            s = s - jnp.max(s, axis=-1, keepdims=True)
            e = jnp.exp(s)
            p = e * pl.reciprocal(jnp.sum(e, axis=-1, keepdims=True), approx=False)
            # lane-dense store: head hh occupies lanes [hh*M, (hh+1)*M) of a 128-lane row
            attn_ref[0, layer, :, hh * m:(hh + 1) * m] = p
            o_h = jnp.dot(p, v[:, sl], preferred_element_type=jnp.float32)          # (M, dh)
            wo_h = wa_ref[a0 + OFF_WO + hh * dh: a0 + OFF_WO + (hh + 1) * dh, :]     # (dh, D)
            acc = acc + jnp.dot(o_h, wo_h, preferred_element_type=jnp.float32)
        x = x + acc + bo

        # ---- pre-LN feed-forward: Linear -> GELU -> Linear ----
        h2 = _layernorm(x, ln2_g, ln2_b)
        w1 = wb_ref[b0: b0 + d, :]                                       # (D, F)
        b1 = wb_ref[b0 + d: b0 + d + 1, :]                               # (1, F)
        ff = jnp.dot(h2, w1, preferred_element_type=jnp.float32) + b1
        ff = _gelu_tanh(ff)
        w2 = wa_ref[a0 + OFF_W2: a0 + OFF_W2 + f, :]                     # (F, D)
        x = x + jnp.dot(ff, w2, preferred_element_type=jnp.float32) + b2

    # ---- regressor: per-graph node mean FIRST (block-averaging matmul), then Linear(D, 4) ----
    reg = wa_ref[REG_OFF: REG_OFF + REG_ROWS, :]
    rw_t = reg[0:4, :]                               # (4, D) = regressor_w^T
    rb4 = reg[4:5, :4]                               # (1, 4)
    row_id = jax.lax.broadcasted_iota(jnp.int32, (bt, m), 0)
    col_id = jax.lax.broadcasted_iota(jnp.int32, (bt, m), 1)
    low = row_id * n
    avg = jnp.where((col_id >= low) & (col_id < low + n), 1.0 / n, 0.0)  # (B_TILE, M)
    mean_x = jnp.dot(avg, x, preferred_element_type=jnp.float32)         # (B_TILE, D)
    y = jax.lax.dot_general(mean_x, rw_t, (((1,), (1,)), ((), ())),
                            preferred_element_type=jnp.float32) + rb4    # (B_TILE, 4)
    out_ref[0] = y


# ----------------------------------- pallas_call wrapper -----------------------------------------
@jax.jit
def graphormer_forward_batch(x_bnd, bias_bhnn, slab_a, slab_b):
    B, N, D = x_bnd.shape
    H = bias_bhnn.shape[1]
    G = B // B_TILE
    M = B_TILE * N
    L = N_LAYERS

    # pack B_TILE graphs per grid step into a (M, D) row slab (pure layout plumbing)
    x_gmd = x_bnd.reshape(G, M, D)

    # block-diagonal bias per tile: per-graph (N,N) bias on diag blocks, -1e9 across graphs
    bias_g = bias_bhnn.reshape(G, B_TILE, H, N, N)
    blk = jnp.full((G, H, B_TILE, N, B_TILE, N), MASK_NEG, dtype=jnp.float32)
    for t in range(B_TILE):
        blk = blk.at[:, :, t, :, t, :].set(bias_g[:, t])
    block_bias = blk.reshape(G, H, M, M)

    out_g, attn_flat = pl.pallas_call(
        graphormer_fused_kernel,
        grid=(G,),
        out_shape=(jax.ShapeDtypeStruct((G, B_TILE, 4), jnp.float32),
                   jax.ShapeDtypeStruct((G, L, M, H * M), jnp.float32)),
        in_specs=[pl.BlockSpec((1, M, D), lambda g: (g, 0, 0)),
                  pl.BlockSpec((1, H, M, M), lambda g: (g, 0, 0, 0)),
                  pl.BlockSpec((ROWS_A, D), lambda g: (0, 0)),          # constant weight slab A
                  pl.BlockSpec((ROWS_B, DIM_FFN), lambda g: (0, 0))],   # constant weight slab B
        out_specs=(pl.BlockSpec((1, B_TILE, 4), lambda g: (g, 0, 0)),
                   pl.BlockSpec((1, L, M, H * M), lambda g: (g, 0, 0, 0))),
        compiler_params=pltpu.CompilerParams(dimension_semantics=("parallel",)),
    )(x_gmd, block_bias, slab_a, slab_b)

    outputs = out_g.reshape(B, 4)

    # (G, L, M, H*M) -> per-graph (B, L, H, N, N): extract diagonal blocks (layout plumbing)
    full = attn_flat.reshape(G, L, B_TILE, N, H, B_TILE, N)
    per_graph = [full[:, :, t, :, :, t, :] for t in range(B_TILE)]       # each (G, L, N, H, N)
    attn = jnp.stack(per_graph, axis=1)                                  # (G, Bt, L, N, H, N)
    attn = attn.transpose(0, 1, 2, 4, 3, 5).reshape(B, L, H, N, N)
    return outputs, attn


# ---------------------------------- deterministic parameters -------------------------------------
def init_params(key):
    def nrm(k, shape, scale):
        return scale * jax.random.normal(k, shape, dtype=jnp.float32)

    keys = iter(jax.random.split(key, 128))
    params = {}
    params["node_encoder"] = nrm(next(keys), (N_NODES, EMBED_DIM), 1.0)
    edge_tbl = nrm(next(keys), (N_NODES ** 2, N_HEADS), 1.0)
    params["edge_encoder"] = edge_tbl.at[0].set(0.0)            # padding_idx=0
    params["centrality_encoding"] = nrm(next(keys), (N_NODES, EMBED_DIM), 1.0)
    spat_tbl = nrm(next(keys), (N_NODES, N_HEADS), 1.0)
    params["spatial_encoding"] = spat_tbl.at[-1].set(0.0)       # padding_idx=-1
    layers = []
    s_d = 1.0 / math.sqrt(EMBED_DIM)
    s_f = 1.0 / math.sqrt(DIM_FFN)
    for _ in range(N_LAYERS):
        lp = dict(
            ln1_g=jnp.ones((1, EMBED_DIM), jnp.float32),
            ln1_b=jnp.zeros((1, EMBED_DIM), jnp.float32),
            wq=nrm(next(keys), (EMBED_DIM, EMBED_DIM), s_d),
            bq=nrm(next(keys), (1, EMBED_DIM), 0.02),
            wk=nrm(next(keys), (EMBED_DIM, EMBED_DIM), s_d),
            bk=nrm(next(keys), (1, EMBED_DIM), 0.02),
            wv=nrm(next(keys), (EMBED_DIM, EMBED_DIM), s_d),
            bv=nrm(next(keys), (1, EMBED_DIM), 0.02),
            wo=nrm(next(keys), (EMBED_DIM, EMBED_DIM), s_d),
            bo=nrm(next(keys), (1, EMBED_DIM), 0.02),
            ln2_g=jnp.ones((1, EMBED_DIM), jnp.float32),
            ln2_b=jnp.zeros((1, EMBED_DIM), jnp.float32),
            w1=nrm(next(keys), (EMBED_DIM, DIM_FFN), s_d),
            b1=nrm(next(keys), (1, DIM_FFN), 0.02),
            w2=nrm(next(keys), (DIM_FFN, EMBED_DIM), s_f),
            b2=nrm(next(keys), (1, EMBED_DIM), 0.02),
        )
        layers.append(lp)
    params["layers"] = layers
    params["regressor_w"] = nrm(next(keys), (EMBED_DIM, 4), s_d)
    params["regressor_b"] = jnp.zeros((1, 4), jnp.float32)
    return params


def pack_param_slabs(params):
    """Pack all per-layer weights + regressor into two contiguous f32 slabs (2 DMAs total).

    The 1/sqrt(d_head) attention scale is folded into wq AND bq here (one-time host transform).
    """
    D, F = EMBED_DIM, DIM_FFN
    scale = 1.0 / math.sqrt(D_HEAD)
    rows_a = []
    for lp in params["layers"]:
        rows_a.append(lp["wq"] * scale)
        rows_a.append(lp["wk"])
        rows_a.append(lp["wv"])
        rows_a.append(lp["wo"])
        rows_a.append(lp["w2"])
        misc = jnp.concatenate(
            [lp["ln1_g"], lp["ln1_b"], lp["bq"] * scale, lp["bk"], lp["bv"], lp["bo"],
             lp["ln2_g"], lp["ln2_b"], lp["b2"],
             jnp.zeros((MISC_ROWS - 9, D), jnp.float32)], axis=0)
        rows_a.append(misc)
    reg = jnp.zeros((REG_ROWS, D), jnp.float32)
    reg = reg.at[0:4, :].set(params["regressor_w"].T)
    reg = reg.at[4, :4].set(params["regressor_b"][0])
    rows_a.append(reg)
    slab_a = jnp.concatenate(rows_a, axis=0)
    assert slab_a.shape == (ROWS_A, D)

    rows_b = []
    for lp in params["layers"]:
        rows_b.append(jnp.concatenate(
            [lp["w1"], lp["b1"], jnp.zeros((LAYER_ROWS_B - D - 1, F), jnp.float32)], axis=0))
    slab_b = jnp.concatenate(rows_b, axis=0)
    assert slab_b.shape == (ROWS_B, F)
    return slab_a, slab_b


# ---------------------------------- numpy graph preprocessing ------------------------------------
# TODO(synk): dgl/networkx graph construction, BFS shortest paths and path reconstruction have no
#             Pallas equivalent; re-implemented in numpy with a deterministic compact edge
#             enumeration (first real edge gets id 0) — dgl's exact edge ordering is not reproduced.
def _build_directed_edges(adj):
    n = adj.shape[0]
    edges = []
    for s in range(n):
        for d in range(n):
            if s != d and adj[s, d] != 0.0:
                edges.append((s, d, float(adj[s, d])))
    return edges


def _bfs(n, edges):
    out_adj = [[] for _ in range(n)]
    for eid, (s, d, _) in enumerate(edges):
        out_adj[s].append((d, eid))
    dist = -np.ones((n, n), dtype=np.int32)
    pred_node = -np.ones((n, n), dtype=np.int32)
    pred_eid = -np.ones((n, n), dtype=np.int32)
    for i in range(n):
        dist[i, i] = 0
        q = deque([i])
        while q:
            u = q.popleft()
            for (w, eid) in out_adj[u]:
                if dist[i, w] < 0:
                    dist[i, w] = dist[i, u] + 1
                    pred_node[i, w] = u
                    pred_eid[i, w] = eid
                    q.append(w)
    return dist, pred_node, pred_eid


def _path_edge_ids(i, j, pred_node, pred_eid):
    path, cur = [], j
    while cur != i and cur >= 0 and pred_node[i, cur] >= 0:
        path.append(int(pred_eid[i, cur]))
        cur = int(pred_node[i, cur])
    path.reverse()
    return path


def preprocess_graph(adj, edge_table_np, n_heads):
    """in-degrees, shortest hop distances, and path-based edge encoding (H, N, N)."""
    n = adj.shape[0]
    edges = _build_directed_edges(adj)
    weights = np.array([w for _, _, w in edges], dtype=np.float32)
    dist, pred_node, pred_eid = _bfs(n, edges)
    enc = np.zeros((n, n, n_heads), dtype=np.float32)
    for i in range(n):
        for j in range(1, n):
            path = _path_edge_ids(i, j, pred_node, pred_eid)
            if len(path) == 0:
                val = np.zeros((n_heads,), dtype=np.float32)
            else:
                emb = edge_table_np[np.asarray(path)]        # (Lpath, H)
                spd = weights[np.asarray(path)][:, None]     # (Lpath, 1)
                val = np.mean(emb * spd, axis=0)
            enc[i, j] = val
            enc[j, i] = val
    for i in range(n):
        enc[i, i] = 0.0
    in_deg = np.zeros((n,), dtype=np.int32)
    for _, d, _ in edges:
        in_deg[d] += 1
    return dist, in_deg, np.transpose(enc, (2, 0, 1))        # edge encoding permuted to (H, N, N)


# ---------------------------------------- host-side glue -----------------------------------------
def build_graph_inputs(adj_np, params):
    """Per-graph node features (N, D) and combined spatial+edge attention bias (H, N, N)."""
    edge_tbl_np = np.asarray(params["edge_encoder"])
    dist, in_deg, edge_enc = preprocess_graph(adj_np, edge_tbl_np, N_HEADS)
    degrees = np.clip(in_deg, 0, N_NODES - 1)
    centrality = params["centrality_encoding"][jnp.asarray(degrees)]            # (N, D)
    # dist == -1 (unreachable) maps to the padding_idx=-1 (last, zeroed) row as in torch;
    # a legitimate hop distance of N-1 aliases to that row too (same as the torch module).
    dist_idx = np.where(dist < 0, N_NODES - 1, np.clip(dist, 0, N_NODES - 1))
    spatial = params["spatial_encoding"][jnp.asarray(dist_idx)]                 # (N, N, H)
    spatial_hnn = jnp.transpose(spatial, (2, 0, 1))                             # (H, N, N)
    x = params["node_encoder"] + centrality                                     # node_encoder(arange)
    bias = spatial_hnn + jnp.asarray(edge_enc, dtype=jnp.float32)               # (H, N, N)
    return x, bias


def make_adjacency_batch(key, batch, n):
    """symmetric, zero-diag, connected (ring backbone), weighted adjacency matrices."""
    mats = []
    keys = jax.random.split(key, batch)
    for b in range(batch):
        k1, k2 = jax.random.split(keys[b])
        mask = (jax.random.uniform(k1, (n, n)) < 0.35).astype(jnp.float32)
        w = jax.random.uniform(k2, (n, n), minval=0.5, maxval=1.5)
        a = np.asarray(mask * w, dtype=np.float32)
        a = np.triu(a, 1)
        for i in range(n):
            j = (i + 1) % n
            lo, hi = min(i, j), max(i, j)
            if a[lo, hi] == 0.0:
                a[lo, hi] = 1.0
        a = a + a.T
        mats.append(a.astype(np.float32))
    return mats


if __name__ == "__main__":
    key = jax.random.PRNGKey(0)
    pkey, dkey = jax.random.split(key)
    params = init_params(pkey)
    slab_a, slab_b = pack_param_slabs(params)
    mats = make_adjacency_batch(dkey, BATCH, N_NODES)

    xs, biases = [], []
    for adj in mats:
        x, bias = build_graph_inputs(adj, params)
        xs.append(x)
        biases.append(bias)
    x_bnd = jnp.stack(xs)            # (B, N, D)
    bias_bhnn = jnp.stack(biases)    # (B, H, N, N)

    outputs, attentions = graphormer_forward_batch(x_bnd, bias_bhnn, slab_a, slab_b)
    jax.block_until_ready((outputs, attentions))

    assert outputs.shape == (BATCH, 4)
    assert attentions.shape == (BATCH, N_LAYERS, N_HEADS, N_NODES, N_NODES)
    assert bool(jnp.all(jnp.isfinite(outputs)))
    assert bool(jnp.all(jnp.isfinite(attentions)))
    # per-graph softmax rows must sum to 1 (validates the block-diagonal masking)
    assert bool(jnp.allclose(jnp.sum(attentions, axis=-1), 1.0, atol=1e-3))
    print("KERNEL_OK")
</pallas_src>

<mosaic_0001>
module attributes {stable_mosaic.version = 11 : i64} {
  func.func @graphormer_fused_kernel(%arg0: i32, %arg1: memref<1x32x32xf32, #tpu.memory_space<vmem>>, %arg2: memref<1x4x32x32xf32, #tpu.memory_space<vmem>>, %arg3: memref<424x32xf32, #tpu.memory_space<vmem>>, %arg4: memref<80x64xf32, #tpu.memory_space<vmem>>, %arg5: memref<1x4x4xf32, #tpu.memory_space<vmem>>, %arg6: memref<1x2x32x128xf32, #tpu.memory_space<vmem>>) attributes {dimension_semantics = [#tpu.dimension_semantics<parallel>], iteration_bounds = array<i64: 2>, scalar_prefetch = 0 : i64, scratch_operands = 0 : i64, tpu.core_type = #tpu.core_type<tc>, window_params = [{transform_indices = @transform_0, window_bounds = array<i64: 1, 32, 32>}, {transform_indices = @transform_1, window_bounds = array<i64: 1, 4, 32, 32>}, {pipeline_mode = #tpu.pipeline_mode<synchronous>, transform_indices = @transform_2, window_bounds = array<i64: 424, 32>}, {pipeline_mode = #tpu.pipeline_mode<synchronous>, transform_indices = @transform_3, window_bounds = array<i64: 80, 64>}, {transform_indices = @transform_4, window_bounds = array<i64: 1, 4, 4>}, {transform_indices = @transform_5, window_bounds = array<i64: 1, 2, 32, 128>}]} {
    %c0 = arith.constant 0 : index
    %c0_0 = arith.constant 0 : index
    %c0_1 = arith.constant 0 : index
    %0 = vector.load %arg1[%c0, %c0_0, %c0_1] : memref<1x32x32xf32, #tpu.memory_space<vmem>>, vector<1x32x32xf32>
    %1 = vector.shape_cast %0 : vector<1x32x32xf32> to vector<32x32xf32>
    %c192 = arith.constant 192 : index
    %c0_2 = arith.constant 0 : index
    %2 = vector.load %arg3[%c192, %c0_2] : memref<424x32xf32, #tpu.memory_space<vmem>>, vector<16x32xf32>
    %3 = vector.extract_strided_slice %2 {offsets = [0, 0], sizes = [1, 32], strides = [1, 1]} : vector<16x32xf32> to vector<1x32xf32>
    %4 = vector.extract_strided_slice %2 {offsets = [1, 0], sizes = [1, 32], strides = [1, 1]} : vector<16x32xf32> to vector<1x32xf32>
    %5 = vector.extract_strided_slice %2 {offsets = [2, 0], sizes = [1, 32], strides = [1, 1]} : vector<16x32xf32> to vector<1x32xf32>
    %6 = vector.extract_strided_slice %2 {offsets = [3, 0], sizes = [1, 32], strides = [1, 1]} : vector<16x32xf32> to vector<1x32xf32>
    %7 = vector.extract_strided_slice %2 {offsets = [4, 0], sizes = [1, 32], strides = [1, 1]} : vector<16x32xf32> to vector<1x32xf32>
    %8 = vector.extract_strided_slice %2 {offsets = [5, 0], sizes = [1, 32], strides = [1, 1]} : vector<16x32xf32> to vector<1x32xf32>
    %9 = vector.extract_strided_slice %2 {offsets = [6, 0], sizes = [1, 32], strides = [1, 1]} : vector<16x32xf32> to vector<1x32xf32>
    %10 = vector.extract_strided_slice %2 {offsets = [7, 0], sizes = [1, 32], strides = [1, 1]} : vector<16x32xf32> to vector<1x32xf32>
    %11 = vector.extract_strided_slice %2 {offsets = [8, 0], sizes = [1, 32], strides = [1, 1]} : vector<16x32xf32> to vector<1x32xf32>
    %cst = arith.constant dense<0.000000e+00> : vector<32xf32>
    %12 = vector.multi_reduction <add>, %1, %cst [1] : vector<32x32xf32> to vector<32xf32>
    %13 = vector.shape_cast %12 : vector<32xf32> to vector<32x1xf32>
    %cst_3 = arith.constant 3.200000e+01 : f32
    %14 = vector.broadcast %cst_3 : f32 to vector<32x1xf32>
    %15 = arith.divf %13, %14 : vector<32x1xf32>
    %16 = vector.broadcast %15 : vector<32x1xf32> to vector<32x32xf32>
    %17 = arith.subf %1, %16 : vector<32x32xf32>
    %18 = arith.mulf %17, %17 : vector<32x32xf32>
    %cst_4 = arith.constant dense<0.000000e+00> : vector<32xf32>
    %19 = vector.multi_reduction <add>, %18, %cst_4 [1] : vector<32x32xf32> to vector<32xf32>
    %20 = vector.shape_cast %19 : vector<32xf32> to vector<32x1xf32>
    %cst_5 = arith.constant 3.200000e+01 : f32
    %21 = vector.broadcast %cst_5 : f32 to vector<32x1xf32>
    %22 = arith.divf %20, %21 : vector<32x1xf32>
    %23 = vector.broadcast %15 : vector<32x1xf32> to vector<32x32xf32>
    %24 = arith.subf %1, %23 : vector<32x32xf32>
    %cst_6 = arith.constant 9.99999974E-6 : f32
    %25 = vector.broadcast %cst_6 : f32 to vector<32x1xf32>
    %26 = arith.addf %22, %25 : vector<32x1xf32>
    %27 = math.rsqrt %26 : vector<32x1xf32>
    %28 = vector.broadcast %27 : vector<32x1xf32> to vector<32x32xf32>
    %29 = arith.mulf %24, %28 : vector<32x32xf32>
    %30 = vector.broadcast %3 : vector<1x32xf32> to vector<32x32xf32>
    %31 = arith.mulf %29, %30 : vector<32x32xf32>
    %32 = vector.broadcast %4 : vector<1x32xf32> to vector<32x32xf32>
    %33 = arith.addf %31, %32 : vector<32x32xf32>
    %c0_7 = arith.constant 0 : index
    %c0_8 = arith.constant 0 : index
    %34 = vector.load %arg3[%c0_7, %c0_8] : memref<424x32xf32, #tpu.memory_space<vmem>>, vector<32x32xf32>
    %c32 = arith.constant 32 : index
    %c0_9 = arith.constant 0 : index
    %35 = vector.load %arg3[%c32, %c0_9] : memref<424x32xf32, #tpu.memory_space<vmem>>, vector<32x32xf32>
    %c64 = arith.constant 64 : index
    %c0_10 = arith.constant 0 : index
    %36 = vector.load %arg3[%c64, %c0_10] : memref<424x32xf32, #tpu.memory_space<vmem>>, vector<32x32xf32>
    %cst_11 = arith.constant dense<0.000000e+00> : vector<32x32xf32>
    %37 = tpu.matmul %33, %34, %cst_11 {dimension_numbers = #tpu.dot_dimension_numbers<[1], [0], [0], [1], [0, 0, 1, 1], [], []>} : vector<32x32xf32>, vector<32x32xf32>, vector<32x32xf32> -> vector<32x32xf32>
    %38 = vector.broadcast %5 : vector<1x32xf32> to vector<32x32xf32>
    %39 = arith.addf %37, %38 : vector<32x32xf32>
    %cst_12 = arith.constant dense<0.000000e+00> : vector<32x32xf32>
    %40 = tpu.matmul %33, %35, %cst_12 {dimension_numbers = #tpu.dot_dimension_numbers<[1], [0], [0], [1], [0, 0, 1, 1], [], []>} : vector<32x32xf32>, vector<32x32xf32>, vector<32x32xf32> -> vector<32x32xf32>
    %41 = vector.broadcast %6 : vector<1x32xf32> to vector<32x32xf32>
    %42 = arith.addf %40, %41 : vector<32x32xf32>
    %cst_13 = arith.constant dense<0.000000e+00> : vector<32x32xf32>
    %43 = tpu.matmul %33, %36, %cst_13 {dimension_numbers = #tpu.dot_dimension_numbers<[1], [0], [0], [1], [0, 0, 1, 1], [], []>} : vector<32x32xf32>, vector<32x32xf32>, vector<32x32xf32> -> vector<32x32xf32>
    %44 = vector.broadcast %7 : vector<1x32xf32> to vector<32x32xf32>
    %45 = arith.addf %43, %44 : vector<32x32xf32>
    %cst_14 = arith.constant 0.000000e+00 : f32
    %46 = vector.broadcast %cst_14 : f32 to vector<32x32xf32>
    %47 = vector.extract_strided_slice %39 {offsets = [0, 0], sizes = [32, 8], strides = [1, 1]} : vector<32x32xf32> to vector<32x8xf32>
    %48 = vector.extract_strided_slice %42 {offsets = [0, 0], sizes = [32, 8], strides = [1, 1]} : vector<32x32xf32> to vector<32x8xf32>
    %cst_15 = arith.constant dense<0.000000e+00> : vector<32x32xf32>
    %49 = tpu.matmul %47, %48, %cst_15 {dimension_numbers = #tpu.dot_dimension_numbers<[1], [1], [0], [0], [0, 0, 1, 0], [], []>} : vector<32x8xf32>, vector<32x8xf32>, vector<32x32xf32> -> vector<32x32xf32>
    %c0_16 = arith.constant 0 : index
    %c0_17 = arith.constant 0 : index
    %c0_18 = arith.constant 0 : index
    %c0_19 = arith.constant 0 : index
    %50 = vector.load %arg2[%c0_16, %c0_17, %c0_18, %c0_19] : memref<1x4x32x32xf32, #tpu.memory_space<vmem>>, vector<1x1x32x32xf32>
    %51 = vector.shape_cast %50 : vector<1x1x32x32xf32> to vector<32x32xf32>
    %52 = arith.addf %49, %51 : vector<32x32xf32>
    %cst_20 = arith.constant dense<0xFF800000> : vector<32xf32>
    %53 = vector.multi_reduction <maximumf>, %52, %cst_20 [1] : vector<32x32xf32> to vector<32xf32>
    %54 = vector.shape_cast %53 : vector<32xf32> to vector<32x1xf32>
    %55 = vector.broadcast %54 : vector<32x1xf32> to vector<32x32xf32>
    %56 = arith.subf %52, %55 : vector<32x32xf32>
    %57 = math.exp %56 : vector<32x32xf32>
    %cst_21 = arith.constant dense<0.000000e+00> : vector<32xf32>
    %58 = vector.multi_reduction <add>, %57, %cst_21 [1] : vector<32x32xf32> to vector<32xf32>
    %59 = vector.shape_cast %58 : vector<32xf32> to vector<32x1xf32>
    %60 = tpu.reciprocal %59 : vector<32x1xf32> -> vector<32x1xf32>
    %61 = vector.broadcast %60 : vector<32x1xf32> to vector<32x32xf32>
    %62 = arith.mulf %57, %61 : vector<32x32xf32>
    %c0_22 = arith.constant 0 : index
    %c0_23 = arith.constant 0 : index
    %c0_24 = arith.constant 0 : index
    %c0_25 = arith.constant 0 : index
    %63 = vector.load %arg6[%c0_22, %c0_23, %c0_24, %c0_25] : memref<1x2x32x128xf32, #tpu.memory_space<vmem>>, vector<1x1x32x32xf32>
    %64 = vector.shape_cast %63 : vector<1x1x32x32xf32> to vector<32x32xf32>
    %65 = vector.shape_cast %62 : vector<32x32xf32> to vector<1x1x32x32xf32>
    tpu.vector_store %arg6[%c0_22, %c0_23, %c0_24, %c0_25], %65 {strides = array<i32>} : memref<1x2x32x128xf32, #tpu.memory_space<vmem>>, vector<1x1x32x32xf32>,
    %66 = vector.extract_strided_slice %45 {offsets = [0, 0], sizes = [32, 8], strides = [1, 1]} : vector<32x32xf32> to vector<32x8xf32>
    %cst_26 = arith.constant dense<0.000000e+00> : vector<32x8xf32>
    %67 = tpu.matmul %62, %66, %cst_26 {dimension_numbers = #tpu.dot_dimension_numbers<[1], [0], [0], [1], [0, 0, 1, 1], [], []>} : vector<32x32xf32>, vector<32x8xf32>, vector<32x8xf32> -> vector<32x8xf32>
    %c96 = arith.constant 96 : index
    %c0_27 = arith.constant 0 : index
    %68 = vector.load %arg3[%c96, %c0_27] : memref<424x32xf32, #tpu.memory_space<vmem>>, vector<8x32xf32>
    %cst_28 = arith.constant dense<0.000000e+00> : vector<32x32xf32>
    %69 = tpu.matmul %67, %68, %cst_28 {dimension_numbers = #tpu.dot_dimension_numbers<[1], [0], [0], [1], [0, 0, 1, 1], [], []>} : vector<32x8xf32>, vector<8x32xf32>, vector<32x32xf32> -> vector<32x32xf32>
    %70 = arith.addf %46, %69 : vector<32x32xf32>
    %71 = vector.extract_strided_slice %39 {offsets = [0, 8], sizes = [32, 8], strides = [1, 1]} : vector<32x32xf32> to vector<32x8xf32>
    %72 = vector.extract_strided_slice %42 {offsets = [0, 8], sizes = [32, 8], strides = [1, 1]} : vector<32x32xf32> to vector<32x8xf32>
    %cst_29 = arith.constant dense<0.000000e+00> : vector<32x32xf32>
    %73 = tpu.matmul %71, %72, %cst_29 {dimension_numbers = #tpu.dot_dimension_numbers<[1], [1], [0], [0], [0, 0, 1, 0], [], []>} : vector<32x8xf32>, vector<32x8xf32>, vector<32x32xf32> -> vector<32x32xf32>
    %c0_30 = arith.constant 0 : index
    %c1 = arith.constant 1 : index
    %c0_31 = arith.constant 0 : index
    %c0_32 = arith.constant 0 : index
    %74 = vector.load %arg2[%c0_30, %c1, %c0_31, %c0_32] : memref<1x4x32x32xf32, #tpu.memory_space<vmem>>, vector<1x1x32x32xf32>
    %75 = vector.shape_cast %74 : vector<1x1x32x32xf32> to vector<32x32xf32>
    %76 = arith.addf %73, %75 : vector<32x32xf32>
    %cst_33 = arith.constant dense<0xFF800000> : vector<32xf32>
    %77 = vector.multi_reduction <maximumf>, %76, %cst_33 [1] : vector<32x32xf32> to vector<32xf32>
    %78 = vector.shape_cast %77 : vector<32xf32> to vector<32x1xf32>
    %79 = vector.broadcast %78 : vector<32x1xf32> to vector<32x32xf32>
    %80 = arith.subf %76, %79 : vector<32x32xf32>
    %81 = math.exp %80 : vector<32x32xf32>
    %cst_34 = arith.constant dense<0.000000e+00> : vector<32xf32>
    %82 = vector.multi_reduction <add>, %81, %cst_34 [1] : vector<32x32xf32> to vector<32xf32>
    %83 = vector.shape_cast %82 : vector<32xf32> to vector<32x1xf32>
    %84 = tpu.reciprocal %83 : vector<32x1xf32> -> vector<32x1xf32>
    %85 = vector.broadcast %84 : vector<32x1xf32> to vector<32x32xf32>
    %86 = arith.mulf %81, %85 : vector<32x32xf32>
    %c0_35 = arith.constant 0 : index
    %c0_36 = arith.constant 0 : index
    %c0_37 = arith.constant 0 : index
    %c32_38 = arith.constant 32 : index
    %87 = vector.load %arg6[%c0_35, %c0_36, %c0_37, %c32_38] : memref<1x2x32x128xf32, #tpu.memory_space<vmem>>, vector<1x1x32x32xf32>
    %88 = vector.shape_cast %87 : vector<1x1x32x32xf32> to vector<32x32xf32>
    %89 = vector.shape_cast %86 : vector<32x32xf32> to vector<1x1x32x32xf32>
    tpu.vector_store %arg6[%c0_35, %c0_36, %c0_37, %c32_38], %89 {strides = array<i32>} : memref<1x2x32x128xf32, #tpu.memory_space<vmem>>, vector<1x1x32x32xf32>,
    %90 = vector.extract_strided_slice %45 {offsets = [0, 8], sizes = [32, 8], strides = [1, 1]} : vector<32x32xf32> to vector<32x8xf32>
    %cst_39 = arith.constant dense<0.000000e+00> : vector<32x8xf32>
    %91 = tpu.matmul %86, %90, %cst_39 {dimension_numbers = #tpu.dot_dimension_numbers<[1], [0], [0], [1], [0, 0, 1, 1], [], []>} : vector<32x32xf32>, vector<32x8xf32>, vector<32x8xf32> -> vector<32x8xf32>
    %c104 = arith.constant 104 : index
    %c0_40 = arith.constant 0 : index
    %92 = vector.load %arg3[%c104, %c0_40] : memref<424x32xf32, #tpu.memory_space<vmem>>, vector<8x32xf32>
    %cst_41 = arith.constant dense<0.000000e+00> : vector<32x32xf32>
    %93 = tpu.matmul %91, %92, %cst_41 {dimension_numbers = #tpu.dot_dimension_numbers<[1], [0], [0], [1], [0, 0, 1, 1], [], []>} : vector<32x8xf32>, vector<8x32xf32>, vector<32x32xf32> -> vector<32x32xf32>
    %94 = arith.addf %70, %93 : vector<32x32xf32>
    %95 = vector.extract_strided_slice %39 {offsets = [0, 16], sizes = [32, 8], strides = [1, 1]} : vector<32x32xf32> to vector<32x8xf32>
    %96 = vector.extract_strided_slice %42 {offsets = [0, 16], sizes = [32, 8], strides = [1, 1]} : vector<32x32xf32> to vector<32x8xf32>
    %cst_42 = arith.constant dense<0.000000e+00> : vector<32x32xf32>
    %97 = tpu.matmul %95, %96, %cst_42 {dimension_numbers = #tpu.dot_dimension_numbers<[1], [1], [0], [0], [0, 0, 1, 0], [], []>} : vector<32x8xf32>, vector<32x8xf32>, vector<32x32xf32> -> vector<32x32xf32>
    %c0_43 = arith.constant 0 : index
    %c2 = arith.constant 2 : index
    %c0_44 = arith.constant 0 : index
    %c0_45 = arith.constant 0 : index
    %98 = vector.load %arg2[%c0_43, %c2, %c0_44, %c0_45] : memref<1x4x32x32xf32, #tpu.memory_space<vmem>>, vector<1x1x32x32xf32>
    %99 = vector.shape_cast %98 : vector<1x1x32x32xf32> to vector<32x32xf32>
    %100 = arith.addf %97, %99 : vector<32x32xf32>
    %cst_46 = arith.constant dense<0xFF800000> : vector<32xf32>
    %101 = vector.multi_reduction <maximumf>, %100, %cst_46 [1] : vector<32x32xf32> to vector<32xf32>
    %102 = vector.shape_cast %101 : vector<32xf32> to vector<32x1xf32>
    %103 = vector.broadcast %102 : vector<32x1xf32> to vector<32x32xf32>
    %104 = arith.subf %100, %103 : vector<32x32xf32>
    %105 = math.exp %104 : vector<32x32xf32>
    %cst_47 = arith.constant dense<0.000000e+00> : vector<32xf32>
    %106 = vector.multi_reduction <add>, %105, %cst_47 [1] : vector<32x32xf32> to vector<32xf32>
    %107 = vector.shape_cast %106 : vector<32xf32> to vector<32x1xf32>
    %108 = tpu.reciprocal %107 : vector<32x1xf32> -> vector<32x1xf32>
    %109 = vector.broadcast %108 : vector<32x1xf32> to vector<32x32xf32>
    %110 = arith.mulf %105, %109 : vector<32x32xf32>
    %c0_48 = arith.constant 0 : index
    %c0_49 = arith.constant 0 : index
    %c0_50 = arith.constant 0 : index
    %c64_51 = arith.constant 64 : index
    %111 = vector.load %arg6[%c0_48, %c0_49, %c0_50, %c64_51] : memref<1x2x32x128xf32, #tpu.memory_space<vmem>>, vector<1x1x32x32xf32>
    %112 = vector.shape_cast %111 : vector<1x1x32x32xf32> to vector<32x32xf32>
    %113 = vector.shape_cast %110 : vector<32x32xf32> to vector<1x1x32x32xf32>
    tpu.vector_store %arg6[%c0_48, %c0_49, %c0_50, %c64_51], %113 {strides = array<i32>} : memref<1x2x32x128xf32, #tpu.memory_space<vmem>>, vector<1x1x32x32xf32>,
    %114 = vector.extract_strided_slice %45 {offsets = [0, 16], sizes = [32, 8], strides = [1, 1]} : vector<32x32xf32> to vector<32x8xf32>
    %cst_52 = arith.constant dense<0.000000e+00> : vector<32x8xf32>
    %115 = tpu.matmul %110, %114, %cst_52 {dimension_numbers = #tpu.dot_dimension_numbers<[1], [0], [0], [1], [0, 0, 1, 1], [], []>} : vector<32x32xf32>, vector<32x8xf32>, vector<32x8xf32> -> vector<32x8xf32>
    %c112 = arith.constant 112 : index
    %c0_53 = arith.constant 0 : index
    %116 = vector.load %arg3[%c112, %c0_53] : memref<424x32xf32, #tpu.memory_space<vmem>>, vector<8x32xf32>
    %cst_54 = arith.constant dense<0.000000e+00> : vector<32x32xf32>
    %117 = tpu.matmul %115, %116, %cst_54 {dimension_numbers = #tpu.dot_dimension_numbers<[1], [0], [0], [1], [0, 0, 1, 1], [], []>} : vector<32x8xf32>, vector<8x32xf32>, vector<32x32xf32> -> vector<32x32xf32>
    %118 = arith.addf %94, %117 : vector<32x32xf32>
    %119 = vector.extract_strided_slice %39 {offsets = [0, 24], sizes = [32, 8], strides = [1, 1]} : vector<32x32xf32> to vector<32x8xf32>
    %120 = vector.extract_strided_slice %42 {offsets = [0, 24], sizes = [32, 8], strides = [1, 1]} : vector<32x32xf32> to vector<32x8xf32>
    %cst_55 = arith.constant dense<0.000000e+00> : vector<32x32xf32>
    %121 = tpu.matmul %119, %120, %cst_55 {dimension_numbers = #tpu.dot_dimension_numbers<[1], [1], [0], [0], [0, 0, 1, 0], [], []>} : vector<32x8xf32>, vector<32x8xf32>, vector<32x32xf32> -> vector<32x32xf32>
    %c0_56 = arith.constant 0 : index
    %c3 = arith.constant 3 : index
    %c0_57 = arith.constant 0 : index
    %c0_58 = arith.constant 0 : index
    %122 = vector.load %arg2[%c0_56, %c3, %c0_57, %c0_58] : memref<1x4x32x32xf32, #tpu.memory_space<vmem>>, vector<1x1x32x32xf32>
    %123 = vector.shape_cast %122 : vector<1x1x32x32xf32> to vector<32x32xf32>
    %124 = arith.addf %121, %123 : vector<32x32xf32>
    %cst_59 = arith.constant dense<0xFF800000> : vector<32xf32>
    %125 = vector.multi_reduction <maximumf>, %124, %cst_59 [1] : vector<32x32xf32> to vector<32xf32>
    %126 = vector.shape_cast %125 : vector<32xf32> to vector<32x1xf32>
    %127 = vector.broadcast %126 : vector<32x1xf32> to vector<32x32xf32>
    %128 = arith.subf %124, %127 : vector<32x32xf32>
    %129 = math.exp %128 : vector<32x32xf32>
    %cst_60 = arith.constant dense<0.000000e+00> : vector<32xf32>
    %130 = vector.multi_reduction <add>, %129, %cst_60 [1] : vector<32x32xf32> to vector<32xf32>
    %131 = vector.shape_cast %130 : vector<32xf32> to vector<32x1xf32>
    %132 = tpu.reciprocal %131 : vector<32x1xf32> -> vector<32x1xf32>
    %133 = vector.broadcast %132 : vector<32x1xf32> to vector<32x32xf32>
    %134 = arith.mulf %129, %133 : vector<32x32xf32>
    %c0_61 = arith.constant 0 : index
    %c0_62 = arith.constant 0 : index
    %c0_63 = arith.constant 0 : index
    %c96_64 = arith.constant 96 : index
    %135 = vector.load %arg6[%c0_61, %c0_62, %c0_63, %c96_64] : memref<1x2x32x128xf32, #tpu.memory_space<vmem>>, vector<1x1x32x32xf32>
    %136 = vector.shape_cast %135 : vector<1x1x32x32xf32> to vector<32x32xf32>
    %137 = vector.shape_cast %134 : vector<32x32xf32> to vector<1x1x32x32xf32>
    tpu.vector_store %arg6[%c0_61, %c0_62, %c0_63, %c96_64], %137 {strides = array<i32>} : memref<1x2x32x128xf32, #tpu.memory_space<vmem>>, vector<1x1x32x32xf32>,
    %138 = vector.extract_strided_slice %45 {offsets = [0, 24], sizes = [32, 8], strides = [1, 1]} : vector<32x32xf32> to vector<32x8xf32>
    %cst_65 = arith.constant dense<0.000000e+00> : vector<32x8xf32>
    %139 = tpu.matmul %134, %138, %cst_65 {dimension_numbers = #tpu.dot_dimension_numbers<[1], [0], [0], [1], [0, 0, 1, 1], [], []>} : vector<32x32xf32>, vector<32x8xf32>, vector<32x8xf32> -> vector<32x8xf32>
    %c120 = arith.constant 120 : index
    %c0_66 = arith.constant 0 : index
    %140 = vector.load %arg3[%c120, %c0_66] : memref<424x32xf32, #tpu.memory_space<vmem>>, vector<8x32xf32>
    %cst_67 = arith.constant dense<0.000000e+00> : vector<32x32xf32>
    %141 = tpu.matmul %139, %140, %cst_67 {dimension_numbers = #tpu.dot_dimension_numbers<[1], [0], [0], [1], [0, 0, 1, 1], [], []>} : vector<32x8xf32>, vector<8x32xf32>, vector<32x32xf32> -> vector<32x32xf32>
    %142 = arith.addf %118, %141 : vector<32x32xf32>
    %143 = arith.addf %1, %142 : vector<32x32xf32>
    %144 = vector.broadcast %8 : vector<1x32xf32> to vector<32x32xf32>
    %145 = arith.addf %143, %144 : vector<32x32xf32>
    %cst_68 = arith.constant dense<0.000000e+00> : vector<32xf32>
    %146 = vector.multi_reduction <add>, %145, %cst_68 [1] : vector<32x32xf32> to vector<32xf32>
    %147 = vector.shape_cast %146 : vector<32xf32> to vector<32x1xf32>
    %cst_69 = arith.constant 3.200000e+01 : f32
    %148 = vector.broadcast %cst_69 : f32 to vector<32x1xf32>
    %149 = arith.divf %147, %148 : vector<32x1xf32>
    %150 = vector.broadcast %149 : vector<32x1xf32> to vector<32x32xf32>
    %151 = arith.subf %145, %150 : vector<32x32xf32>
    %152 = arith.mulf %151, %151 : vector<32x32xf32>
    %cst_70 = arith.constant dense<0.000000e+00> : vector<32xf32>
    %153 = vector.multi_reduction <add>, %152, %cst_70 [1] : vector<32x32xf32> to vector<32xf32>
    %154 = vector.shape_cast %153 : vector<32xf32> to vector<32x1xf32>
    %cst_71 = arith.constant 3.200000e+01 : f32
    %155 = vector.broadcast %cst_71 : f32 to vector<32x1xf32>
    %156 = arith.divf %154, %155 : vector<32x1xf32>
    %157 = vector.broadcast %149 : vector<32x1xf32> to vector<32x32xf32>
    %158 = arith.subf %145, %157 : vector<32x32xf32>
    %cst_72 = arith.constant 9.99999974E-6 : f32
    %159 = vector.broadcast %cst_72 : f32 to vector<32x1xf32>
    %160 = arith.addf %156, %159 : vector<32x1xf32>
    %161 = math.rsqrt %160 : vector<32x1xf32>
    %162 = vector.broadcast %161 : vector<32x1xf32> to vector<32x32xf32>
    %163 = arith.mulf %158, %162 : vector<32x32xf32>
    %164 = vector.broadcast %9 : vector<1x32xf32> to vector<32x32xf32>
    %165 = arith.mulf %163, %164 : vector<32x32xf32>
    %166 = vector.broadcast %10 : vector<1x32xf32> to vector<32x32xf32>
    %167 = arith.addf %165, %166 : vector<32x32xf32>
    %c0_73 = arith.constant 0 : index
    %c0_74 = arith.constant 0 : index
    %168 = vector.load %arg4[%c0_73, %c0_74] : memref<80x64xf32, #tpu.memory_space<vmem>>, vector<32x64xf32>
    %c32_75 = arith.constant 32 : index
    %c0_76 = arith.constant 0 : index
    %169 = vector.load %arg4[%c32_75, %c0_76] : memref<80x64xf32, #tpu.memory_space<vmem>>, vector<1x64xf32>
    %cst_77 = arith.constant dense<0.000000e+00> : vector<32x64xf32>
    %170 = tpu.matmul %167, %168, %cst_77 {dimension_numbers = #tpu.dot_dimension_numbers<[1], [0], [0], [1], [0, 0, 1, 1], [], []>} : vector<32x32xf32>, vector<32x64xf32>, vector<32x64xf32> -> vector<32x64xf32>
    %171 = vector.broadcast %169 : vector<1x64xf32> to vector<32x64xf32>
    %172 = arith.addf %170, %171 : vector<32x64xf32>
    %cst_78 = arith.constant 5.000000e-01 : f32
    %173 = vector.broadcast %cst_78 : f32 to vector<32x64xf32>
    %174 = arith.mulf %173, %172 : vector<32x64xf32>
    %cst_79 = arith.constant 4.471500e-02 : f32
    %175 = vector.broadcast %cst_79 : f32 to vector<32x64xf32>
    %176 = arith.mulf %175, %172 : vector<32x64xf32>
    %177 = arith.mulf %176, %172 : vector<32x64xf32>
    %178 = arith.mulf %177, %172 : vector<32x64xf32>
    %179 = arith.addf %172, %178 : vector<32x64xf32>
    %cst_80 = arith.constant 0.797884583 : f32
    %180 = vector.broadcast %cst_80 : f32 to vector<32x64xf32>
    %181 = arith.mulf %180, %179 : vector<32x64xf32>
    %182 = math.tanh %181 : vector<32x64xf32>
    %cst_81 = arith.constant 1.000000e+00 : f32
    %183 = vector.broadcast %cst_81 : f32 to vector<32x64xf32>
    %184 = arith.addf %183, %182 : vector<32x64xf32>
    %185 = arith.mulf %174, %184 : vector<32x64xf32>
    %c128 = arith.constant 128 : index
    %c0_82 = arith.constant 0 : index
    %186 = vector.load %arg3[%c128, %c0_82] : memref<424x32xf32, #tpu.memory_space<vmem>>, vector<64x32xf32>
    %cst_83 = arith.constant dense<0.000000e+00> : vector<32x32xf32>
    %187 = tpu.matmul %185, %186, %cst_83 {dimension_numbers = #tpu.dot_dimension_numbers<[1], [0], [0], [1], [0, 0, 1, 1], [], []>} : vector<32x64xf32>, vector<64x32xf32>, vector<32x32xf32> -> vector<32x32xf32>
    %188 = arith.addf %145, %187 : vector<32x32xf32>
    %189 = vector.broadcast %11 : vector<1x32xf32> to vector<32x32xf32>
    %190 = arith.addf %188, %189 : vector<32x32xf32>
    %c400 = arith.constant 400 : index
    %c0_84 = arith.constant 0 : index
    %191 = vector.load %arg3[%c400, %c0_84] : memref<424x32xf32, #tpu.memory_space<vmem>>, vector<16x32xf32>
    %192 = vector.extract_strided_slice %191 {offsets = [0, 0], sizes = [1, 32], strides = [1, 1]} : vector<16x32xf32> to vector<1x32xf32>
    %193 = vector.extract_strided_slice %191 {offsets = [1, 0], sizes = [1, 32], strides = [1, 1]} : vector<16x32xf32> to vector<1x32xf32>
    %194 = vector.extract_strided_slice %191 {offsets = [2, 0], sizes = [1, 32], strides = [1, 1]} : vector<16x32xf32> to vector<1x32xf32>
    %195 = vector.extract_strided_slice %191 {offsets = [3, 0], sizes = [1, 32], strides = [1, 1]} : vector<16x32xf32> to vector<1x32xf32>
    %196 = vector.extract_strided_slice %191 {offsets = [4, 0], sizes = [1, 32], strides = [1, 1]} : vector<16x32xf32> to vector<1x32xf32>
    %197 = vector.extract_strided_slice %191 {offsets = [5, 0], sizes = [1, 32], strides = [1, 1]} : vector<16x32xf32> to vector<1x32xf32>
    %198 = vector.extract_strided_slice %191 {offsets = [6, 0], sizes = [1, 32], strides = [1, 1]} : vector<16x32xf32> to vector<1x32xf32>
    %199 = vector.extract_strided_slice %191 {offsets = [7, 0], sizes = [1, 32], strides = [1, 1]} : vector<16x32xf32> to vector<1x32xf32>
    %200 = vector.extract_strided_slice %191 {offsets = [8, 0], sizes = [1, 32], strides = [1, 1]} : vector<16x32xf32> to vector<1x32xf32>
    %cst_85 = arith.constant dense<0.000000e+00> : vector<32xf32>
    %201 = vector.multi_reduction <add>, %190, %cst_85 [1] : vector<32x32xf32> to vector<32xf32>
    %202 = vector.shape_cast %201 : vector<32xf32> to vector<32x1xf32>
    %cst_86 = arith.constant 3.200000e+01 : f32
    %203 = vector.broadcast %cst_86 : f32 to vector<32x1xf32>
    %204 = arith.divf %202, %203 : vector<32x1xf32>
    %205 = vector.broadcast %204 : vector<32x1xf32> to vector<32x32xf32>
    %206 = arith.subf %190, %205 : vector<32x32xf32>
    %207 = arith.mulf %206, %206 : vector<32x32xf32>
    %cst_87 = arith.constant dense<0.000000e+00> : vector<32xf32>
    %208 = vector.multi_reduction <add>, %207, %cst_87 [1] : vector<32x32xf32> to vector<32xf32>
    %209 = vector.shape_cast %208 : vector<32xf32> to vector<32x1xf32>
    %cst_88 = arith.constant 3.200000e+01 : f32
    %210 = vector.broadcast %cst_88 : f32 to vector<32x1xf32>
    %211 = arith.divf %209, %210 : vector<32x1xf32>
    %212 = vector.broadcast %204 : vector<32x1xf32> to vector<32x32xf32>
    %213 = arith.subf %190, %212 : vector<32x32xf32>
    %cst_89 = arith.constant 9.99999974E-6 : f32
    %214 = vector.broadcast %cst_89 : f32 to vector<32x1xf32>
    %215 = arith.addf %211, %214 : vector<32x1xf32>
    %216 = math.rsqrt %215 : vector<32x1xf32>
    %217 = vector.broadcast %216 : vector<32x1xf32> to vector<32x32xf32>
    %218 = arith.mulf %213, %217 : vector<32x32xf32>
    %219 = vector.broadcast %192 : vector<1x32xf32> to vector<32x32xf32>
    %220 = arith.mulf %218, %219 : vector<32x32xf32>
    %221 = vector.broadcast %193 : vector<1x32xf32> to vector<32x32xf32>
    %222 = arith.addf %220, %221 : vector<32x32xf32>
    %c208 = arith.constant 208 : index
    %c0_90 = arith.constant 0 : index
    %223 = vector.load %arg3[%c208, %c0_90] : memref<424x32xf32, #tpu.memory_space<vmem>>, vector<32x32xf32>
    %c240 = arith.constant 240 : index
    %c0_91 = arith.constant 0 : index
    %224 = vector.load %arg3[%c240, %c0_91] : memref<424x32xf32, #tpu.memory_space<vmem>>, vector<32x32xf32>
    %c272 = arith.constant 272 : index
    %c0_92 = arith.constant 0 : index
    %225 = vector.load %arg3[%c272, %c0_92] : memref<424x32xf32, #tpu.memory_space<vmem>>, vector<32x32xf32>
    %cst_93 = arith.constant dense<0.000000e+00> : vector<32x32xf32>
    %226 = tpu.matmul %222, %223, %cst_93 {dimension_numbers = #tpu.dot_dimension_numbers<[1], [0], [0], [1], [0, 0, 1, 1], [], []>} : vector<32x32xf32>, vector<32x32xf32>, vector<32x32xf32> -> vector<32x32xf32>
    %227 = vector.broadcast %194 : vector<1x32xf32> to vector<32x32xf32>
    %228 = arith.addf %226, %227 : vector<32x32xf32>
    %cst_94 = arith.constant dense<0.000000e+00> : vector<32x32xf32>
    %229 = tpu.matmul %222, %224, %cst_94 {dimension_numbers = #tpu.dot_dimension_numbers<[1], [0], [0], [1], [0, 0, 1, 1], [], []>} : vector<32x32xf32>, vector<32x32xf32>, vector<32x32xf32> -> vector<32x32xf32>
    %230 = vector.broadcast %195 : vector<1x32xf32> to vector<32x32xf32>
    %231 = arith.addf %229, %230 : vector<32x32xf32>
    %cst_95 = arith.constant dense<0.000000e+00> : vector<32x32xf32>
    %232 = tpu.matmul %222, %225, %cst_95 {dimension_numbers = #tpu.dot_dimension_numbers<[1], [0], [0], [1], [0, 0, 1, 1], [], []>} : vector<32x32xf32>, vector<32x32xf32>, vector<32x32xf32> -> vector<32x32xf32>
    %233 = vector.broadcast %196 : vector<1x32xf32> to vector<32x32xf32>
    %234 = arith.addf %232, %233 : vector<32x32xf32>
    %cst_96 = arith.constant 0.000000e+00 : f32
    %235 = vector.broadcast %cst_96 : f32 to vector<32x32xf32>
    %236 = vector.extract_strided_slice %228 {offsets = [0, 0], sizes = [32, 8], strides = [1, 1]} : vector<32x32xf32> to vector<32x8xf32>
    %237 = vector.extract_strided_slice %231 {offsets = [0, 0], sizes = [32, 8], strides = [1, 1]} : vector<32x32xf32> to vector<32x8xf32>
    %cst_97 = arith.constant dense<0.000000e+00> : vector<32x32xf32>
    %238 = tpu.matmul %236, %237, %cst_97 {dimension_numbers = #tpu.dot_dimension_numbers<[1], [1], [0], [0], [0, 0, 1, 0], [], []>} : vector<32x8xf32>, vector<32x8xf32>, vector<32x32xf32> -> vector<32x32xf32>
    %c0_98 = arith.constant 0 : index
    %c0_99 = arith.constant 0 : index
    %c0_100 = arith.constant 0 : index
    %c0_101 = arith.constant 0 : index
    %239 = vector.load %arg2[%c0_98, %c0_99, %c0_100, %c0_101] : memref<1x4x32x32xf32, #tpu.memory_space<vmem>>, vector<1x1x32x32xf32>
    %240 = vector.shape_cast %239 : vector<1x1x32x32xf32> to vector<32x32xf32>
    %241 = arith.addf %238, %240 : vector<32x32xf32>
    %cst_102 = arith.constant dense<0xFF800000> : vector<32xf32>
    %242 = vector.multi_reduction <maximumf>, %241, %cst_102 [1] : vector<32x32xf32> to vector<32xf32>
    %243 = vector.shape_cast %242 : vector<32xf32> to vector<32x1xf32>
    %244 = vector.broadcast %243 : vector<32x1xf32> to vector<32x32xf32>
    %245 = arith.subf %241, %244 : vector<32x32xf32>
    %246 = math.exp %245 : vector<32x32xf32>
    %cst_103 = arith.constant dense<0.000000e+00> : vector<32xf32>
    %247 = vector.multi_reduction <add>, %246, %cst_103 [1] : vector<32x32xf32> to vector<32xf32>
    %248 = vector.shape_cast %247 : vector<32xf32> to vector<32x1xf32>
    %249 = tpu.reciprocal %248 : vector<32x1xf32> -> vector<32x1xf32>
    %250 = vector.broadcast %249 : vector<32x1xf32> to vector<32x32xf32>
    %251 = arith.mulf %246, %250 : vector<32x32xf32>
    %c0_104 = arith.constant 0 : index
    %c1_105 = arith.constant 1 : index
    %c0_106 = arith.constant 0 : index
    %c0_107 = arith.constant 0 : index
    %252 = vector.load %arg6[%c0_104, %c1_105, %c0_106, %c0_107] : memref<1x2x32x128xf32, #tpu.memory_space<vmem>>, vector<1x1x32x32xf32>
    %253 = vector.shape_cast %252 : vector<1x1x32x32xf32> to vector<32x32xf32>
    %254 = vector.shape_cast %251 : vector<32x32xf32> to vector<1x1x32x32xf32>
    tpu.vector_store %arg6[%c0_104, %c1_105, %c0_106, %c0_107], %254 {strides = array<i32>} : memref<1x2x32x128xf32, #tpu.memory_space<vmem>>, vector<1x1x32x32xf32>,
    %255 = vector.extract_strided_slice %234 {offsets = [0, 0], sizes = [32, 8], strides = [1, 1]} : vector<32x32xf32> to vector<32x8xf32>
    %cst_108 = arith.constant dense<0.000000e+00> : vector<32x8xf32>
    %256 = tpu.matmul %251, %255, %cst_108 {dimension_numbers = #tpu.dot_dimension_numbers<[1], [0], [0], [1], [0, 0, 1, 1], [], []>} : vector<32x32xf32>, vector<32x8xf32>, vector<32x8xf32> -> vector<32x8xf32>
    %c304 = arith.constant 304 : index
    %c0_109 = arith.constant 0 : index
    %257 = vector.load %arg3[%c304, %c0_109] : memref<424x32xf32, #tpu.memory_space<vmem>>, vector<8x32xf32>
    %cst_110 = arith.constant dense<0.000000e+00> : vector<32x32xf32>
    %258 = tpu.matmul %256, %257, %cst_110 {dimension_numbers = #tpu.dot_dimension_numbers<[1], [0], [0], [1], [0, 0, 1, 1], [], []>} : vector<32x8xf32>, vector<8x32xf32>, vector<32x32xf32> -> vector<32x32xf32>
    %259 = arith.addf %235, %258 : vector<32x32xf32>
    %260 = vector.extract_strided_slice %228 {offsets = [0, 8], sizes = [32, 8], strides = [1, 1]} : vector<32x32xf32> to vector<32x8xf32>
    %261 = vector.extract_strided_slice %231 {offsets = [0, 8], sizes = [32, 8], strides = [1, 1]} : vector<32x32xf32> to vector<32x8xf32>
    %cst_111 = arith.constant dense<0.000000e+00> : vector<32x32xf32>
    %262 = tpu.matmul %260, %261, %cst_111 {dimension_numbers = #tpu.dot_dimension_numbers<[1], [1], [0], [0], [0, 0, 1, 0], [], []>} : vector<32x8xf32>, vector<32x8xf32>, vector<32x32xf32> -> vector<32x32xf32>
    %c0_112 = arith.constant 0 : index
    %c1_113 = arith.constant 1 : index
    %c0_114 = arith.constant 0 : index
    %c0_115 = arith.constant 0 : index
    %263 = vector.load %arg2[%c0_112, %c1_113, %c0_114, %c0_115] : memref<1x4x32x32xf32, #tpu.memory_space<vmem>>, vector<1x1x32x32xf32>
    %264 = vector.shape_cast %263 : vector<1x1x32x32xf32> to vector<32x32xf32>
    %265 = arith.addf %262, %264 : vector<32x32xf32>
    %cst_116 = arith.constant dense<0xFF800000> : vector<32xf32>
    %266 = vector.multi_reduction <maximumf>, %265, %cst_116 [1] : vector<32x32xf32> to vector<32xf32>
    %267 = vector.shape_cast %266 : vector<32xf32> to vector<32x1xf32>
    %268 = vector.broadcast %267 : vector<32x1xf32> to vector<32x32xf32>
    %269 = arith.subf %265, %268 : vector<32x32xf32>
    %270 = math.exp %269 : vector<32x32xf32>
    %cst_117 = arith.constant dense<0.000000e+00> : vector<32xf32>
    %271 = vector.multi_reduction <add>, %270, %cst_117 [1] : vector<32x32xf32> to vector<32xf32>
    %272 = vector.shape_cast %271 : vector<32xf32> to vector<32x1xf32>
    %273 = tpu.reciprocal %272 : vector<32x1xf32> -> vector<32x1xf32>
    %274 = vector.broadcast %273 : vector<32x1xf32> to vector<32x32xf32>
    %275 = arith.mulf %270, %274 : vector<32x32xf32>
    %c0_118 = arith.constant 0 : index
    %c1_119 = arith.constant 1 : index
    %c0_120 = arith.constant 0 : index
    %c32_121 = arith.constant 32 : index
    %276 = vector.load %arg6[%c0_118, %c1_119, %c0_120, %c32_121] : memref<1x2x32x128xf32, #tpu.memory_space<vmem>>, vector<1x1x32x32xf32>
    %277 = vector.shape_cast %276 : vector<1x1x32x32xf32> to vector<32x32xf32>
    %278 = vector.shape_cast %275 : vector<32x32xf32> to vector<1x1x32x32xf32>
    tpu.vector_store %arg6[%c0_118, %c1_119, %c0_120, %c32_121], %278 {strides = array<i32>} : memref<1x2x32x128xf32, #tpu.memory_space<vmem>>, vector<1x1x32x32xf32>,
    %279 = vector.extract_strided_slice %234 {offsets = [0, 8], sizes = [32, 8], strides = [1, 1]} : vector<32x32xf32> to vector<32x8xf32>
    %cst_122 = arith.constant dense<0.000000e+00> : vector<32x8xf32>
    %280 = tpu.matmul %275, %279, %cst_122 {dimension_numbers = #tpu.dot_dimension_numbers<[1], [0], [0], [1], [0, 0, 1, 1], [], []>} : vector<32x32xf32>, vector<32x8xf32>, vector<32x8xf32> -> vector<32x8xf32>
    %c312 = arith.constant 312 : index
    %c0_123 = arith.constant 0 : index
    %281 = vector.load %arg3[%c312, %c0_123] : memref<424x32xf32, #tpu.memory_space<vmem>>, vector<8x32xf32>
    %cst_124 = arith.constant dense<0.000000e+00> : vector<32x32xf32>
    %282 = tpu.matmul %280, %281, %cst_124 {dimension_numbers = #tpu.dot_dimension_numbers<[1], [0], [0], [1], [0, 0, 1, 1], [], []>} : vector<32x8xf32>, vector<8x32xf32>, vector<32x32xf32> -> vector<32x32xf32>
    %283 = arith.addf %259, %282 : vector<32x32xf32>
    %284 = vector.extract_strided_slice %228 {offsets = [0, 16], sizes = [32, 8], strides = [1, 1]} : vector<32x32xf32> to vector<32x8xf32>
    %285 = vector.extract_strided_slice %231 {offsets = [0, 16], sizes = [32, 8], strides = [1, 1]} : vector<32x32xf32> to vector<32x8xf32>
    %cst_125 = arith.constant dense<0.000000e+00> : vector<32x32xf32>
    %286 = tpu.matmul %284, %285, %cst_125 {dimension_numbers = #tpu.dot_dimension_numbers<[1], [1], [0], [0], [0, 0, 1, 0], [], []>} : vector<32x8xf32>, vector<32x8xf32>, vector<32x32xf32> -> vector<32x32xf32>
    %c0_126 = arith.constant 0 : index
    %c2_127 = arith.constant 2 : index
    %c0_128 = arith.constant 0 : index
    %c0_129 = arith.constant 0 : index
    %287 = vector.load %arg2[%c0_126, %c2_127, %c0_128, %c0_129] : memref<1x4x32x32xf32, #tpu.memory_space<vmem>>, vector<1x1x32x32xf32>
    %288 = vector.shape_cast %287 : vector<1x1x32x32xf32> to vector<32x32xf32>
    %289 = arith.addf %286, %288 : vector<32x32xf32>
    %cst_130 = arith.constant dense<0xFF800000> : vector<32xf32>
    %290 = vector.multi_reduction <maximumf>, %289, %cst_130 [1] : vector<32x32xf32> to vector<32xf32>
    %291 = vector.shape_cast %290 : vector<32xf32> to vector<32x1xf32>
    %292 = vector.broadcast %291 : vector<32x1xf32> to vector<32x32xf32>
    %293 = arith.subf %289, %292 : vector<32x32xf32>
    %294 = math.exp %293 : vector<32x32xf32>
    %cst_131 = arith.constant dense<0.000000e+00> : vector<32xf32>
    %295 = vector.multi_reduction <add>, %294, %cst_131 [1] : vector<32x32xf32> to vector<32xf32>
    %296 = vector.shape_cast %295 : vector<32xf32> to vector<32x1xf32>
    %297 = tpu.reciprocal %296 : vector<32x1xf32> -> vector<32x1xf32>
    %298 = vector.broadcast %297 : vector<32x1xf32> to vector<32x32xf32>
    %299 = arith.mulf %294, %298 : vector<32x32xf32>
    %c0_132 = arith.constant 0 : index
    %c1_133 = arith.constant 1 : index
    %c0_134 = arith.constant 0 : index
    %c64_135 = arith.constant 64 : index
    %300 = vector.load %arg6[%c0_132, %c1_133, %c0_134, %c64_135] : memref<1x2x32x128xf32, #tpu.memory_space<vmem>>, vector<1x1x32x32xf32>
    %301 = vector.shape_cast %300 : vector<1x1x32x32xf32> to vector<32x32xf32>
    %302 = vector.shape_cast %299 : vector<32x32xf32> to vector<1x1x32x32xf32>
    tpu.vector_store %arg6[%c0_132, %c1_133, %c0_134, %c64_135], %302 {strides = array<i32>} : memref<1x2x32x128xf32, #tpu.memory_space<vmem>>, vector<1x1x32x32xf32>,
    %303 = vector.extract_strided_slice %234 {offsets = [0, 16], sizes = [32, 8], strides = [1, 1]} : vector<32x32xf32> to vector<32x8xf32>
    %cst_136 = arith.constant dense<0.000000e+00> : vector<32x8xf32>
    %304 = tpu.matmul %299, %303, %cst_136 {dimension_numbers = #tpu.dot_dimension_numbers<[1], [0], [0], [1], [0, 0, 1, 1], [], []>} : vector<32x32xf32>, vector<32x8xf32>, vector<32x8xf32> -> vector<32x8xf32>
    %c320 = arith.constant 320 : index
    %c0_137 = arith.constant 0 : index
    %305 = vector.load %arg3[%c320, %c0_137] : memref<424x32xf32, #tpu.memory_space<vmem>>, vector<8x32xf32>
    %cst_138 = arith.constant dense<0.000000e+00> : vector<32x32xf32>
    %306 = tpu.matmul %304, %305, %cst_138 {dimension_numbers = #tpu.dot_dimension_numbers<[1], [0], [0], [1], [0, 0, 1, 1], [], []>} : vector<32x8xf32>, vector<8x32xf32>, vector<32x32xf32> -> vector<32x32xf32>
    %307 = arith.addf %283, %306 : vector<32x32xf32>
    %308 = vector.extract_strided_slice %228 {offsets = [0, 24], sizes = [32, 8], strides = [1, 1]} : vector<32x32xf32> to vector<32x8xf32>
    %309 = vector.extract_strided_slice %231 {offsets = [0, 24], sizes = [32, 8], strides = [1, 1]} : vector<32x32xf32> to vector<32x8xf32>
    %cst_139 = arith.constant dense<0.000000e+00> : vector<32x32xf32>
    %310 = tpu.matmul %308, %309, %cst_139 {dimension_numbers = #tpu.dot_dimension_numbers<[1], [1], [0], [0], [0, 0, 1, 0], [], []>} : vector<32x8xf32>, vector<32x8xf32>, vector<32x32xf32> -> vector<32x32xf32>
    %c0_140 = arith.constant 0 : index
    %c3_141 = arith.constant 3 : index
    %c0_142 = arith.constant 0 : index
    %c0_143 = arith.constant 0 : index
    %311 = vector.load %arg2[%c0_140, %c3_141, %c0_142, %c0_143] : memref<1x4x32x32xf32, #tpu.memory_space<vmem>>, vector<1x1x32x32xf32>
    %312 = vector.shape_cast %311 : vector<1x1x32x32xf32> to vector<32x32xf32>
    %313 = arith.addf %310, %312 : vector<32x32xf32>
    %cst_144 = arith.constant dense<0xFF800000> : vector<32xf32>
    %314 = vector.multi_reduction <maximumf>, %313, %cst_144 [1] : vector<32x32xf32> to vector<32xf32>
    %315 = vector.shape_cast %314 : vector<32xf32> to vector<32x1xf32>
    %316 = vector.broadcast %315 : vector<32x1xf32> to vector<32x32xf32>
    %317 = arith.subf %313, %316 : vector<32x32xf32>
    %318 = math.exp %317 : vector<32x32xf32>
    %cst_145 = arith.constant dense<0.000000e+00> : vector<32xf32>
    %319 = vector.multi_reduction <add>, %318, %cst_145 [1] : vector<32x32xf32> to vector<32xf32>
    %320 = vector.shape_cast %319 : vector<32xf32> to vector<32x1xf32>
    %321 = tpu.reciprocal %320 : vector<32x1xf32> -> vector<32x1xf32>
    %322 = vector.broadcast %321 : vector<32x1xf32> to vector<32x32xf32>
    %323 = arith.mulf %318, %322 : vector<32x32xf32>
    %c0_146 = arith.constant 0 : index
    %c1_147 = arith.constant 1 : index
    %c0_148 = arith.constant 0 : index
    %c96_149 = arith.constant 96 : index
    %324 = vector.load %arg6[%c0_146, %c1_147, %c0_148, %c96_149] : memref<1x2x32x128xf32, #tpu.memory_space<vmem>>, vector<1x1x32x32xf32>
    %325 = vector.shape_cast %324 : vector<1x1x32x32xf32> to vector<32x32xf32>
    %326 = vector.shape_cast %323 : vector<32x32xf32> to vector<1x1x32x32xf32>
    tpu.vector_store %arg6[%c0_146, %c1_147, %c0_148, %c96_149], %326 {strides = array<i32>} : memref<1x2x32x128xf32, #tpu.memory_space<vmem>>, vector<1x1x32x32xf32>,
    %327 = vector.extract_strided_slice %234 {offsets = [0, 24], sizes = [32, 8], strides = [1, 1]} : vector<32x32xf32> to vector<32x8xf32>
    %cst_150 = arith.constant dense<0.000000e+00> : vector<32x8xf32>
    %328 = tpu.matmul %323, %327, %cst_150 {dimension_numbers = #tpu.dot_dimension_numbers<[1], [0], [0], [1], [0, 0, 1, 1], [], []>} : vector<32x32xf32>, vector<32x8xf32>, vector<32x8xf32> -> vector<32x8xf32>
    %c328 = arith.constant 328 : index
    %c0_151 = arith.constant 0 : index
    %329 = vector.load %arg3[%c328, %c0_151] : memref<424x32xf32, #tpu.memory_space<vmem>>, vector<8x32xf32>
    %cst_152 = arith.constant dense<0.000000e+00> : vector<32x32xf32>
    %330 = tpu.matmul %328, %329, %cst_152 {dimension_numbers = #tpu.dot_dimension_numbers<[1], [0], [0], [1], [0, 0, 1, 1], [], []>} : vector<32x8xf32>, vector<8x32xf32>, vector<32x32xf32> -> vector<32x32xf32>
    %331 = arith.addf %307, %330 : vector<32x32xf32>
    %332 = arith.addf %190, %331 : vector<32x32xf32>
    %333 = vector.broadcast %197 : vector<1x32xf32> to vector<32x32xf32>
    %334 = arith.addf %332, %333 : vector<32x32xf32>
    %cst_153 = arith.constant dense<0.000000e+00> : vector<32xf32>
    %335 = vector.multi_reduction <add>, %334, %cst_153 [1] : vector<32x32xf32> to vector<32xf32>
    %336 = vector.shape_cast %335 : vector<32xf32> to vector<32x1xf32>
    %cst_154 = arith.constant 3.200000e+01 : f32
    %337 = vector.broadcast %cst_154 : f32 to vector<32x1xf32>
    %338 = arith.divf %336, %337 : vector<32x1xf32>
    %339 = vector.broadcast %338 : vector<32x1xf32> to vector<32x32xf32>
    %340 = arith.subf %334, %339 : vector<32x32xf32>
    %341 = arith.mulf %340, %340 : vector<32x32xf32>
    %cst_155 = arith.constant dense<0.000000e+00> : vector<32xf32>
    %342 = vector.multi_reduction <add>, %341, %cst_155 [1] : vector<32x32xf32> to vector<32xf32>
    %343 = vector.shape_cast %342 : vector<32xf32> to vector<32x1xf32>
    %cst_156 = arith.constant 3.200000e+01 : f32
    %344 = vector.broadcast %cst_156 : f32 to vector<32x1xf32>
    %345 = arith.divf %343, %344 : vector<32x1xf32>
    %346 = vector.broadcast %338 : vector<32x1xf32> to vector<32x32xf32>
    %347 = arith.subf %334, %346 : vector<32x32xf32>
    %cst_157 = arith.constant 9.99999974E-6 : f32
    %348 = vector.broadcast %cst_157 : f32 to vector<32x1xf32>
    %349 = arith.addf %345, %348 : vector<32x1xf32>
    %350 = math.rsqrt %349 : vector<32x1xf32>
    %351 = vector.broadcast %350 : vector<32x1xf32> to vector<32x32xf32>
    %352 = arith.mulf %347, %351 : vector<32x32xf32>
    %353 = vector.broadcast %198 : vector<1x32xf32> to vector<32x32xf32>
    %354 = arith.mulf %352, %353 : vector<32x32xf32>
    %355 = vector.broadcast %199 : vector<1x32xf32> to vector<32x32xf32>
    %356 = arith.addf %354, %355 : vector<32x32xf32>
    %c40 = arith.constant 40 : index
    %c0_158 = arith.constant 0 : index
    %357 = vector.load %arg4[%c40, %c0_158] : memref<80x64xf32, #tpu.memory_space<vmem>>, vector<32x64xf32>
    %c72 = arith.constant 72 : index
    %c0_159 = arith.constant 0 : index
    %358 = vector.load %arg4[%c72, %c0_159] : memref<80x64xf32, #tpu.memory_space<vmem>>, vector<1x64xf32>
    %cst_160 = arith.constant dense<0.000000e+00> : vector<32x64xf32>
    %359 = tpu.matmul %356, %357, %cst_160 {dimension_numbers = #tpu.dot_dimension_numbers<[1], [0], [0], [1], [0, 0, 1, 1], [], []>} : vector<32x32xf32>, vector<32x64xf32>, vector<32x64xf32> -> vector<32x64xf32>
    %360 = vector.broadcast %358 : vector<1x64xf32> to vector<32x64xf32>
    %361 = arith.addf %359, %360 : vector<32x64xf32>
    %cst_161 = arith.constant 5.000000e-01 : f32
    %362 = vector.broadcast %cst_161 : f32 to vector<32x64xf32>
    %363 = arith.mulf %362, %361 : vector<32x64xf32>
    %cst_162 = arith.constant 4.471500e-02 : f32
    %364 = vector.broadcast %cst_162 : f32 to vector<32x64xf32>
    %365 = arith.mulf %364, %361 : vector<32x64xf32>
    %366 = arith.mulf %365, %361 : vector<32x64xf32>
    %367 = arith.mulf %366, %361 : vector<32x64xf32>
    %368 = arith.addf %361, %367 : vector<32x64xf32>
    %cst_163 = arith.constant 0.797884583 : f32
    %369 = vector.broadcast %cst_163 : f32 to vector<32x64xf32>
    %370 = arith.mulf %369, %368 : vector<32x64xf32>
    %371 = math.tanh %370 : vector<32x64xf32>
    %cst_164 = arith.constant 1.000000e+00 : f32
    %372 = vector.broadcast %cst_164 : f32 to vector<32x64xf32>
    %373 = arith.addf %372, %371 : vector<32x64xf32>
    %374 = arith.mulf %363, %373 : vector<32x64xf32>
    %c336 = arith.constant 336 : index
    %c0_165 = arith.constant 0 : index
    %375 = vector.load %arg3[%c336, %c0_165] : memref<424x32xf32, #tpu.memory_space<vmem>>, vector<64x32xf32>
    %cst_166 = arith.constant dense<0.000000e+00> : vector<32x32xf32>
    %376 = tpu.matmul %374, %375, %cst_166 {dimension_numbers = #tpu.dot_dimension_numbers<[1], [0], [0], [1], [0, 0, 1, 1], [], []>} : vector<32x64xf32>, vector<64x32xf32>, vector<32x32xf32> -> vector<32x32xf32>
    %377 = arith.addf %334, %376 : vector<32x32xf32>
    %378 = vector.broadcast %200 : vector<1x32xf32> to vector<32x32xf32>
    %379 = arith.addf %377, %378 : vector<32x32xf32>
    %c416 = arith.constant 416 : index
    %c0_167 = arith.constant 0 : index
    %380 = vector.load %arg3[%c416, %c0_167] : memref<424x32xf32, #tpu.memory_space<vmem>>, vector<8x32xf32>
    %381 = vector.extract_strided_slice %380 {offsets = [0, 0], sizes = [4, 32], strides = [1, 1]} : vector<8x32xf32> to vector<4x32xf32>
    %382 = vector.extract_strided_slice %380 {offsets = [4, 0], sizes = [1, 4], strides = [1, 1]} : vector<8x32xf32> to vector<1x4xf32>
    %383 = tpu.iota {dimensions = array<i32: 0>} : vector<4x32xi32>
    %384 = tpu.iota {dimensions = array<i32: 1>} : vector<4x32xi32>
    %c8_i32 = arith.constant 8 : i32
    %385 = vector.broadcast %c8_i32 : i32 to vector<4x32xi32>
    %386 = arith.muli %383, %385 : vector<4x32xi32>
    %387 = arith.cmpi sge, %384, %386 : vector<4x32xi32>
    %c8_i32_168 = arith.constant 8 : i32
    %388 = vector.broadcast %c8_i32_168 : i32 to vector<4x32xi32>
    %389 = arith.addi %386, %388 : vector<4x32xi32>
    %390 = arith.cmpi slt, %384, %389 : vector<4x32xi32>
    %391 = arith.andi %387, %390 : vector<4x32xi1>
    %cst_169 = arith.constant 1.250000e-01 : f32
    %cst_170 = arith.constant 0.000000e+00 : f32
    %392 = vector.broadcast %cst_169 : f32 to vector<4x32xf32>
    %393 = vector.broadcast %cst_170 : f32 to vector<4x32xf32>
    %394 = arith.select %391, %392, %393 : vector<4x32xi1>, vector<4x32xf32>
    %cst_171 = arith.constant dense<0.000000e+00> : vector<4x32xf32>
    %395 = tpu.matmul %394, %379, %cst_171 {dimension_numbers = #tpu.dot_dimension_numbers<[1], [0], [0], [1], [0, 0, 1, 1], [], []>} : vector<4x32xf32>, vector<32x32xf32>, vector<4x32xf32> -> vector<4x32xf32>
    %cst_172 = arith.constant dense<0.000000e+00> : vector<4x4xf32>
    %396 = tpu.matmul %395, %381, %cst_172 {dimension_numbers = #tpu.dot_dimension_numbers<[1], [1], [0], [0], [0, 0, 1, 0], [], []>} : vector<4x32xf32>, vector<4x32xf32>, vector<4x4xf32> -> vector<4x4xf32>
    %397 = vector.broadcast %382 : vector<1x4xf32> to vector<4x4xf32>
    %398 = arith.addf %396, %397 : vector<4x4xf32>
    %c0_173 = arith.constant 0 : index
    %c0_174 = arith.constant 0 : index
    %c0_175 = arith.constant 0 : index
    %399 = vector.load %arg5[%c0_173, %c0_174, %c0_175] : memref<1x4x4xf32, #tpu.memory_space<vmem>>, vector<1x4x4xf32>
    %400 = vector.shape_cast %399 : vector<1x4x4xf32> to vector<4x4xf32>
    %401 = vector.shape_cast %398 : vector<4x4xf32> to vector<1x4x4xf32>
    tpu.vector_store %arg5[%c0_173, %c0_174, %c0_175], %401 {strides = array<i32>} : memref<1x4x4xf32, #tpu.memory_space<vmem>>, vector<1x4x4xf32>,
    return
  }
  func.func @transform_0(%arg0: i32) -> (i32, i32, i32) {
    %c0_i32 = arith.constant 0 : i32
    %c0_i32_0 = arith.constant 0 : i32
    %c0_i32_1 = arith.constant 0 : i32
    return %arg0, %c0_i32, %c0_i32_0 : i32, i32, i32
  }
  func.func @transform_1(%arg0: i32) -> (i32, i32, i32, i32) {
    %c0_i32 = arith.constant 0 : i32
    %c0_i32_0 = arith.constant 0 : i32
    %c0_i32_1 = arith.constant 0 : i32
    %c0_i32_2 = arith.constant 0 : i32
    return %arg0, %c0_i32, %c0_i32_0, %c0_i32_1 : i32, i32, i32, i32
  }
  func.func @transform_2(%arg0: i32) -> (i32, i32) {
    %c0_i32 = arith.constant 0 : i32
    %c0_i32_0 = arith.constant 0 : i32
    %c0_i32_1 = arith.constant 0 : i32
    return %c0_i32, %c0_i32_0 : i32, i32
  }
  func.func @transform_3(%arg0: i32) -> (i32, i32) {
    %c0_i32 = arith.constant 0 : i32
    %c0_i32_0 = arith.constant 0 : i32
    %c0_i32_1 = arith.constant 0 : i32
    return %c0_i32, %c0_i32_0 : i32, i32
  }
  func.func @transform_4(%arg0: i32) -> (i32, i32, i32) {
    %c0_i32 = arith.constant 0 : i32
    %c0_i32_0 = arith.constant 0 : i32
    %c0_i32_1 = arith.constant 0 : i32
    return %arg0, %c0_i32, %c0_i32_0 : i32, i32, i32
  }
  func.func @transform_5(%arg0: i32) -> (i32, i32, i32, i32) {
    %c0_i32 = arith.constant 0 : i32
    %c0_i32_0 = arith.constant 0 : i32
    %c0_i32_1 = arith.constant 0 : i32
    %c0_i32_2 = arith.constant 0 : i32
    return %arg0, %c0_i32, %c0_i32_0, %c0_i32_1 : i32, i32, i32, i32
  }
}

</mosaic_0001>

<bundles_post_ra>
// kernel: graphormer_forward_batch.1
= control target key start
LH: loop header
LB: loop body
LE: loop exit
PB: predicated region body
PF: predicated region fallthrough
CT: control target
= control target key end

     0   :  { %s6196_s18 = smov 0   ;;  %s7375_s0 = inlined_call_operand.vmem [shape: f32[2,32,32], index: 0, kind: input, shape index: {}]   ;;  %s7376_s1 = inlined_call_operand.vmem [shape: f32[2,4,32,32], index: 1, kind: input, shape index: {}]   ;;  %s7377_s2 = inlined_call_operand.vmem [shape: f32[424,32], index: 2, kind: input, shape index: {}]   ;;  %s7378_s3 = inlined_call_operand.vmem [shape: f32[80,64], index: 3, kind: input, shape index: {}]   ;;  %s7379_s4 = inlined_call_operand.vmem [shape: f32[2,4,4], index: 4, kind: output, shape index: {0}]   ;;  %s7380_s5 = inlined_call_operand.vmem [shape: f32[2,2,32,128], index: 5, kind: output, shape index: {1}]  }
   0x1 LB: > { %s4999_s19 = sadd.s32 4294967295, %s6156_s18   ;;  %p5003_p0 = scmp.ge.s32.totalorder %s6156_s18, 1  ;;  %s6156_s18 = sphi %s6196_s18, %s16_s18  }
   0x2   : > { %p200_p1 = scmp.lt.s32.totalorder %s6156_s18, 3 }
   0x4   : > { %p201_p2 = pnand %p5003_p0, %p200_p1 }
   0x5   : > { %p237_p3 = scmp.lt.s32.totalorder (!%p201_p2), %s4999_s19, 1  ;;  %s6158_s7 = smov (!%p201_p2), 120  }
   0x6   : > { %204 = sbr.rel (%p201_p2) target bundleno = 7720 (0x1e28), region = 36  ;;  %s6159_s14 = smov (!%p201_p2), 112  }
   0x7   : > { %s6160_s15 = smov (!%p201_p2), 104   ;;  %s6161_s9 = smov (!%p201_p2), 32  }
   0x8   : > { %s6162_s24 = smov (!%p201_p2), 64   ;;  %s6163_s25 = smov (!%p201_p2), 96  }
   0xb   : > { %s7382_s19 = smov (!%p237_p3, %s4999_s19), 1  ;;  %vm262_vm0 = vcmask 261120   ;;  %v335_v28 = vld [vmem:[%s7377_s2 + $0x18] sm:$0xff]  ;;  %v334_v30 = vld [vmem:[%s7377_s2 + $0x10] sm:$0xff]  ;;  %v333_v32 = vld [vmem:[%s7377_s2 + $0x8] sm:$0xff]  ;;  %v316_v44 = vlaneseq  ;;  %vm627_vm1 = vcmask 64512  }
   0xc   : > { %s5226_s20 = sshll.u32 %s7382_s19, 5  ;;  %v339_v29 = vld [vmem:[%s7377_s2 + $0x38] sm:$0xff]  ;;  %5492 = vmatprep.subr.mxu0 %v335_v28  ;;  %v338_v31 = vld [vmem:[%s7377_s2 + $0x30] sm:$0xff]  ;;  %v337_v33 = vld [vmem:[%s7377_s2 + $0x28] sm:$0xff]  ;;  %s5227_s28 = sshll.u32 %s7382_s19, 7  ;;  %vm2392_vm2 = vcmask 523264  }
   0xd   : > { %s6210_s23 = scalar_lea.vmem %s7375_s0, %s5226_s20  ;;  %5506 = vmatprep.subr.mxu1 %v339_v29  ;;  %5493 = vmatpush3.msra.mxu0 %v335_v28  ;;  %v332_v34 = vld [vmem:[%s7377_s2] sm:$0xff]  ;;  %v343_v36 = vld [vmem:[%s7377_s2 + $0x58] sm:$0xff]  ;;  %v6268_v49 = vshrl.u32 %v316_v44, 7  ;;  %s6382_s6 = scalar_lea.vmem %s7376_s1, %s5227_s28  ;;  %vm1065_vm3 = vcmask 523520   ;;  %vm1556_vm4 = vcmask 785920   ;;  %vm1950_vm5 = vcmask 1048320  }
   0xe   : > { %v256_v0 = vld [vmem:[%s6210_s23] sm:$0xff]  ;;  %v258_v1 = vld [vmem:[%s6210_s23 + $0x10] sm:$0xff]  ;;  %v257_v2 = vld [vmem:[%s6210_s23 + $0x8] sm:$0xff]  ;;  %5507 = vmatpush3.msra.mxu1 %v339_v29  ;;  %5494 = vmatprep.subr.mxu0 %v334_v30  ;;  %s5228_s8 = sshll.u32 %s7382_s19, 6  ;;  %vm6165_vm6 = vmmov 0   ;;  %vm4899_vm10 = vcmask 27648  }
   0xf   : > { %v263_v3 = vsel %vm262_vm0, %v256_v0, 0.0  ;;  %v269_v4 = vsel %vm262_vm0, %v258_v1, 0.0  ;;  %v259_v5 = vld [vmem:[%s6210_s23 + $0x18] sm:$0xff]  ;;  %v266_v6 = vsel %vm262_vm0, %v257_v2, 0.0  ;;  %5508 = vmatprep.subr.mxu1 %v338_v31  ;;  %5495 = vmatpush3.msra.mxu0 %v334_v30  ;;  %v336_v35 = vld [vmem:[%s7377_s2 + $0x20] sm:$0xff]  ;;  %v6271_v51 = vsub.s32 0, %v6268_v49  ;;  %s6417_s11 = scalar_lea.vmem %s7380_s5, %s5228_s8 }
  0x10   : > { %264 = vadd.xlane.f32.xlu0 %v263_v3  ;;  %270 = vadd.xlane.f32.xlu1 %v269_v4  ;;  %v272_v7 = vsel %vm262_vm0, %v259_v5, 0.0  ;;  %v6276_v52 = vld [vmem:[%s7377_s2 + $0xc0] sm:$0xff]  ;;  %v326_v53 = vsub.s32 1, %v6268_v49 }
  0x11   : > { %5509 = vmatpush3.msra.mxu1 %v338_v31  ;;  %5496 = vmatprep.subr.mxu0 %v333_v32  ;;  %v319_v54 = vrot.slane %v6276_v52, %v6271_v51 }
  0x12   : > { %5497 = vmatpush3.msra.mxu0 %v333_v32  ;;  %5510 = vmatprep.subr.mxu1 %v337_v33  ;;  %v327_v57 = vrot.slane %v6276_v52, %v326_v53 }
  0x13   : > { %5498 = vmatprep.subr.mxu0 %v332_v34  ;;  %5511 = vmatpush3.msra.mxu1 %v337_v33 }
  0x14   : > { %267 = vadd.xlane.f32.xlu0 %v266_v6  ;;  %273 = vadd.xlane.f32.xlu1 %v272_v7  ;;  %v342_v6 = vld [vmem:[%s7377_s2 + $0x50] sm:$0xff] }
  0x15   : > { %5499 = vmatpush3.msra.mxu0 %v332_v34  ;;  %5512 = vmatprep.subr.mxu1 %v336_v35 }
  0x16   : > { %5513 = vmatpush3.msra.mxu1 %v336_v35  ;;  %5520 = vmatprep.subr.mxu0 %v343_v36 }
  0x99   : > { %v265_v8 = vpop.xlane.xlu0 %264  ;;  %v271_v9 = vpop.xlane.xlu1 %270 }
  0x9a   : > { %v276_v10 = vmul.f32 0.03125, %v265_v8  ;;  %v278_v11 = vmul.f32 0.03125, %v271_v9  ;;  %v341_v9 = vld [vmem:[%s7377_s2 + $0x48] sm:$0xff] }
  0x9c   : > { %v6220_v12 = vsub.f32 %v256_v0, %v276_v10  ;;  %v6222_v13 = vsub.f32 %v258_v1, %v278_v11  ;;  %v340_v10 = vld [vmem:[%s7377_s2 + $0x40] sm:$0xff]  ;;  %v346_v11 = vsub.s32 2, %v6268_v49 }
  0x9d   : > { %v268_v14 = vpop.xlane.xlu0 %267  ;;  %v274_v15 = vpop.xlane.xlu1 %273 }
  0x9e   : > { %v277_v16 = vmul.f32 0.03125, %v268_v14  ;;  %v279_v17 = vmul.f32 0.03125, %v274_v15  ;;  %v284_v18 = vmul.f32 %v6220_v12, %v6220_v12  ;;  %v286_v19 = vmul.f32 %v6222_v13, %v6222_v13 }
  0x9f   : > { %v347_v15 = vrot.slane %v6276_v52, %v346_v11 }
  0xa0   : > { %v6228_v20 = vsub.f32 %v257_v2, %v277_v16  ;;  %v6230_v21 = vsub.f32 %v259_v5, %v279_v17  ;;  %v288_v22 = vsel %vm262_vm0, %v284_v18, 0.0  ;;  %v294_v23 = vsel %vm262_vm0, %v286_v19, 0.0 }
  0xa1   : > { %289 = vadd.xlane.f32.xlu0 %v288_v22 }
  0xa2   : > { %v285_v24 = vmul.f32 %v6228_v20, %v6228_v20  ;;  %v287_v25 = vmul.f32 %v6230_v21, %v6230_v21 }
  0xa4   : > { %v291_v26 = vsel %vm262_vm0, %v285_v24, 0.0  ;;  %v297_v27 = vsel %vm262_vm0, %v287_v25, 0.0 }
  0xa5   : > { %295 = vadd.xlane.f32.xlu0 %v294_v23  ;;  %292 = vadd.xlane.f32.xlu1 %v291_v26  ;;  %v6328_v26 = vsub.s32 4, %v6268_v49 }
  0xa7   : > { %v537_v30 = vrot.slane %v6276_v52, %v6328_v26 }
  0xa9   : > { %298 = vadd.xlane.f32.xlu1 %v297_v27 }
 0x12a   : > { %v290_v37 = vpop.xlane.xlu0 %289 }
 0x12b   : > { %v300_v38 = vmul.f32 0.03125, %v290_v37 }
 0x12d   : > { %v304_v39 = vadd.f32 1e-05, %v300_v38 }
 0x12e   : > { %v293_v40 = vpop.xlane.xlu1 %292  ;;  %v296_v41 = vpop.xlane.xlu0 %295 }
 0x12f   : > { %5968 = vrsqrt.f32 %v304_v39  ;;  %v301_v42 = vmul.f32 0.03125, %v293_v40  ;;  %v302_v43 = vmul.f32 0.03125, %v296_v41  ;;  %v624_v41 = vld [vmem:[%s6382_s6 + $0x8] sm:$0xff] }
 0x131   : > { %v305_v45 = vadd.f32 1e-05, %v301_v42  ;;  %v306_v46 = vadd.f32 1e-05, %v302_v43  ;;  %v623_v43 = vld [vmem:[%s6382_s6] sm:$0xff] }
 0x132   : > { %v299_v47 = vpop.xlane.xlu1 %298 }
 0x133   : > { %5970 = vrsqrt.f32 %v305_v45  ;;  %v303_v48 = vmul.f32 0.03125, %v299_v47  ;;  %v626_v47 = vld [vmem:[%s6382_s6 + $0x18] sm:$0xff] }
 0x134   : > { %5972 = vrsqrt.f32 %v306_v46 }
 0x135   : > { %v307_v50 = vadd.f32 1e-05, %v303_v48 }
 0x137   : > { %5974 = vrsqrt.f32 %v307_v50 }
 0x13c   : > { %v5969_v55 = vpop.eup %5968 }
 0x13d   : > { %v312_v56 = vmul.f32 %v5969_v55, %v6220_v12  ;;  %v447_v12 = vsub.s32 3, %v6268_v49 }
 0x13f   : > { %v320_v58 = vmul.f32 %v319_v54, %v312_v56  ;;  %v448_v18 = vrot.slane %v6276_v52, %v447_v12 }
 0x140   : > { %v5971_v59 = vpop.eup %5970 }
 0x141   : > { %v5973_v60 = vpop.eup %5972  ;;  %v328_v61 = vadd.f32 %v327_v57, %v320_v58  ;;  %v313_v62 = vmul.f32 %v5971_v59, %v6228_v20 }
 0x142   : > { %v314_v63 = vmul.f32 %v5973_v60, %v6222_v13 }
 0x143   : > { %5500 = vmatprep.mubr.msk.f32.mxu0 %vm262_vm0, %v328_v61  ;;  %5514 = vmatprep.mubr.msk.f32.mxu1 %vm262_vm0, %v328_v61  ;;  %v321_v0 = vmul.f32 %v319_v54, %v313_v62 }
 0x144   : > { %v5975_v1 = vpop.eup %5974  ;;  %v322_v2 = vmul.f32 %v319_v54, %v314_v63 }
 0x145   : > { %v329_v3 = vadd.f32 %v327_v57, %v321_v0  ;;  %v315_v4 = vmul.f32 %v5975_v1, %v6230_v21 }
 0x146   : > { %v330_v5 = vadd.f32 %v327_v57, %v322_v2 }
 0x147   : > { %5501 = vmatmul.mubr.msk.f32.vlgmr.msra.gmra.mxu0 %vm262_vm0, %v329_v3  ;;  %5515 = vmatmul.mubr.msk.f32.vlgmr.msra.gmra.mxu1 %vm262_vm0, %v329_v3  ;;  %v323_v7 = vmul.f32 %v319_v54, %v315_v4  ;;  %v625_v54 = vld [vmem:[%s6382_s6 + $0x10] sm:$0xff] }
 0x148   : > { %5503 = vmatprep.mubr.msk.f32.mxu0 %vm262_vm0, %v330_v5  ;;  %5517 = vmatprep.mubr.msk.f32.mxu1 %vm262_vm0, %v330_v5 }
 0x149   : > { %5521 = vmatpush3.msra.mxu0 %v343_v36  ;;  %v331_v8 = vadd.f32 %v327_v57, %v323_v7 }
 0x14a   : > { %5522 = vmatprep.subr.mxu0 %v342_v6 }
 0x14b   : > { %5523 = vmatpush3.msra.mxu0 %v342_v6  ;;  %5518 = vmatmul.mubr.msk.f32.gmra.mxu1 %vm262_vm0, %v331_v8 }
 0x14c   : > { %5504 = vmatmul.mubr.msk.f32.gmra.mxu0 %vm262_vm0, %v331_v8  ;;  %5524 = vmatprep.subr.mxu0 %v341_v9 }
 0x14d   : > { %5525 = vmatpush3.msra.mxu0 %v341_v9  ;;  %5528 = vmatprep.mubr.msk.f32.mxu0 %vm262_vm0, %v328_v61 }
 0x14e   : > { %5526 = vmatprep.subr.mxu0 %v340_v10 }
 0x14f   : > { %5527 = vmatpush3.msra.mxu0 %v340_v10 }
 0x150   : > { %5529 = vmatmul.mubr.msk.f32.vlgmr.msra.gmra.mxu0 %vm262_vm0, %v329_v3 }
 0x151   : > { %5531 = vmatprep.mubr.msk.f32.mxu0 %vm262_vm0, %v330_v5 }
 0x154   : > { %5532 = vmatmul.mubr.msk.f32.gmra.mxu0 %vm262_vm0, %v331_v8 }
 0x207   : > { %v5502_v13 = vpop.f32.mrf.mxu0  ;;  %v5516_v14 = vpop.f32.mrf.mxu1 }
 0x208   : > { %v6334_v28 = vadd.f32 %v5516_v14, %v448_v18  ;;  %v6363_v38 = vadd.f32 %v5502_v13, %v347_v15 }
 0x209   : > { %v426_v16 = vpop.f32.mrf.mxu0  ;;  %v515_v17 = vpop.f32.mrf.mxu1 }
 0x20a   : > { %v6317_v19 = vadd.f32 %v426_v16, %v347_v15  ;;  %v6344_v33 = vadd.f32 %v515_v17, %v448_v18 }
 0x20b   : > { %v5519_v20 = vpop.f32.mrf.mxu1 }
 0x20c   : > { %v5505_v21 = vpop.f32.mrf.mxu0  ;;  %v6319_v22 = vadd.f32 %v5519_v20, %v448_v18  ;;  %5542 = vmatprep.mubr.msk.f32.mxu1 %vm627_vm1, %v6317_v19 }
 0x20d   : > { %v525_v23 = vpop.f32.mrf.mxu1  ;;  %v6374_v40 = vadd.f32 %v5505_v21, %v347_v15 }
 0x20e   : > { %v436_v24 = vpop.f32.mrf.mxu0  ;;  %v6323_v25 = vadd.f32 %v525_v23, %v448_v18  ;;  %5534 = vmatprep.subr.msk.mxu1 %vm627_vm1, %v6319_v22 }
 0x20f   : > { %5535 = vmatpush3.xpose.msk.msra.mxu1 %vm627_vm1, %v6319_v22  ;;  %v6366_v39 = vadd.f32 %v436_v24, %v347_v15 }
 0x210   : > { %v5530_v27 = vpop.f32.mrf.mxu0  ;;  %5536 = vmatprep.subr.msk.mxu1 %vm627_vm1, %v6323_v25 }
 0x211   : > { %v6354_v36 = vadd.f32 %v5530_v27, %v537_v30 }
 0x212   : > { %v604_v29 = vpop.f32.mrf.mxu0 }
 0x213   : > { %5537 = vmatpush3.xpose.msk.msra.mxu1 %vm627_vm1, %v6323_v25  ;;  %v6358_v37 = vadd.f32 %v604_v29, %v537_v30 }
 0x214   : > { %v5533_v31 = vpop.f32.mrf.mxu0  ;;  %5538 = vmatprep.subr.msk.mxu1 %vm627_vm1, %v6334_v28 }
 0x215   : > { %v6342_v32 = vadd.f32 %v5533_v31, %v537_v30 }
 0x216   : > { %v614_v34 = vpop.f32.mrf.mxu0 }
 0x217   : > { %v6346_v35 = vadd.f32 %v614_v34, %v537_v30  ;;  %5548 = vmatprep.subr.mxu0 %v6342_v32  ;;  %5539 = vmatpush3.xpose.msk.msra.mxu1 %vm627_vm1, %v6334_v28 }
 0x218   : > { %5549 = vmatpush3.msra.mxu0 %v6342_v32  ;;  %5540 = vmatprep.subr.msk.mxu1 %vm627_vm1, %v6344_v33 }
 0x219   : > { %5550 = vmatprep.subr.mxu0 %v6346_v35 }
 0x21a   : > { %5551 = vmatpush3.msra.mxu0 %v6346_v35 }
 0x21b   : > { %5552 = vmatprep.subr.mxu0 %v6354_v36  ;;  %5541 = vmatpush3.xpose.msk.msra.mxu1 %vm627_vm1, %v6344_v33 }
 0x21c   : > { %5553 = vmatpush3.msra.mxu0 %v6354_v36 }
 0x21d   : > { %5554 = vmatprep.subr.mxu0 %v6358_v37 }
 0x21e   : > { %5555 = vmatpush3.msra.mxu0 %v6358_v37  ;;  %5543 = vmatmul.mubr.msk.f32.vlgmr.msra.gmra.mxu1 %vm627_vm1, %v6363_v38 }
 0x21f   : > { %5545 = vmatprep.mubr.msk.f32.mxu1 %vm627_vm1, %v6366_v39 }
 0x222   : > { %5546 = vmatmul.mubr.msk.f32.gmra.mxu1 %vm627_vm1, %v6374_v40 }
 0x2de   : > { %v5544_v42 = vpop.f32.mrf.mxu1 }
 0x2df   : > { %v724_v45 = vadd.f32 %v5544_v42, %v624_v41 }
 0x2e0   : > { %v718_v46 = vpop.f32.mrf.mxu1 }
 0x2e1   : > { %v719_v48 = vadd.f32 %v718_v46, %v623_v43  ;;  %v740_v50 = vsel %vm262_vm0, %v724_v45, -inf }
 0x2e2   : > { %741 = vmax.xlane.f32.xlu1 %v740_v50  ;;  %v5547_v52 = vpop.f32.mrf.mxu1 }
 0x2e3   : > { %v734_v55 = vadd.f32 %v5547_v52, %v626_v47  ;;  %v737_v56 = vsel %vm262_vm0, %v719_v48, -inf }
 0x2e4   : > { %738 = vmax.xlane.f32.xlu0 %v737_v56  ;;  %v728_v57 = vpop.f32.mrf.mxu1  ;;  %v882_v56 = vld [vmem:[%s7377_s2 + $0x60] sm:$0xff] }
 0x2e5   : > { %v729_v58 = vadd.f32 %v728_v57, %v625_v54  ;;  %v746_v59 = vsel %vm262_vm0, %v734_v55, -inf }
 0x2e6   : > { %747 = vmax.xlane.f32.xlu1 %v746_v59 }
 0x2e7   : > { %v743_v60 = vsel %vm262_vm0, %v729_v58, -inf }
 0x2e8   : > { %744 = vmax.xlane.f32.xlu0 %v743_v60 }
 0x36b   : > { %v742_v61 = vpop.xlane.xlu1 %741 }
 0x36c   : > { %v750_v62 = vsub.f32 %v724_v45, %v742_v61  ;;  %v5036_v61 = vld [vmem:[%s6382_s6 + $0x28] sm:$0xff] }
 0x36d   : > { %v739_v63 = vpop.xlane.xlu0 %738 }
 0x36e   : > { %v755_v0 = vmul.f32 1.442695, %v750_v62  ;;  %v749_v1 = vsub.f32 %v719_v48, %v739_v63  ;;  %v5035_v63 = vld [vmem:[%s6382_s6 + $0x20] sm:$0xff] }
 0x36f   : > { %v748_v2 = vpop.xlane.xlu1 %747 }
 0x370   : > { %5976 = vpow2.f32 %v755_v0  ;;  %v753_v3 = vmul.f32 1.442695, %v749_v1  ;;  %v752_v4 = vsub.f32 %v734_v55, %v748_v2 }
 0x371   : > { %v745_v5 = vpop.xlane.xlu0 %744 }
 0x372   : > { %5978 = vpow2.f32 %v753_v3  ;;  %v759_v6 = vmul.f32 1.442695, %v752_v4  ;;  %v751_v7 = vsub.f32 %v729_v58, %v745_v5  ;;  %v5037_v5 = vld [vmem:[%s6382_s6 + $0x30] sm:$0xff] }
 0x374   : > { %5980 = vpow2.f32 %v759_v6  ;;  %v757_v8 = vmul.f32 1.442695, %v751_v7  ;;  %v5038_v7 = vld [vmem:[%s6382_s6 + $0x38] sm:$0xff] }
 0x376   : > { %5982 = vpow2.f32 %v757_v8 }
 0x37d   : > { %v5977_v9 = vpop.eup %5976 }
 0x37e   : > { %v764_v10 = vsel %vm262_vm0, %v5977_v9, 0.0 }
 0x37f   : > { %v5979_v13 = vpop.eup %5978  ;;  %765 = vadd.xlane.f32.xlu1 %v764_v10 }
 0x380   : > { %v761_v14 = vsel %vm262_vm0, %v5979_v13, 0.0 }
 0x381   : > { %v5981_v15 = vpop.eup %5980  ;;  %762 = vadd.xlane.f32.xlu0 %v761_v14 }
 0x382   : > { %v770_v16 = vsel %vm262_vm0, %v5981_v15, 0.0 }
 0x383   : > { %v5983_v17 = vpop.eup %5982  ;;  %771 = vadd.xlane.f32.xlu1 %v770_v16 }
 0x384   : > { %v767_v18 = vsel %vm262_vm0, %v5983_v17, 0.0 }
 0x385   : > { %768 = vadd.xlane.f32.xlu0 %v767_v18 }
 0x394   : > { %900 = vrot.lane.b32.xlu1 %v6323_v25, %s6158_s7 }
 0x398   : > { %898 = vrot.lane.b32.xlu1 %v6334_v28, %s6158_s7 }
 0x39b   : > { %902 = vrot.lane.b32.xlu0 %v6319_v22, %s6158_s7 }
 0x39c   : > { %896 = vrot.lane.b32.xlu1 %v6344_v33, %s6158_s7 }
 0x39f   : > { %888 = vrot.lane.b32.xlu0 %v6317_v19, %s6158_s7 }
 0x3a0   : > { %890 = vrot.lane.b32.xlu1 %v6363_v38, %s6158_s7 }
 0x3a3   : > { %892 = vrot.lane.b32.xlu0 %v6366_v39, %s6158_s7 }
 0x3a4   : > { %894 = vrot.lane.b32.xlu1 %v6374_v40, %s6158_s7 }
 0x408   : > { %v766_v20 = vpop.xlane.xlu1 %765 }
 0x409   : > { %5984 = vrcp.f32 %v766_v20 }
 0x40a   : > { %v763_v21 = vpop.xlane.xlu0 %762 }
 0x40b   : > { %5986 = vrcp.f32 %v763_v21 }
 0x40c   : > { %v772_v23 = vpop.xlane.xlu1 %771 }
 0x40d   : > { %5988 = vrcp.f32 %v772_v23 }
 0x40e   : > { %v769_v24 = vpop.xlane.xlu0 %768 }
 0x40f   : > { %5990 = vrcp.f32 %v769_v24 }
 0x410   : > { %v901_v31 = vpop.permute.xlu1 %900 }
 0x412   : > { %v903_v27 = vpop.permute.xlu0 %902 }
 0x413   : > { %5562 = vmatprep.subr.msk.mxu0 %vm627_vm1, %v903_v27 }
 0x414   : > { %v899_v46 = vpop.permute.xlu1 %898 }
 0x416   : > { %v5985_v29 = vpop.eup %5984  ;;  %v889_v48 = vpop.permute.xlu0 %888 }
 0x417   : > { %v778_v30 = vmul.f32 %v5985_v29, %v5977_v9 }
 0x418   : > { %v5987_v34 = vpop.eup %5986  ;;  %v897_v50 = vpop.permute.xlu1 %896 }
 0x419   : > { %782 = vst.msk [vmem:[%s6417_s11 + $0x8] sm:$0xff] %vm262_vm0, %v778_v30  ;;  %v777_v41 = vmul.f32 %v5987_v34, %v5979_v13 }
 0x41a   : > { %v5989_v42 = vpop.eup %5988  ;;  %v893_v54 = vpop.permute.xlu0 %892 }
 0x41b   : > { %5556 = vmatprep.mubr.msk.f32.mxu0 %vm262_vm0, %v777_v41  ;;  %781 = vst.msk [vmem:[%s6417_s11] sm:$0xff] %vm262_vm0, %v777_v41  ;;  %v780_v43 = vmul.f32 %v5989_v42, %v5981_v15 }
 0x41c   : > { %v5991_v45 = vpop.eup %5990  ;;  %5557 = vmatmul.mubr.msk.f32.vlgmr.msra.gmra.mxu0 %vm262_vm0, %v778_v30  ;;  %v891_v52 = vpop.permute.xlu1 %890 }
 0x41d   : > { %5563 = vmatpush3.xpose.msk.msra.mxu0 %vm627_vm1, %v903_v27  ;;  %v779_v47 = vmul.f32 %v5991_v45, %v5983_v17  ;;  %784 = vst.msk [vmem:[%s6417_s11 + $0x18] sm:$0xff] %vm262_vm0, %v780_v43 }
 0x41e   : > { %5564 = vmatprep.subr.msk.mxu0 %vm627_vm1, %v901_v31 }
 0x41f   : > { %5559 = vmatprep.mubr.msk.f32.mxu0 %vm262_vm0, %v779_v47  ;;  %783 = vst.msk [vmem:[%s6417_s11 + $0x10] sm:$0xff] %vm262_vm0, %v779_v47 }
 0x420   : > { %5560 = vmatmul.mubr.msk.f32.gmra.mxu0 %vm262_vm0, %v780_v43  ;;  %v895_v55 = vpop.permute.xlu1 %894 }
 0x421   : > { %5565 = vmatpush3.xpose.msk.msra.mxu0 %vm627_vm1, %v901_v31  ;;  %5570 = vmatprep.mubr.msk.f32.mxu0 %vm627_vm1, %v889_v48 }
 0x422   : > { %5566 = vmatprep.subr.msk.mxu0 %vm627_vm1, %v899_v46 }
 0x425   : > { %5567 = vmatpush3.xpose.msk.msra.mxu0 %vm627_vm1, %v899_v46 }
 0x426   : > { %5568 = vmatprep.subr.msk.mxu0 %vm627_vm1, %v897_v50 }
 0x429   : > { %5569 = vmatpush3.xpose.msk.msra.mxu0 %vm627_vm1, %v897_v50 }
 0x42a   : > { %5598 = vmatprep.subr.mxu0 %v882_v56 }
 0x42c   : > { %5571 = vmatmul.mubr.msk.f32.vlgmr.msra.gmra.mxu0 %vm627_vm1, %v891_v52 }
 0x42d   : > { %5573 = vmatprep.mubr.msk.f32.mxu0 %vm627_vm1, %v893_v54  ;;  %5599 = vmatpush3.msra.mxu0 %v882_v56  ;;  %v1179_v56 = vld [vmem:[%s7377_s2 + $0x68] sm:$0xff] }
 0x430   : > { %5574 = vmatmul.mubr.msk.f32.gmra.mxu0 %vm627_vm1, %v895_v55 }
 0x4dc   : > { %v5558_v57 = vpop.f32.mrf.mxu0 }
 0x4de   : > { %v863_v58 = vpop.f32.mrf.mxu0 }
 0x4df   : > { %5600 = vmatprep.mubr.msk.f32.mxu0 %vm627_vm1, %v863_v58 }
 0x4e0   : > { %v5561_v59 = vpop.f32.mrf.mxu0  ;;  %5601 = vmatmul.mubr.msk.f32.vlgmr.msra.gmra.mxu0 %vm627_vm1, %v5558_v57 }
 0x4e2   : > { %v873_v60 = vpop.f32.mrf.mxu0 }
 0x4e3   : > { %5603 = vmatprep.mubr.msk.f32.mxu0 %vm627_vm1, %v873_v60 }
 0x4e4   : > { %5604 = vmatmul.mubr.msk.f32.gmra.mxu0 %vm627_vm1, %v5561_v59 }
 0x4ec   : > { %v5572_v62 = vpop.f32.mrf.mxu0 }
 0x4ed   : > { %v992_v0 = vadd.f32 %v5572_v62, %v5036_v61 }
 0x4ee   : > { %v986_v1 = vpop.f32.mrf.mxu0 }
 0x4ef   : > { %v987_v2 = vadd.f32 %v5035_v63, %v986_v1  ;;  %v1008_v3 = vsel %vm262_vm0, %v992_v0, -inf }
 0x4f0   : > { %1009 = vmax.xlane.f32.xlu1 %v1008_v3  ;;  %v5575_v4 = vpop.f32.mrf.mxu0 }
 0x4f1   : > { %v1005_v6 = vsel %vm262_vm0, %v987_v2, -inf  ;;  %v1002_v10 = vadd.f32 %v5575_v4, %v5038_v7 }
 0x4f2   : > { %1006 = vmax.xlane.f32.xlu0 %v1005_v6  ;;  %v996_v8 = vpop.f32.mrf.mxu0 }
 0x4f3   : > { %v997_v9 = vadd.f32 %v5037_v5, %v996_v8  ;;  %v1014_v14 = vsel %vm262_vm0, %v1002_v10, -inf }
 0x4f5   : > { %v1011_v13 = vsel %vm262_vm0, %v997_v9, -inf }
 0x4f6   : > { %1012 = vmax.xlane.f32.xlu0 %v1011_v13 }
 0x4fa   : > { %1015 = vmax.xlane.f32.xlu0 %v1014_v14 }
 0x579   : > { %v1010_v15 = vpop.xlane.xlu1 %1009 }
 0x57a   : > { %v1018_v16 = vsub.f32 %v992_v0, %v1010_v15 }
 0x57b   : > { %v1007_v17 = vpop.xlane.xlu0 %1006 }
 0x57c   : > { %v1023_v18 = vmul.f32 1.442695, %v1018_v16  ;;  %v1017_v20 = vsub.f32 %v987_v2, %v1007_v17 }
 0x57e   : > { %5992 = vpow2.f32 %v1023_v18  ;;  %v1021_v21 = vmul.f32 1.442695, %v1017_v20 }
 0x57f   : > { %v1013_v23 = vpop.xlane.xlu0 %1012 }
 0x580   : > { %5994 = vpow2.f32 %v1021_v21  ;;  %v1019_v24 = vsub.f32 %v997_v9, %v1013_v23 }
 0x582   : > { %v1025_v27 = vmul.f32 1.442695, %v1019_v24 }
 0x583   : > { %v1016_v29 = vpop.xlane.xlu0 %1015 }
 0x584   : > { %5996 = vpow2.f32 %v1025_v27  ;;  %v1020_v30 = vsub.f32 %v1002_v10, %v1016_v29  ;;  %v5060_v27 = vld [vmem:[%s6382_s6 + $0x48] sm:$0xff] }
 0x586   : > { %v1027_v31 = vmul.f32 1.442695, %v1020_v30  ;;  %v5059_v30 = vld [vmem:[%s6382_s6 + $0x40] sm:$0xff] }
 0x588   : > { %5998 = vpow2.f32 %v1027_v31 }
 0x58b   : > { %v5993_v34 = vpop.eup %5992 }
 0x58c   : > { %v1032_v41 = vsel %vm262_vm0, %v5993_v34, 0.0 }
 0x58d   : > { %v5995_v42 = vpop.eup %5994  ;;  %1033 = vadd.xlane.f32.xlu1 %v1032_v41 }
 0x58e   : > { %v1029_v43 = vsel %vm262_vm0, %v5995_v42, 0.0 }
 0x58f   : > { %1030 = vadd.xlane.f32.xlu0 %v1029_v43 }
 0x591   : > { %v5997_v45 = vpop.eup %5996 }
 0x592   : > { %v1035_v46 = vsel %vm262_vm0, %v5997_v45, 0.0 }
 0x593   : > { %1036 = vadd.xlane.f32.xlu0 %v1035_v46 }
 0x595   : > { %v5999_v47 = vpop.eup %5998 }
 0x596   : > { %v1038_v48 = vsel %vm262_vm0, %v5999_v47, 0.0 }
 0x597   : > { %1039 = vadd.xlane.f32.xlu1 %v1038_v48 }
 0x5a8   : > { %1078 = vrot.lane.b32.xlu1 %v6346_v35, %s6158_s7 }
 0x5a9   : > { %1080 = vrot.lane.b32.xlu0 %v6342_v32, %s6158_s7 }
 0x5ac   : > { %1076 = vrot.lane.b32.xlu1 %v6354_v36, %s6158_s7 }
 0x5ad   : > { %1393 = vrot.lane.b32.xlu0 %v6319_v22, %s6159_s14 }
 0x5b0   : > { %1074 = vrot.lane.b32.xlu1 %v6358_v37, %s6158_s7 }
 0x5b1   : > { %1389 = vrot.lane.b32.xlu0 %v6334_v28, %s6159_s14 }
 0x5b4   : > { %1391 = vrot.lane.b32.xlu1 %v6323_v25, %s6159_s14 }
 0x5b5   : > { %1379 = vrot.lane.b32.xlu0 %v6317_v19, %s6159_s14 }
 0x5b8   : > { %1387 = vrot.lane.b32.xlu1 %v6344_v33, %s6159_s14 }
 0x5b9   : > { %1383 = vrot.lane.b32.xlu0 %v6366_v39, %s6159_s14 }
 0x5bc   : > { %1381 = vrot.lane.b32.xlu1 %v6363_v38, %s6159_s14 }
 0x5bd   : > { %1787 = vrot.lane.b32.xlu0 %v6319_v22, %s6160_s15 }
 0x5c0   : > { %1385 = vrot.lane.b32.xlu1 %v6374_v40, %s6159_s14 }
 0x5c1   : > { %1783 = vrot.lane.b32.xlu0 %v6334_v28, %s6160_s15 }
 0x5c4   : > { %1785 = vrot.lane.b32.xlu1 %v6323_v25, %s6160_s15 }
 0x5c5   : > { %1773 = vrot.lane.b32.xlu0 %v6317_v19, %s6160_s15 }
 0x5c8   : > { %1781 = vrot.lane.b32.xlu1 %v6344_v33, %s6160_s15 }
 0x5c9   : > { %1777 = vrot.lane.b32.xlu0 %v6366_v39, %s6160_s15 }
 0x5cc   : > { %1775 = vrot.lane.b32.xlu1 %v6363_v38, %s6160_s15 }
 0x5d0   : > { %1779 = vrot.lane.b32.xlu1 %v6374_v40, %s6160_s15 }
 0x616   : > { %v1034_v28 = vpop.xlane.xlu1 %1033 }
 0x618   : > { %v1031_v22 = vpop.xlane.xlu0 %1030 }
 0x619   : > { %6000 = vrcp.f32 %v1031_v22 }
 0x61a   : > { %6002 = vrcp.f32 %v1034_v28 }
 0x61c   : > { %v1037_v50 = vpop.xlane.xlu0 %1036 }
 0x61d   : > { %6004 = vrcp.f32 %v1037_v50 }
 0x620   : > { %v1040_v25 = vpop.xlane.xlu1 %1039  ;;  %v1081_v19 = vpop.permute.xlu0 %1080 }
 0x621   : > { %6006 = vrcp.f32 %v1040_v25  ;;  %5576 = vmatprep.subr.mxu1 %v1081_v19 }
 0x622   : > { %5577 = vmatpush3.msra.mxu1 %v1081_v19 }
 0x624   : > { %v1079_v33 = vpop.permute.xlu1 %1078  ;;  %v1394_v60 = vpop.permute.xlu0 %1393 }
 0x625   : > { %5578 = vmatprep.subr.mxu1 %v1079_v33 }
 0x626   : > { %v6001_v39 = vpop.eup %6000  ;;  %5579 = vmatpush3.msra.mxu1 %v1079_v33 }
 0x627   : > { %v6501_v52 = vmul.f32 %v6001_v39, %v5995_v42  ;;  %v6003_v40 = vpop.eup %6002 }
 0x628   : > { %v1077_v38 = vpop.permute.xlu1 %1076  ;;  %v6508_v57 = vmul.f32 %v6003_v40, %v5993_v34  ;;  %v1390_v62 = vpop.permute.xlu0 %1389 }
 0x629   : > { %5580 = vmatprep.subr.mxu1 %v1077_v38  ;;  %5584 = vmatprep.mubr.msk.f32.mxu1 %vm262_vm0, %v6501_v52 }
 0x62a   : > { %5581 = vmatpush3.msra.mxu1 %v1077_v38  ;;  %v6005_v54 = vpop.eup %6004 }
 0x62b   : > { %v6510_v59 = vmul.f32 %v6005_v54, %v5997_v45  ;;  %v5061_v45 = vld [vmem:[%s6382_s6 + $0x50] sm:$0xff] }
 0x62c   : > { %v1075_v55 = vpop.permute.xlu1 %1074  ;;  %v1380_v0 = vpop.permute.xlu0 %1379 }
 0x62d   : > { %5582 = vmatprep.subr.mxu1 %v1075_v55 }
 0x62e   : > { %v6007_v58 = vpop.eup %6006  ;;  %5583 = vmatpush3.msra.mxu1 %v1075_v55 }
 0x62f   : > { %5585 = vmatmul.mubr.msk.f32.vlgmr.msra.gmra.mxu1 %vm262_vm0, %v6508_v57  ;;  %5590 = vmatprep.subr.mxu1 %v1179_v56  ;;  %v6517_v61 = vmul.f32 %v6007_v58, %v5999_v47  ;;  %v5062_v47 = vld [vmem:[%s6382_s6 + $0x58] sm:$0xff] }
 0x630   : > { %5587 = vmatprep.mubr.msk.f32.mxu1 %vm262_vm0, %v6510_v59  ;;  %5591 = vmatpush3.msra.mxu1 %v1179_v56  ;;  %v1392_v63 = vpop.permute.xlu1 %1391  ;;  %v1384_v5 = vpop.permute.xlu0 %1383 }
 0x631   : > { %5606 = vmatprep.subr.msk.mxu1 %vm627_vm1, %v1394_v60 }
 0x633   : > { %5588 = vmatmul.mubr.msk.f32.gmra.mxu1 %vm262_vm0, %v6517_v61 }
 0x634   : > { %v1388_v3 = vpop.permute.xlu1 %1387  ;;  %v1788_v8 = vpop.permute.xlu0 %1787 }
 0x638   : > { %v1382_v7 = vpop.permute.xlu1 %1381  ;;  %v1784_v10 = vpop.permute.xlu0 %1783 }
 0x63c   : > { %v1386_v9 = vpop.permute.xlu1 %1385  ;;  %v1774_v14 = vpop.permute.xlu0 %1773 }
 0x640   : > { %v1786_v13 = vpop.permute.xlu1 %1785  ;;  %v1778_v17 = vpop.permute.xlu0 %1777 }
 0x644   : > { %v1782_v15 = vpop.permute.xlu1 %1781 }
 0x648   : > { %v1776_v16 = vpop.permute.xlu1 %1775 }
 0x64c   : > { %v1780_v18 = vpop.permute.xlu1 %1779 }
 0x6ef   : > { %v5586_v1 = vpop.f32.mrf.mxu1 }
 0x6f1   : > { %v1160_v2 = vpop.f32.mrf.mxu1 }
 0x6f2   : > { %5592 = vmatprep.mubr.msk.f32.mxu1 %vm627_vm1, %v1160_v2 }
 0x6f3   : > { %v5589_v4 = vpop.f32.mrf.mxu1  ;;  %5593 = vmatmul.mubr.msk.f32.vlgmr.msra.gmra.mxu1 %vm627_vm1, %v5586_v1 }
 0x6f4   : > { %5607 = vmatpush3.xpose.msk.msra.mxu1 %vm627_vm1, %v1394_v60 }
 0x6f5   : > { %5608 = vmatprep.subr.msk.mxu1 %vm627_vm1, %v1392_v63  ;;  %v1170_v6 = vpop.f32.mrf.mxu1 }
 0x6f6   : > { %5595 = vmatprep.mubr.msk.f32.mxu1 %vm627_vm1, %v1170_v6 }
 0x6f7   : > { %5596 = vmatmul.mubr.msk.f32.gmra.mxu1 %vm627_vm1, %v5589_v4 }
 0x6f8   : > { %5609 = vmatpush3.xpose.msk.msra.mxu1 %vm627_vm1, %v1392_v63  ;;  %5614 = vmatprep.mubr.msk.f32.mxu1 %vm627_vm1, %v1380_v0 }
 0x6f9   : > { %5610 = vmatprep.subr.msk.mxu1 %vm627_vm1, %v1390_v62 }
 0x6fc   : > { %5611 = vmatpush3.xpose.msk.msra.mxu1 %vm627_vm1, %v1390_v62 }
 0x6fd   : > { %5612 = vmatprep.subr.msk.mxu1 %vm627_vm1, %v1388_v3 }
 0x700   : > { %5613 = vmatpush3.xpose.msk.msra.mxu1 %vm627_vm1, %v1388_v3 }
 0x701   : > { %5642 = vmatprep.subr.msk.mxu1 %vm627_vm1, %v1788_v8 }
 0x703   : > { %5615 = vmatmul.mubr.msk.f32.vlgmr.msra.gmra.mxu1 %vm627_vm1, %v1382_v7 }
 0x704   : > { %5617 = vmatprep.mubr.msk.f32.mxu1 %vm627_vm1, %v1384_v5  ;;  %5643 = vmatpush3.xpose.msk.msra.mxu1 %vm627_vm1, %v1788_v8 }
 0x705   : > { %5644 = vmatprep.subr.msk.mxu1 %vm627_vm1, %v1786_v13 }
 0x707   : > { %5618 = vmatmul.mubr.msk.f32.gmra.mxu1 %vm627_vm1, %v1386_v9 }
 0x708   : > { %5645 = vmatpush3.xpose.msk.msra.mxu1 %vm627_vm1, %v1786_v13  ;;  %5650 = vmatprep.mubr.msk.f32.mxu1 %vm627_vm1, %v1774_v14 }
 0x709   : > { %5646 = vmatprep.subr.msk.mxu1 %vm627_vm1, %v1784_v10 }
 0x70c   : > { %5647 = vmatpush3.xpose.msk.msra.mxu1 %vm627_vm1, %v1784_v10  ;;  %v5079_v10 = vld [vmem:[%s6382_s6 + $0x60] sm:$0xff] }
 0x70d   : > { %5648 = vmatprep.subr.msk.mxu1 %vm627_vm1, %v1782_v15 }
 0x710   : > { %5649 = vmatpush3.xpose.msk.msra.mxu1 %vm627_vm1, %v1782_v15 }
 0x713   : > { %5651 = vmatmul.mubr.msk.f32.vlgmr.msra.gmra.mxu1 %vm627_vm1, %v1776_v16  ;;  %v5081_v16 = vld [vmem:[%s6382_s6 + $0x70] sm:$0xff] }
 0x714   : > { %5653 = vmatprep.mubr.msk.f32.mxu1 %vm627_vm1, %v1778_v17 }
 0x717   : > { %5654 = vmatmul.mubr.msk.f32.gmra.mxu1 %vm627_vm1, %v1780_v18 }
 0x7b3   : > { %v6548_v20 = vpop.f32.mrf.mxu1 }
 0x7b5   : > { %v6550_v21 = vpop.f32.mrf.mxu1 }
 0x7b7   : > { %v6552_v23 = vpop.f32.mrf.mxu1 }
 0x7b9   : > { %v6554_v24 = vpop.f32.mrf.mxu1 }
 0x7c3   : > { %v5616_v29 = vpop.f32.mrf.mxu1 }
 0x7c4   : > { %v1483_v31 = vadd.f32 %v5616_v29, %v5060_v27  ;;  %v5082_v27 = vld [vmem:[%s6382_s6 + $0x78] sm:$0xff] }
 0x7c5   : > { %v1477_v34 = vpop.f32.mrf.mxu1 }
 0x7c6   : > { %v1478_v41 = vadd.f32 %v5059_v30, %v1477_v34  ;;  %v1499_v42 = vsel %vm262_vm0, %v1483_v31, -inf }
 0x7c7   : > { %1500 = vmax.xlane.f32.xlu1 %v1499_v42  ;;  %v5619_v43 = vpop.f32.mrf.mxu1 }
 0x7c8   : > { %v1496_v46 = vsel %vm262_vm0, %v1478_v41, -inf  ;;  %v1493_v28 = vadd.f32 %v5619_v43, %v5062_v47 }
 0x7c9   : > { %1497 = vmax.xlane.f32.xlu0 %v1496_v46  ;;  %v1487_v48 = vpop.f32.mrf.mxu1 }
 0x7ca   : > { %v1488_v22 = vadd.f32 %v5061_v45, %v1487_v48  ;;  %v1505_v25 = vsel %vm262_vm0, %v1493_v28, -inf }
 0x7cc   : > { %v1502_v50 = vsel %vm262_vm0, %v1488_v22, -inf }
 0x7cd   : > { %1503 = vmax.xlane.f32.xlu0 %v1502_v50 }
 0x7d1   : > { %1506 = vmax.xlane.f32.xlu0 %v1505_v25 }
 0x7d3   : > { %v5652_v8 = vpop.f32.mrf.mxu1 }
 0x7d5   : > { %v1871_v9 = vpop.f32.mrf.mxu1 }
 0x7d6   : > { %v1872_v14 = vadd.f32 %v5079_v10, %v1871_v9 }
 0x7d7   : > { %v5655_v13 = vpop.f32.mrf.mxu1 }
 0x7d8   : > { %v1890_v18 = vsel %vm262_vm0, %v1872_v14, -inf  ;;  %v1887_v29 = vadd.f32 %v5655_v13, %v5082_v27 }
 0x7d9   : > { %v1881_v15 = vpop.f32.mrf.mxu1 }
 0x7da   : > { %v1882_v17 = vadd.f32 %v5081_v16, %v1881_v15  ;;  %v1666_v15 = vld [vmem:[%s7377_s2 + $0x70] sm:$0xff] }
 0x7dc   : > { %v1896_v30 = vsel %vm262_vm0, %v1882_v17, -inf }
 0x850   : > { %v1501_v19 = vpop.xlane.xlu1 %1500 }
 0x851   : > { %v1509_v33 = vsub.f32 %v1483_v31, %v1501_v19  ;;  %v5080_v31 = vld [vmem:[%s6382_s6 + $0x68] sm:$0xff] }
 0x852   : > { %v1498_v39 = vpop.xlane.xlu0 %1497  ;;  %v1877_v34 = vadd.f32 %v5652_v8, %v5080_v31 }
 0x853   : > { %v1514_v38 = vmul.f32 1.442695, %v1509_v33  ;;  %v1508_v40 = vsub.f32 %v1478_v41, %v1498_v39  ;;  %v1899_v41 = vsel %vm262_vm0, %v1887_v29, -inf }
 0x854   : > { %v1893_v42 = vsel %vm262_vm0, %v1877_v34, -inf }
 0x855   : > { %6008 = vpow2.f32 %v1514_v38  ;;  %v1512_v54 = vmul.f32 1.442695, %v1508_v40 }
 0x856   : > { %v1504_v55 = vpop.xlane.xlu0 %1503 }
 0x857   : > { %6010 = vpow2.f32 %v1512_v54  ;;  %v1510_v56 = vsub.f32 %v1488_v22, %v1504_v55 }
 0x859   : > { %v1516_v58 = vmul.f32 1.442695, %v1510_v56 }
 0x85a   : > { %v1507_v60 = vpop.xlane.xlu0 %1506 }
 0x85b   : > { %6012 = vpow2.f32 %v1516_v58  ;;  %v1511_v62 = vsub.f32 %v1493_v28, %v1507_v60 }
 0x85d   : > { %v1518_v63 = vmul.f32 1.442695, %v1511_v62 }
 0x85f   : > { %6014 = vpow2.f32 %v1518_v63 }
 0x862   : > { %v6009_v0 = vpop.eup %6008 }
 0x863   : > { %v1523_v1 = vsel %vm262_vm0, %v6009_v0, 0.0 }
 0x864   : > { %v6011_v2 = vpop.eup %6010  ;;  %1524 = vadd.xlane.f32.xlu1 %v1523_v1 }
 0x865   : > { %v1520_v3 = vsel %vm262_vm0, %v6011_v2, 0.0 }
 0x866   : > { %1521 = vadd.xlane.f32.xlu0 %v1520_v3 }
 0x868   : > { %v6013_v4 = vpop.eup %6012 }
 0x869   : > { %v1526_v5 = vsel %vm262_vm0, %v6013_v4, 0.0 }
 0x86a   : > { %1527 = vadd.xlane.f32.xlu0 %v1526_v5 }
 0x86c   : > { %v6015_v6 = vpop.eup %6014 }
 0x86d   : > { %v1529_v7 = vsel %vm262_vm0, %v6015_v6, 0.0 }
 0x86e   : > { %1530 = vadd.xlane.f32.xlu1 %v1529_v7 }
 0x87f   : > { %1565 = vrot.lane.b32.xlu1 %v6346_v35, %s6159_s14 }
 0x880   : > { %1567 = vrot.lane.b32.xlu0 %v6342_v32, %s6159_s14 }
 0x883   : > { %1563 = vrot.lane.b32.xlu1 %v6354_v36, %s6159_s14 }
 0x887   : > { %1561 = vrot.lane.b32.xlu1 %v6358_v37, %s6159_s14 }
 0x89f   : > { %1891 = vmax.xlane.f32.xlu0 %v1890_v18  ;;  %v5602_v18 = vpop.f32.mrf.mxu0 }
 0x8a1   : > { %v1355_v27 = vpop.f32.mrf.mxu0 }
 0x8a3   : > { %1897 = vmax.xlane.f32.xlu0 %v1896_v30 }
 0x8a7   : > { %1900 = vmax.xlane.f32.xlu0 %v1899_v41 }
 0x8ab   : > { %1894 = vmax.xlane.f32.xlu1 %v1893_v42 }
 0x8ed   : > { %v1525_v45 = vpop.xlane.xlu1 %1524 }
 0x8ef   : > { %v1522_v43 = vpop.xlane.xlu0 %1521 }
 0x8f0   : > { %6016 = vrcp.f32 %v1522_v43 }
 0x8f1   : > { %6018 = vrcp.f32 %v1525_v45 }
 0x8f3   : > { %v1528_v46 = vpop.xlane.xlu0 %1527 }
 0x8f4   : > { %6020 = vrcp.f32 %v1528_v46 }
 0x8f7   : > { %v1531_v47 = vpop.xlane.xlu1 %1530  ;;  %v1568_v48 = vpop.permute.xlu0 %1567 }
 0x8f8   : > { %6022 = vrcp.f32 %v1531_v47  ;;  %5620 = vmatprep.subr.mxu0 %v1568_v48 }
 0x8f9   : > { %5621 = vmatpush3.msra.mxu0 %v1568_v48 }
 0x8fb   : > { %v1566_v22 = vpop.permute.xlu1 %1565 }
 0x8fc   : > { %5622 = vmatprep.subr.mxu0 %v1566_v22 }
 0x8fd   : > { %v6017_v28 = vpop.eup %6016  ;;  %5623 = vmatpush3.msra.mxu0 %v1566_v22 }
 0x8fe   : > { %v6584_v50 = vmul.f32 %v6017_v28, %v6011_v2  ;;  %v6019_v19 = vpop.eup %6018 }
 0x8ff   : > { %v1564_v25 = vpop.permute.xlu1 %1563  ;;  %v6588_v38 = vmul.f32 %v6019_v19, %v6009_v0 }
 0x900   : > { %5624 = vmatprep.subr.mxu0 %v1564_v25  ;;  %5628 = vmatprep.mubr.msk.f32.mxu0 %vm262_vm0, %v6584_v50 }
 0x901   : > { %5625 = vmatpush3.msra.mxu0 %v1564_v25  ;;  %v6021_v33 = vpop.eup %6020 }
 0x902   : > { %v6590_v54 = vmul.f32 %v6021_v33, %v6013_v4 }
 0x903   : > { %v1562_v39 = vpop.permute.xlu1 %1561 }
 0x904   : > { %5626 = vmatprep.subr.mxu0 %v1562_v39 }
 0x905   : > { %v6023_v40 = vpop.eup %6022  ;;  %5627 = vmatpush3.msra.mxu0 %v1562_v39 }
 0x906   : > { %5629 = vmatmul.mubr.msk.f32.vlgmr.msra.gmra.mxu0 %vm262_vm0, %v6588_v38  ;;  %v6596_v55 = vmul.f32 %v6023_v40, %v6015_v6  ;;  %5634 = vmatprep.subr.mxu0 %v1666_v15 }
 0x907   : > { %5631 = vmatprep.mubr.msk.f32.mxu0 %vm262_vm0, %v6590_v54  ;;  %5635 = vmatpush3.msra.mxu0 %v1666_v15 }
 0x90a   : > { %5632 = vmatmul.mubr.msk.f32.gmra.mxu0 %vm262_vm0, %v6596_v55 }
 0x928   : > { %v1892_v56 = vpop.xlane.xlu0 %1891 }
 0x929   : > { %v1902_v58 = vsub.f32 %v1872_v14, %v1892_v56  ;;  %v2060_v56 = vld [vmem:[%s7377_s2 + $0x78] sm:$0xff] }
 0x92b   : > { %v1906_v60 = vmul.f32 1.442695, %v1902_v58  ;;  %v1361_v58 = vadd.f32 %v5602_v18, %v6548_v20 }
 0x92c   : > { %v1898_v62 = vpop.xlane.xlu0 %1897 }
 0x92d   : > { %6024 = vpow2.f32 %v1906_v60  ;;  %v1904_v63 = vsub.f32 %v1882_v17, %v1898_v62  ;;  %v1356_v62 = vadd.f32 %v1355_v27, %v6550_v21 }
 0x92f   : > { %v1910_v0 = vmul.f32 1.442695, %v1904_v63 }
 0x930   : > { %v1901_v1 = vpop.xlane.xlu0 %1900 }
 0x931   : > { %6026 = vpow2.f32 %v1910_v0  ;;  %v1905_v2 = vsub.f32 %v1887_v29, %v1901_v1  ;;  %v5605_v29 = vpop.f32.mrf.mxu0 }
 0x932   : > { %v1371_v1 = vadd.f32 %v5605_v29, %v6552_v23  ;;  %v2168_v23 = vsub.s32 5, %v6268_v49 }
 0x933   : > { %v1912_v5 = vmul.f32 1.442695, %v1905_v2  ;;  %v1365_v30 = vpop.f32.mrf.mxu0 }
 0x934   : > { %v1895_v3 = vpop.xlane.xlu1 %1894 }
 0x935   : > { %v1903_v4 = vsub.f32 %v1877_v34, %v1895_v3 }
 0x937   : > { %v1908_v7 = vmul.f32 1.442695, %v1903_v4  ;;  %v1366_v4 = vadd.f32 %v1365_v30, %v6554_v24  ;;  %v6146_v30 = vld [vmem:[%s6210_s23] sm:$0xff] }
 0x939   : > { %6028 = vpow2.f32 %v1908_v7 }
 0x93a   : > { %v6025_v6 = vpop.eup %6024  ;;  %6030 = vpow2.f32 %v1912_v5 }
 0x93b   : > { %v1914_v8 = vsel %vm262_vm0, %v6025_v6, 0.0 }
 0x93c   : > { %1915 = vadd.xlane.f32.xlu0 %v1914_v8 }
 0x93e   : > { %v6027_v9 = vpop.eup %6026 }
 0x93f   : > { %v1920_v10 = vsel %vm262_vm0, %v6027_v9, 0.0 }
 0x940   : > { %1921 = vadd.xlane.f32.xlu0 %v1920_v10 }
 0x946   : > { %v6029_v13 = vpop.eup %6028 }
 0x947   : > { %v1917_v14 = vsel %vm262_vm0, %v6029_v13, 0.0  ;;  %v6031_v16 = vpop.eup %6030 }
 0x948   : > { %1918 = vadd.xlane.f32.xlu1 %v1917_v14  ;;  %v1923_v17 = vsel %vm262_vm0, %v6031_v16, 0.0 }
 0x94c   : > { %1924 = vadd.xlane.f32.xlu1 %v1923_v17 }
 0x956   : > { %1961 = vrot.lane.b32.xlu0 %v6342_v32, %s6160_s15 }
 0x95d   : > { %1959 = vrot.lane.b32.xlu1 %v6346_v35, %s6160_s15 }
 0x961   : > { %1957 = vrot.lane.b32.xlu1 %v6354_v36, %s6160_s15 }
 0x965   : > { %1955 = vrot.lane.b32.xlu1 %v6358_v37, %s6160_s15 }
 0x9c5   : > { %v1916_v31 = vpop.xlane.xlu0 %1915 }
 0x9c6   : > { %6032 = vrcp.f32 %v1916_v31  ;;  %v5630_v34 = vpop.f32.mrf.mxu0 }
 0x9c8   : > { %v1647_v41 = vpop.f32.mrf.mxu0 }
 0x9c9   : > { %5636 = vmatprep.mubr.msk.f32.mxu0 %vm627_vm1, %v1647_v41  ;;  %v1922_v32 = vpop.xlane.xlu0 %1921 }
 0x9ca   : > { %v5633_v42 = vpop.f32.mrf.mxu0  ;;  %5637 = vmatmul.mubr.msk.f32.vlgmr.msra.gmra.mxu0 %vm627_vm1, %v5630_v34 }
 0x9cc   : > { %v1657_v35 = vpop.f32.mrf.mxu0 }
 0x9cd   : > { %5639 = vmatprep.mubr.msk.f32.mxu0 %vm627_vm1, %v1657_v35  ;;  %v1962_v36 = vpop.permute.xlu0 %1961 }
 0x9ce   : > { %5640 = vmatmul.mubr.msk.f32.gmra.mxu0 %vm627_vm1, %v5633_v42  ;;  %5656 = vmatprep.subr.mxu0 %v1962_v36 }
 0x9cf   : > { %5657 = vmatpush3.msra.mxu0 %v1962_v36  ;;  %v6147_v36 = vld [vmem:[%s6210_s23 + $0x18] sm:$0xff] }
 0x9d1   : > { %v1919_v37 = vpop.xlane.xlu1 %1918 }
 0x9d2   : > { %6034 = vrcp.f32 %v1919_v37 }
 0x9d3   : > { %v6033_v43 = vpop.eup %6032  ;;  %6036 = vrcp.f32 %v1922_v32 }
 0x9d4   : > { %v6619_v45 = vmul.f32 %v6033_v43, %v6025_v6  ;;  %v6148_v43 = vld [vmem:[%s6210_s23 + $0x10] sm:$0xff] }
 0x9d5   : > { %v1925_v46 = vpop.xlane.xlu1 %1924 }
 0x9d6   : > { %6038 = vrcp.f32 %v1925_v46  ;;  %5664 = vmatprep.mubr.msk.f32.mxu0 %vm262_vm0, %v6619_v45 }
 0x9d9   : > { %v1960_v47 = vpop.permute.xlu1 %1959 }
 0x9da   : > { %5658 = vmatprep.subr.mxu0 %v1960_v47 }
 0x9db   : > { %5659 = vmatpush3.msra.mxu0 %v1960_v47 }
 0x9dd   : > { %v1958_v48 = vpop.permute.xlu1 %1957 }
 0x9de   : > { %5660 = vmatprep.subr.mxu0 %v1958_v48 }
 0x9df   : > { %v6035_v22 = vpop.eup %6034  ;;  %5661 = vmatpush3.msra.mxu0 %v1958_v48 }
 0x9e0   : > { %v6037_v28 = vpop.eup %6036  ;;  %v6623_v19 = vmul.f32 %v6035_v22, %v6029_v13  ;;  %v6650_v13 = vld [vmem:[%s7377_s2 + $0xc0] sm:$0xff] }
 0x9e1   : > { %v1956_v25 = vpop.permute.xlu1 %1955  ;;  %v6625_v39 = vmul.f32 %v6037_v28, %v6027_v9  ;;  %v2169_v14 = vrot.slane %v6650_v13, %v2168_v23 }
 0x9e2   : > { %5662 = vmatprep.subr.mxu0 %v1956_v25 }
 0x9e3   : > { %v6039_v33 = vpop.eup %6038  ;;  %5663 = vmatpush3.msra.mxu0 %v1956_v25 }
 0x9e4   : > { %5665 = vmatmul.mubr.msk.f32.vlgmr.msra.gmra.mxu0 %vm262_vm0, %v6623_v19  ;;  %v6631_v40 = vmul.f32 %v6039_v33, %v6031_v16  ;;  %5670 = vmatprep.subr.mxu0 %v2060_v56  ;;  %v6145_v16 = vld [vmem:[%s6210_s23 + $0x8] sm:$0xff] }
 0x9e5   : > { %5667 = vmatprep.mubr.msk.f32.mxu0 %vm262_vm0, %v6625_v39  ;;  %5671 = vmatpush3.msra.mxu0 %v2060_v56 }
 0x9e8   : > { %5668 = vmatmul.mubr.msk.f32.gmra.mxu0 %vm262_vm0, %v6631_v40 }
 0xa8a   : > { %v5638_v60 = vpop.f32.mrf.mxu0 }
 0xa8b   : > { %v1765_v63 = vadd.f32 %v5638_v60, %v1361_v58 }
 0xa8c   : > { %v1745_v0 = vpop.f32.mrf.mxu0 }
 0xa8d   : > { %v1764_v2 = vadd.f32 %v1745_v0, %v1356_v62 }
 0xa8e   : > { %v5641_v3 = vpop.f32.mrf.mxu0 }
 0xa8f   : > { %v1767_v5 = vadd.f32 %v5641_v3, %v1371_v1 }
 0xa90   : > { %v1755_v7 = vpop.f32.mrf.mxu0 }
 0xa91   : > { %v1766_v6 = vadd.f32 %v1755_v7, %v1366_v4 }
 0xaa4   : > { %v5666_v8 = vpop.f32.mrf.mxu0 }
 0xaa6   : > { %v2041_v9 = vpop.f32.mrf.mxu0 }
 0xaa7   : > { %5672 = vmatprep.mubr.msk.f32.mxu0 %vm627_vm1, %v2041_v9 }
 0xaa8   : > { %v5669_v20 = vpop.f32.mrf.mxu0  ;;  %5673 = vmatmul.mubr.msk.f32.vlgmr.msra.gmra.mxu0 %vm627_vm1, %v5666_v8 }
 0xaaa   : > { %v2051_v21 = vpop.f32.mrf.mxu0 }
 0xaab   : > { %5675 = vmatprep.mubr.msk.f32.mxu0 %vm627_vm1, %v2051_v21 }
 0xaac   : > { %5676 = vmatmul.mubr.msk.f32.gmra.mxu0 %vm627_vm1, %v5669_v20 }
 0xb68   : > { %v5674_v24 = vpop.f32.mrf.mxu0 }
 0xb69   : > { %v2159_v10 = vadd.f32 %v5674_v24, %v1765_v63 }
 0xb6a   : > { %v2139_v15 = vpop.f32.mrf.mxu0 }
 0xb6b   : > { %v2163_v17 = vadd.f32 %v6145_v16, %v2159_v10  ;;  %v2158_v18 = vadd.f32 %v2139_v15, %v1764_v2  ;;  %v2244_v15 = vld [vmem:[%s7378_s3 + $0x10] sm:$0xff]  ;;  %v2243_v16 = vld [vmem:[%s7378_s3 + $0x8] sm:$0xff] }
 0xb6c   : > { %v5677_v27 = vpop.f32.mrf.mxu0 }
 0xb6d   : > { %v6656_v29 = vadd.f32 %v2169_v14, %v2163_v17  ;;  %v2162_v31 = vadd.f32 %v6146_v30, %v2158_v18  ;;  %v2161_v34 = vadd.f32 %v5677_v27, %v1767_v5  ;;  %v2242_v17 = vld [vmem:[%s7378_s3] sm:$0xff] }
 0xb6e   : > { %v2149_v41 = vpop.f32.mrf.mxu0 }
 0xb6f   : > { %v6659_v32 = vadd.f32 %v2169_v14, %v2162_v31  ;;  %v2160_v42 = vadd.f32 %v2149_v41, %v1766_v6  ;;  %v2177_v35 = vsel %vm262_vm0, %v6656_v29, 0.0  ;;  %v2165_v37 = vadd.f32 %v6147_v36, %v2161_v34 }
 0xb70   : > { %2178 = vadd.xlane.f32.xlu1 %v2177_v35 }
 0xb71   : > { %v2164_v46 = vadd.f32 %v6148_v43, %v2160_v42  ;;  %v2174_v47 = vsel %vm262_vm0, %v6659_v32, 0.0  ;;  %v6669_v22 = vadd.f32 %v2169_v14, %v2165_v37 }
 0xb72   : > { %2175 = vadd.xlane.f32.xlu0 %v2174_v47  ;;  %v2228_v47 = vsub.s32 6, %v6268_v49 }
 0xb73   : > { %v6667_v48 = vadd.f32 %v2169_v14, %v2164_v46  ;;  %v2183_v25 = vsel %vm262_vm0, %v6669_v22, 0.0  ;;  %v2245_v14 = vld [vmem:[%s7378_s3 + $0x18] sm:$0xff] }
 0xb74   : > { %5678 = vmatprep.subr.mxu1 %v2245_v14 }
 0xb75   : > { %v2180_v28 = vsel %vm262_vm0, %v6667_v48, 0.0  ;;  %5679 = vmatpush3.msra.mxu1 %v2245_v14  ;;  %v2387_v14 = vld [vmem:[%s7377_s2 + $0x98] sm:$0xff] }
 0xb76   : > { %2181 = vadd.xlane.f32.xlu0 %v2180_v28  ;;  %5680 = vmatprep.subr.mxu1 %v2244_v15 }
 0xb77   : > { %5681 = vmatpush3.msra.mxu1 %v2244_v15  ;;  %v2386_v15 = vld [vmem:[%s7377_s2 + $0x90] sm:$0xff] }
 0xb78   : > { %5682 = vmatprep.subr.mxu1 %v2243_v16 }
 0xb79   : > { %5683 = vmatpush3.msra.mxu1 %v2243_v16  ;;  %v2385_v16 = vld [vmem:[%s7377_s2 + $0x88] sm:$0xff] }
 0xb7a   : > { %2184 = vadd.xlane.f32.xlu0 %v2183_v25  ;;  %5684 = vmatprep.subr.mxu1 %v2242_v17  ;;  %v2229_v25 = vrot.slane %v6650_v13, %v2228_v47 }
 0xb7b   : > { %5685 = vmatpush3.msra.mxu1 %v2242_v17  ;;  %v2384_v17 = vld [vmem:[%s7377_s2 + $0x80] sm:$0xff] }
 0xbf9   : > { %v2179_v33 = vpop.xlane.xlu1 %2178 }
 0xbfa   : > { %v2187_v56 = vmul.f32 0.03125, %v2179_v33  ;;  %v2236_v33 = vsub.s32 7, %v6268_v49 }
 0xbfb   : > { %v2176_v58 = vpop.xlane.xlu0 %2175 }
 0xbfc   : > { %v2191_v60 = vsub.f32 %v6656_v29, %v2187_v56  ;;  %v2186_v62 = vmul.f32 0.03125, %v2176_v58 }
 0xbfe   : > { %v2190_v63 = vsub.f32 %v6659_v32, %v2186_v62  ;;  %v2195_v0 = vmul.f32 %v2191_v60, %v2191_v60 }
 0xbff   : > { %v2182_v1 = vpop.xlane.xlu0 %2181 }
 0xc00   : > { %v2188_v2 = vmul.f32 0.03125, %v2182_v1  ;;  %v2201_v3 = vsel %vm262_vm0, %v2195_v0, 0.0  ;;  %v2194_v4 = vmul.f32 %v2190_v63, %v2190_v63  ;;  %v2237_v0 = vrot.slane %v6650_v13, %v2236_v33  ;;  %v2391_v13 = vld [vmem:[%s7377_s2 + $0xb8] sm:$0xff] }
 0xc01   : > { %2202 = vadd.xlane.f32.xlu1 %v2201_v3  ;;  %5692 = vmatprep.subr.mxu0 %v2391_v13 }
 0xc02   : > { %v2192_v5 = vsub.f32 %v6667_v48, %v2188_v2  ;;  %v2198_v7 = vsel %vm262_vm0, %v2194_v4, 0.0  ;;  %5693 = vmatpush3.msra.mxu0 %v2391_v13 }
 0xc03   : > { %2199 = vadd.xlane.f32.xlu0 %v2198_v7  ;;  %v2185_v6 = vpop.xlane.xlu0 %2184 }
 0xc04   : > { %v2189_v8 = vmul.f32 0.03125, %v2185_v6  ;;  %v2196_v9 = vmul.f32 %v2192_v5, %v2192_v5 }
 0xc06   : > { %v2193_v20 = vsub.f32 %v6669_v22, %v2189_v8  ;;  %v2204_v21 = vsel %vm262_vm0, %v2196_v9, 0.0 }
 0xc07   : > { %2205 = vadd.xlane.f32.xlu0 %v2204_v21 }
 0xc08   : > { %v2197_v24 = vmul.f32 %v2193_v20, %v2193_v20 }
 0xc0a   : > { %v2207_v10 = vsel %vm262_vm0, %v2197_v24, 0.0 }
 0xc0b   : > { %2208 = vadd.xlane.f32.xlu1 %v2207_v10  ;;  %v2388_v10 = vld [vmem:[%s7377_s2 + $0xa0] sm:$0xff] }
 0xc8a   : > { %v2203_v18 = vpop.xlane.xlu1 %2202 }
 0xc8b   : > { %v2211_v27 = vmul.f32 0.03125, %v2203_v18  ;;  %v5099_v18 = vld [vmem:[%s7378_s3 + $0x20] ss:$0 sm:$0xff] }
 0xc8c   : > { %v2200_v30 = vpop.xlane.xlu0 %2199 }
 0xc8d   : > { %v2215_v31 = vadd.f32 1e-05, %v2211_v27  ;;  %v2210_v34 = vmul.f32 0.03125, %v2200_v30 }
 0xc8f   : > { %6040 = vrsqrt.f32 %v2215_v31  ;;  %v2214_v41 = vadd.f32 1e-05, %v2210_v34 }
 0xc90   : > { %v2206_v42 = vpop.xlane.xlu0 %2205 }
 0xc91   : > { %6042 = vrsqrt.f32 %v2214_v41  ;;  %v2212_v35 = vmul.f32 0.03125, %v2206_v42 }
 0xc93   : > { %v2216_v36 = vadd.f32 1e-05, %v2212_v35 }
 0xc94   : > { %v2209_v37 = vpop.xlane.xlu1 %2208 }
 0xc95   : > { %6044 = vrsqrt.f32 %v2216_v36  ;;  %v2213_v43 = vmul.f32 0.03125, %v2209_v37 }
 0xc97   : > { %v2217_v46 = vadd.f32 1e-05, %v2213_v43 }
 0xc99   : > { %6046 = vrsqrt.f32 %v2217_v46 }
 0xc9c   : > { %v6041_v28 = vpop.eup %6040 }
 0xc9d   : > { %v2223_v56 = vmul.f32 %v6041_v28, %v2191_v60 }
 0xc9e   : > { %v6043_v58 = vpop.eup %6042 }
 0xc9f   : > { %v2222_v62 = vmul.f32 %v6043_v58, %v2190_v63  ;;  %v2231_v1 = vmul.f32 %v2229_v25, %v2223_v56 }
 0xca1   : > { %v2230_v2 = vmul.f32 %v2229_v25, %v2222_v62  ;;  %v2239_v6 = vadd.f32 %v2237_v0, %v2231_v1 }
 0xca2   : > { %v6045_v3 = vpop.eup %6044 }
 0xca3   : > { %v2238_v4 = vadd.f32 %v2237_v0, %v2230_v2  ;;  %v2224_v7 = vmul.f32 %v6045_v3, %v2192_v5  ;;  %v2390_v5 = vld [vmem:[%s7377_s2 + $0xb0] sm:$0xff] }
 0xca4   : > { %5694 = vmatprep.subr.mxu0 %v2390_v5 }
 0xca5   : > { %5686 = vmatprep.mubr.msk.f32.mxu1 %vm262_vm0, %v2238_v4  ;;  %v2232_v8 = vmul.f32 %v2229_v25, %v2224_v7  ;;  %5695 = vmatpush3.msra.mxu0 %v2390_v5 }
 0xca6   : > { %v6047_v9 = vpop.eup %6046  ;;  %5687 = vmatmul.mubr.msk.f32.vlgmr.msra.gmra.mxu1 %vm262_vm0, %v2239_v6 }
 0xca7   : > { %v2240_v21 = vadd.f32 %v2237_v0, %v2232_v8  ;;  %v2225_v60 = vmul.f32 %v6047_v9, %v2193_v20  ;;  %v2389_v20 = vld [vmem:[%s7377_s2 + $0xa8] sm:$0xff] }
 0xca8   : > { %5696 = vmatprep.subr.mxu0 %v2389_v20 }
 0xca9   : > { %5689 = vmatprep.mubr.msk.f32.mxu1 %vm262_vm0, %v2240_v21  ;;  %v2233_v63 = vmul.f32 %v2229_v25, %v2225_v60  ;;  %5697 = vmatpush3.msra.mxu0 %v2389_v20 }
 0xcaa   : > { %5698 = vmatprep.subr.mxu0 %v2388_v10 }
 0xcab   : > { %v2241_v24 = vadd.f32 %v2237_v0, %v2233_v63  ;;  %5699 = vmatpush3.msra.mxu0 %v2388_v10 }
 0xcac   : > { %5700 = vmatprep.subr.mxu0 %v2387_v14 }
 0xcad   : > { %5690 = vmatmul.mubr.msk.f32.gmra.mxu1 %vm262_vm0, %v2241_v24  ;;  %5701 = vmatpush3.msra.mxu0 %v2387_v14 }
 0xcae   : > { %5702 = vmatprep.subr.mxu0 %v2386_v15 }
 0xcaf   : > { %5703 = vmatpush3.msra.mxu0 %v2386_v15 }
 0xcb0   : > { %5704 = vmatprep.subr.mxu0 %v2385_v16 }
 0xcb1   : > { %5705 = vmatpush3.msra.mxu0 %v2385_v16 }
 0xcb2   : > { %5706 = vmatprep.subr.mxu0 %v2384_v17 }
 0xcb3   : > { %5707 = vmatpush3.msra.mxu0 %v2384_v17 }
 0xd66   : > { %v5688_v27 = vpop.f32.mrf.mxu1 }
 0xd67   : > { %v2335_v30 = vadd.f32 %v5688_v27, %v5099_v18 }
 0xd68   : > { %v2329_v31 = vpop.f32.mrf.mxu1 }
 0xd69   : > { %v2353_v34 = vmul.f32 0.044715, %v2335_v30  ;;  %v2330_v41 = vadd.f32 %v5099_v18, %v2329_v31  ;;  %v2349_v14 = vmul.f32 0.5, %v2335_v30 }
 0xd6b   : > { %v2357_v42 = vmul.f32 %v2353_v34, %v2335_v30  ;;  %v2352_v35 = vmul.f32 0.044715, %v2330_v41  ;;  %v2348_v20 = vmul.f32 0.5, %v2330_v41 }
 0xd6d   : > { %v2361_v36 = vmul.f32 %v2357_v42, %v2335_v30  ;;  %v2356_v37 = vmul.f32 %v2352_v35, %v2330_v41  ;;  %v5691_v43 = vpop.f32.mrf.mxu1 }
 0xd6e   : > { %v2345_v46 = vadd.f32 %v5691_v43, %v5099_v18 }
 0xd6f   : > { %v2365_v28 = vadd.f32 %v2361_v36, %v2335_v30  ;;  %v2360_v25 = vmul.f32 %v2356_v37, %v2330_v41  ;;  %v2339_v56 = vpop.f32.mrf.mxu1  ;;  %v261_v30 = vld [vmem:[%s7377_s2 + $0xc8] sm:$0xff] }
 0xd70   : > { %v2355_v58 = vmul.f32 0.044715, %v2345_v46  ;;  %v2340_v62 = vadd.f32 %v5099_v18, %v2339_v56  ;;  %v2351_v42 = vmul.f32 0.5, %v2345_v46 }
 0xd71   : > { %v2369_v0 = vmul.f32 0.7978846, %v2365_v28  ;;  %v2364_v1 = vadd.f32 %v2360_v25, %v2330_v41  ;;  %v2497_v41 = vrot.slane %v261_v30, %v6271_v51  ;;  %v2573_v30 = vld [vmem:[%s7377_s2 + $0xd8] sm:$0xff] }
 0xd72   : > { %v2359_v2 = vmul.f32 %v2355_v58, %v2345_v46  ;;  %v2354_v3 = vmul.f32 0.044715, %v2340_v62  ;;  %v2350_v31 = vmul.f32 0.5, %v2340_v62 }
 0xd73   : > { %6048 = vtanh.f32 %v2369_v0  ;;  %v2368_v4 = vmul.f32 0.7978846, %v2364_v1 }
 0xd74   : > { %v2363_v7 = vmul.f32 %v2359_v2, %v2345_v46  ;;  %v2358_v6 = vmul.f32 %v2354_v3, %v2340_v62 }
 0xd75   : > { %6050 = vtanh.f32 %v2368_v4 }
 0xd76   : > { %v2367_v8 = vadd.f32 %v2363_v7, %v2345_v46  ;;  %v2362_v9 = vmul.f32 %v2358_v6, %v2340_v62 }
 0xd78   : > { %v2366_v21 = vadd.f32 %v2362_v9, %v2340_v62  ;;  %v2371_v60 = vmul.f32 0.7978846, %v2367_v8 }
 0xd7a   : > { %v2370_v63 = vmul.f32 0.7978846, %v2366_v21  ;;  %6052 = vtanh.f32 %v2371_v60 }
 0xd7c   : > { %6054 = vtanh.f32 %v2370_v63 }
 0xd80   : > { %v6049_v24 = vpop.eup %6048 }
 0xd81   : > { %v2377_v5 = vadd.f32 1.0, %v6049_v24 }
 0xd82   : > { %v6051_v13 = vpop.eup %6050 }
 0xd83   : > { %v2376_v10 = vadd.f32 1.0, %v6051_v13  ;;  %v2381_v16 = vmul.f32 %v2377_v5, %v2349_v14 }
 0xd85   : > { %v2380_v15 = vmul.f32 %v2376_v10, %v2348_v20 }
 0xd87   : > { %v6053_v17 = vpop.eup %6052  ;;  %5708 = vmatprep.mubr.msk.f32.mxu0 %vm2392_vm2, %v2380_v15 }
 0xd88   : > { %5709 = vmatmul.mubr.msk.f32.vlgmr.msra.gmra.mxu0 %vm2392_vm2, %v2381_v16  ;;  %v2379_v27 = vadd.f32 1.0, %v6053_v17 }
 0xd89   : > { %v6055_v18 = vpop.eup %6054 }
 0xd8a   : > { %v2378_v34 = vadd.f32 1.0, %v6055_v18  ;;  %v2383_v36 = vmul.f32 %v2379_v27, %v2351_v42  ;;  %v2583_v42 = vld [vmem:[%s7377_s2 + $0x128] sm:$0xff] }
 0xd8b   : > { %5742 = vmatprep.subr.mxu0 %v2583_v42 }
 0xd8c   : > { %v2382_v35 = vmul.f32 %v2378_v34, %v2350_v31  ;;  %v2575_v34 = vld [vmem:[%s7377_s2 + $0xe8] sm:$0xff]  ;;  %5743 = vmatpush3.msra.mxu0 %v2583_v42 }
 0xd8d   : > { %5714 = vmatprep.subr.mxu1 %v2575_v34 }
 0xd8e   : > { %5711 = vmatprep.mubr.msk.f32.mxu0 %vm2392_vm2, %v2382_v35  ;;  %v2574_v35 = vld [vmem:[%s7377_s2 + $0xe0] sm:$0xff]  ;;  %5715 = vmatpush3.msra.mxu1 %v2575_v34 }
 0xd8f   : > { %5712 = vmatmul.mubr.msk.f32.gmra.mxu0 %vm2392_vm2, %v2383_v36  ;;  %v2582_v36 = vld [vmem:[%s7377_s2 + $0x120] sm:$0xff]  ;;  %5716 = vmatprep.subr.mxu1 %v2574_v35 }
 0xd90   : > { %5744 = vmatprep.subr.mxu0 %v2582_v36  ;;  %5717 = vmatpush3.msra.mxu1 %v2574_v35 }
 0xd91   : > { %5745 = vmatpush3.msra.mxu0 %v2582_v36  ;;  %5718 = vmatprep.subr.mxu1 %v2573_v30 }
 0xd92   : > { %5719 = vmatpush3.msra.mxu1 %v2573_v30  ;;  %v2576_v30 = vld [vmem:[%s7377_s2 + $0xf0] sm:$0xff] }
 0xe48   : > { %v5710_v37 = vpop.f32.mrf.mxu0 }
 0xe49   : > { %v2491_v43 = vadd.f32 %v5710_v37, %v6656_v29  ;;  %v2572_v37 = vld [vmem:[%s7377_s2 + $0xd0] sm:$0xff] }
 0xe4a   : > { %v2471_v28 = vpop.f32.mrf.mxu0  ;;  %5720 = vmatprep.subr.mxu1 %v2572_v37 }
 0xe4b   : > { %v6743_v25 = vadd.f32 %v2497_v41, %v2491_v43  ;;  %v2490_v46 = vadd.f32 %v2471_v28, %v6659_v32  ;;  %v2580_v43 = vld [vmem:[%s7377_s2 + $0x110] sm:$0xff]  ;;  %5721 = vmatpush3.msra.mxu1 %v2572_v37  ;;  %v2579_v28 = vld [vmem:[%s7377_s2 + $0x108] sm:$0xff] }
 0xe4c   : > { %5728 = vmatprep.subr.mxu1 %v2579_v28 }
 0xe4d   : > { %v6746_v56 = vadd.f32 %v2497_v41, %v2490_v46  ;;  %v2507_v58 = vsel %vm262_vm0, %v6743_v25, 0.0 }
 0xe4e   : > { %2508 = vadd.xlane.f32.xlu1 %v2507_v58 }
 0xe4f   : > { %v5713_v62 = vpop.f32.mrf.mxu0  ;;  %v2504_v0 = vsel %vm262_vm0, %v6746_v56, 0.0 }
 0xe50   : > { %v2493_v1 = vadd.f32 %v5713_v62, %v6669_v22  ;;  %2505 = vadd.xlane.f32.xlu0 %v2504_v0 }
 0xe51   : > { %v2481_v2 = vpop.f32.mrf.mxu0 }
 0xe52   : > { %v6753_v29 = vadd.f32 %v2497_v41, %v2493_v1  ;;  %v2492_v3 = vadd.f32 %v2481_v2, %v6667_v48 }
 0xe54   : > { %v6756_v4 = vadd.f32 %v2497_v41, %v2492_v3  ;;  %v2513_v32 = vsel %vm262_vm0, %v6753_v29, 0.0  ;;  %v2581_v41 = vld [vmem:[%s7377_s2 + $0x118] sm:$0xff] }
 0xe55   : > { %2514 = vadd.xlane.f32.xlu1 %v2513_v32  ;;  %5746 = vmatprep.subr.mxu0 %v2581_v41 }
 0xe56   : > { %v2510_v7 = vsel %vm262_vm0, %v6756_v4, 0.0  ;;  %5747 = vmatpush3.msra.mxu0 %v2581_v41 }
 0xe57   : > { %2511 = vadd.xlane.f32.xlu0 %v2510_v7  ;;  %5748 = vmatprep.subr.mxu0 %v2580_v43 }
 0xe58   : > { %5749 = vmatpush3.msra.mxu0 %v2580_v43 }
 0xed7   : > { %v2509_v6 = vpop.xlane.xlu1 %2508 }
 0xed8   : > { %v2517_v8 = vmul.f32 0.03125, %v2509_v6 }
 0xed9   : > { %v2506_v9 = vpop.xlane.xlu0 %2505 }
 0xeda   : > { %v6763_v22 = vsub.f32 %v6743_v25, %v2517_v8  ;;  %v2516_v21 = vmul.f32 0.03125, %v2506_v9 }
 0xedc   : > { %v6766_v60 = vsub.f32 %v6746_v56, %v2516_v21  ;;  %v2525_v48 = vmul.f32 %v6763_v22, %v6763_v22  ;;  %v6816_v21 = vld [vmem:[%s7377_s2 + $0x190] sm:$0xff] }
 0xedd   : > { %v2587_v41 = vrot.slane %v6816_v21, %v346_v11 }
 0xede   : > { %v2515_v63 = vpop.xlane.xlu1 %2514  ;;  %v2531_v24 = vsel %vm262_vm0, %v2525_v48, 0.0  ;;  %v2524_v13 = vmul.f32 %v6766_v60, %v6766_v60 }
 0xedf   : > { %v2519_v5 = vmul.f32 0.03125, %v2515_v63  ;;  %2532 = vadd.xlane.f32.xlu1 %v2531_v24  ;;  %v2559_v63 = vrot.slane %v6816_v21, %v6271_v51 }
 0xee0   : > { %v2512_v20 = vpop.xlane.xlu0 %2511  ;;  %v2528_v10 = vsel %vm262_vm0, %v2524_v13, 0.0 }
 0xee1   : > { %v6775_v14 = vsub.f32 %v6753_v29, %v2519_v5  ;;  %v2518_v15 = vmul.f32 0.03125, %v2512_v20  ;;  %2529 = vadd.xlane.f32.xlu0 %v2528_v10  ;;  %v2567_v20 = vrot.slane %v6816_v21, %v326_v53 }
 0xee3   : > { %v6778_v16 = vsub.f32 %v6756_v4, %v2518_v15  ;;  %v2527_v17 = vmul.f32 %v6775_v14, %v6775_v14 }
 0xee5   : > { %v2537_v18 = vsel %vm262_vm0, %v2527_v17, 0.0  ;;  %v2526_v27 = vmul.f32 %v6778_v16, %v6778_v16 }
 0xee6   : > { %2538 = vadd.xlane.f32.xlu1 %v2537_v18 }
 0xee7   : > { %v2534_v31 = vsel %vm262_vm0, %v2526_v27, 0.0 }
 0xee8   : > { %2535 = vadd.xlane.f32.xlu0 %v2534_v31 }
 0xf68   : > { %v2533_v46 = vpop.xlane.xlu1 %2532 }
 0xf69   : > { %v2541_v58 = vmul.f32 0.03125, %v2533_v46 }
 0xf6a   : > { %v2530_v62 = vpop.xlane.xlu0 %2529 }
 0xf6b   : > { %v2545_v0 = vadd.f32 1e-05, %v2541_v58  ;;  %v2540_v1 = vmul.f32 0.03125, %v2530_v62  ;;  %v2777_v58 = vrot.slane %v6816_v21, %v6328_v26 }
 0xf6d   : > { %6056 = vrsqrt.f32 %v2545_v0  ;;  %v2544_v2 = vadd.f32 1e-05, %v2540_v1 }
 0xf6f   : > { %6058 = vrsqrt.f32 %v2544_v2  ;;  %v2539_v3 = vpop.xlane.xlu1 %2538 }
 0xf70   : > { %v2543_v32 = vmul.f32 0.03125, %v2539_v3 }
 0xf71   : > { %v2536_v7 = vpop.xlane.xlu0 %2535 }
 0xf72   : > { %v2547_v6 = vadd.f32 1e-05, %v2543_v32  ;;  %v2542_v8 = vmul.f32 0.03125, %v2536_v7 }
 0xf74   : > { %6060 = vrsqrt.f32 %v2547_v6  ;;  %v2546_v9 = vadd.f32 1e-05, %v2542_v8 }
 0xf76   : > { %6062 = vrsqrt.f32 %v2546_v9  ;;  %v2688_v9 = vrot.slane %v6816_v21, %v447_v12 }
 0xf7a   : > { %v6057_v48 = vpop.eup %6056 }
 0xf7b   : > { %v2553_v24 = vmul.f32 %v6057_v48, %v6763_v22  ;;  %v2578_v22 = vld [vmem:[%s7377_s2 + $0x100] sm:$0xff] }
 0xf7c   : > { %v6059_v13 = vpop.eup %6058 }
 0xf7d   : > { %v2552_v5 = vmul.f32 %v6059_v13, %v6766_v60  ;;  %v2561_v10 = vmul.f32 %v2559_v63, %v2553_v24 }
 0xf7f   : > { %v2560_v15 = vmul.f32 %v2559_v63, %v2552_v5  ;;  %v2569_v27 = vadd.f32 %v2567_v20, %v2561_v10 }
 0xf81   : > { %v6061_v17 = vpop.eup %6060  ;;  %v2568_v18 = vadd.f32 %v2567_v20, %v2560_v15  ;;  %v2864_v15 = vld [vmem:[%s6382_s6 + $0x8] sm:$0xff] }
 0xf82   : > { %v2555_v31 = vmul.f32 %v6061_v17, %v6775_v14  ;;  %v2577_v14 = vld [vmem:[%s7377_s2 + $0xf8] sm:$0xff] }
 0xf83   : > { %v6063_v34 = vpop.eup %6062  ;;  %5722 = vmatprep.mubr.msk.f32.mxu1 %vm262_vm0, %v2568_v18  ;;  %5750 = vmatprep.mubr.msk.f32.mxu0 %vm262_vm0, %v2568_v18 }
 0xf84   : > { %5723 = vmatmul.mubr.msk.f32.vlgmr.msra.gmra.mxu1 %vm262_vm0, %v2569_v27  ;;  %5751 = vmatmul.mubr.msk.f32.vlgmr.msra.gmra.mxu0 %vm262_vm0, %v2569_v27  ;;  %v2554_v53 = vmul.f32 %v6063_v34, %v6778_v16  ;;  %v2563_v60 = vmul.f32 %v2559_v63, %v2555_v31  ;;  %v2866_v34 = vld [vmem:[%s6382_s6 + $0x18] sm:$0xff] }
 0xf85   : > { %5729 = vmatpush3.msra.mxu1 %v2579_v28 }
 0xf86   : > { %5730 = vmatprep.subr.mxu1 %v2578_v22  ;;  %v2562_v42 = vmul.f32 %v2559_v63, %v2554_v53  ;;  %v2571_v36 = vadd.f32 %v2567_v20, %v2563_v60 }
 0xf87   : > { %5731 = vmatpush3.msra.mxu1 %v2578_v22 }
 0xf88   : > { %v2570_v35 = vadd.f32 %v2567_v20, %v2562_v42  ;;  %5732 = vmatprep.subr.mxu1 %v2577_v14 }
 0xf89   : > { %5733 = vmatpush3.msra.mxu1 %v2577_v14  ;;  %v2865_v14 = vld [vmem:[%s6382_s6 + $0x10] sm:$0xff] }
 0xf8a   : > { %5725 = vmatprep.mubr.msk.f32.mxu1 %vm262_vm0, %v2570_v35  ;;  %5753 = vmatprep.mubr.msk.f32.mxu0 %vm262_vm0, %v2570_v35 }
 0xf8b   : > { %5726 = vmatmul.mubr.msk.f32.gmra.mxu1 %vm262_vm0, %v2571_v36  ;;  %5754 = vmatmul.mubr.msk.f32.gmra.mxu0 %vm262_vm0, %v2571_v36 }
 0xf8c   : > { %5736 = vmatprep.mubr.msk.f32.mxu1 %vm262_vm0, %v2568_v18  ;;  %5734 = vmatprep.subr.mxu1 %v2576_v30  ;;  %v2863_v18 = vld [vmem:[%s6382_s6] sm:$0xff] }
 0xf8d   : > { %5735 = vmatpush3.msra.mxu1 %v2576_v30 }
 0xf8f   : > { %5737 = vmatmul.mubr.msk.f32.vlgmr.msra.gmra.mxu1 %vm262_vm0, %v2569_v27 }
 0xf90   : > { %5739 = vmatprep.mubr.msk.f32.mxu1 %vm262_vm0, %v2570_v35 }
 0xf93   : > { %5740 = vmatmul.mubr.msk.f32.gmra.mxu1 %vm262_vm0, %v2571_v36 }
0x1044   : > { %v5724_v16 = vpop.f32.mrf.mxu1  ;;  %v5752_v37 = vpop.f32.mrf.mxu0 }
0x1045   : > { %v6863_v7 = vadd.f32 %v5752_v37, %v2777_v58  ;;  %v6900_v5 = vadd.f32 %v5724_v16, %v2587_v41 }
0x1046   : > { %v2666_v43 = vpop.f32.mrf.mxu1  ;;  %v2844_v46 = vpop.f32.mrf.mxu0 }
0x1047   : > { %v6851_v28 = vadd.f32 %v2666_v43, %v2587_v41  ;;  %v6867_v8 = vadd.f32 %v2844_v46, %v2777_v58 }
0x1049   : > { %5764 = vmatprep.mubr.msk.f32.mxu1 %vm627_vm1, %v6851_v28 }
0x104b   : > { %v5727_v62 = vpop.f32.mrf.mxu1  ;;  %v5755_v0 = vpop.f32.mrf.mxu0 }
0x104c   : > { %v6857_v1 = vadd.f32 %v5755_v0, %v2777_v58  ;;  %v6908_v10 = vadd.f32 %v5727_v62, %v2587_v41 }
0x104d   : > { %v2676_v2 = vpop.f32.mrf.mxu1  ;;  %v2854_v3 = vpop.f32.mrf.mxu0 }
0x104e   : > { %v6859_v32 = vadd.f32 %v2854_v3, %v2777_v58  ;;  %5770 = vmatprep.subr.mxu0 %v6857_v1  ;;  %v6902_v20 = vadd.f32 %v2676_v2, %v2587_v41 }
0x104f   : > { %v5738_v11 = vpop.f32.mrf.mxu1  ;;  %5771 = vmatpush3.msra.mxu0 %v6857_v1 }
0x1050   : > { %5772 = vmatprep.subr.mxu0 %v6859_v32  ;;  %v6886_v12 = vadd.f32 %v5738_v11, %v2688_v9 }
0x1051   : > { %v2755_v6 = vpop.f32.mrf.mxu1  ;;  %5773 = vmatpush3.msra.mxu0 %v6859_v32 }
0x1052   : > { %5774 = vmatprep.subr.mxu0 %v6863_v7  ;;  %v6892_v21 = vadd.f32 %v2755_v6, %v2688_v9 }
0x1053   : > { %v5741_v48 = vpop.f32.mrf.mxu1  ;;  %5775 = vmatpush3.msra.mxu0 %v6863_v7 }
0x1054   : > { %v6874_v63 = vadd.f32 %v5741_v48, %v2688_v9  ;;  %5776 = vmatprep.subr.mxu0 %v6867_v8 }
0x1055   : > { %v2765_v24 = vpop.f32.mrf.mxu1  ;;  %5777 = vmatpush3.msra.mxu0 %v6867_v8 }
0x1056   : > { %v6878_v13 = vadd.f32 %v2765_v24, %v2688_v9  ;;  %5756 = vmatprep.subr.msk.mxu1 %vm627_vm1, %v6874_v63 }
0x1057   : > { %5757 = vmatpush3.xpose.msk.msra.mxu1 %vm627_vm1, %v6874_v63 }
0x1058   : > { %5758 = vmatprep.subr.msk.mxu1 %vm627_vm1, %v6878_v13 }
0x105b   : > { %5759 = vmatpush3.xpose.msk.msra.mxu1 %vm627_vm1, %v6878_v13 }
0x105c   : > { %5760 = vmatprep.subr.msk.mxu1 %vm627_vm1, %v6886_v12 }
0x105f   : > { %5761 = vmatpush3.xpose.msk.msra.mxu1 %vm627_vm1, %v6886_v12 }
0x1060   : > { %5762 = vmatprep.subr.msk.mxu1 %vm627_vm1, %v6892_v21 }
0x1063   : > { %5763 = vmatpush3.xpose.msk.msra.mxu1 %vm627_vm1, %v6892_v21 }
0x1066   : > { %5765 = vmatmul.mubr.msk.f32.vlgmr.msra.gmra.mxu1 %vm627_vm1, %v6900_v5 }
0x1067   : > { %5767 = vmatprep.mubr.msk.f32.mxu1 %vm627_vm1, %v6902_v20 }
0x106a   : > { %5768 = vmatmul.mubr.msk.f32.gmra.mxu1 %vm627_vm1, %v6908_v10 }
0x1126   : > { %v5766_v17 = vpop.f32.mrf.mxu1 }
0x1127   : > { %v2963_v27 = vadd.f32 %v5766_v17, %v2864_v15 }
0x1128   : > { %v2957_v31 = vpop.f32.mrf.mxu1 }
0x1129   : > { %v2958_v22 = vadd.f32 %v2957_v31, %v2863_v18  ;;  %v2979_v53 = vsel %vm262_vm0, %v2963_v27, -inf }
0x112a   : > { %2980 = vmax.xlane.f32.xlu1 %v2979_v53  ;;  %v5769_v60 = vpop.f32.mrf.mxu1 }
0x112b   : > { %v2973_v42 = vadd.f32 %v5769_v60, %v2866_v34  ;;  %v2976_v35 = vsel %vm262_vm0, %v2958_v22, -inf }
0x112c   : > { %2977 = vmax.xlane.f32.xlu0 %v2976_v35  ;;  %v2967_v36 = vpop.f32.mrf.mxu1 }
0x112d   : > { %v2968_v30 = vadd.f32 %v2967_v36, %v2865_v14  ;;  %v2985_v16 = vsel %vm262_vm0, %v2973_v42, -inf }
0x112e   : > { %2986 = vmax.xlane.f32.xlu1 %v2985_v16 }
0x112f   : > { %v2982_v41 = vsel %vm262_vm0, %v2968_v30, -inf }
0x1130   : > { %2983 = vmax.xlane.f32.xlu0 %v2982_v41 }
0x11b3   : > { %v2981_v37 = vpop.xlane.xlu1 %2980 }
0x11b4   : > { %v2989_v43 = vsub.f32 %v2963_v27, %v2981_v37 }
0x11b5   : > { %v2978_v46 = vpop.xlane.xlu0 %2977 }
0x11b6   : > { %v2994_v58 = vmul.f32 1.442695, %v2989_v43  ;;  %v2988_v62 = vsub.f32 %v2958_v22, %v2978_v46 }
0x11b7   : > { %v2987_v0 = vpop.xlane.xlu1 %2986 }
0x11b8   : > { %6064 = vpow2.f32 %v2994_v58  ;;  %v2992_v2 = vmul.f32 1.442695, %v2988_v62  ;;  %v2991_v3 = vsub.f32 %v2973_v42, %v2987_v0 }
0x11b9   : > { %v2984_v11 = vpop.xlane.xlu0 %2983 }
0x11ba   : > { %6066 = vpow2.f32 %v2992_v2  ;;  %v2998_v6 = vmul.f32 1.442695, %v2991_v3  ;;  %v2990_v9 = vsub.f32 %v2968_v30, %v2984_v11 }
0x11bc   : > { %6068 = vpow2.f32 %v2998_v6  ;;  %v2996_v48 = vmul.f32 1.442695, %v2990_v9 }
0x11be   : > { %6070 = vpow2.f32 %v2996_v48  ;;  %v3122_v48 = vld [vmem:[%s7377_s2 + $0x130] sm:$0xff] }
0x11c5   : > { %v6065_v24 = vpop.eup %6064 }
0x11c6   : > { %v3003_v15 = vsel %vm262_vm0, %v6065_v24, 0.0 }
0x11c7   : > { %v6067_v17 = vpop.eup %6066  ;;  %3004 = vadd.xlane.f32.xlu1 %v3003_v15 }
0x11c8   : > { %v3000_v18 = vsel %vm262_vm0, %v6067_v17, 0.0 }
0x11c9   : > { %v6069_v27 = vpop.eup %6068  ;;  %3001 = vadd.xlane.f32.xlu0 %v3000_v18 }
0x11ca   : > { %v3009_v31 = vsel %vm262_vm0, %v6069_v27, 0.0 }
0x11cb   : > { %v6071_v34 = vpop.eup %6070  ;;  %3010 = vadd.xlane.f32.xlu1 %v3009_v31 }
0x11cc   : > { %v3006_v22 = vsel %vm262_vm0, %v6071_v34, 0.0 }
0x11cd   : > { %3007 = vadd.xlane.f32.xlu0 %v3006_v22 }
0x11dc   : > { %3139 = vrot.lane.b32.xlu1 %v6878_v13, %s6158_s7 }
0x11e0   : > { %3137 = vrot.lane.b32.xlu1 %v6886_v12, %s6158_s7 }
0x11e3   : > { %3141 = vrot.lane.b32.xlu0 %v6874_v63, %s6158_s7 }
0x11e4   : > { %3135 = vrot.lane.b32.xlu1 %v6892_v21, %s6158_s7 }
0x11e7   : > { %3127 = vrot.lane.b32.xlu0 %v6851_v28, %s6158_s7 }
0x11e8   : > { %3129 = vrot.lane.b32.xlu1 %v6900_v5, %s6158_s7 }
0x11eb   : > { %3131 = vrot.lane.b32.xlu0 %v6902_v20, %s6158_s7 }
0x11ec   : > { %3133 = vrot.lane.b32.xlu1 %v6908_v10, %s6158_s7 }
0x1250   : > { %v3005_v53 = vpop.xlane.xlu1 %3004 }
0x1251   : > { %6072 = vrcp.f32 %v3005_v53 }
0x1252   : > { %v3002_v60 = vpop.xlane.xlu0 %3001 }
0x1253   : > { %6074 = vrcp.f32 %v3002_v60 }
0x1254   : > { %v3011_v14 = vpop.xlane.xlu1 %3010 }
0x1255   : > { %6076 = vrcp.f32 %v3011_v14 }
0x1256   : > { %v3008_v42 = vpop.xlane.xlu0 %3007 }
0x1257   : > { %6078 = vrcp.f32 %v3008_v42 }
0x1258   : > { %v3140_v16 = vpop.permute.xlu1 %3139 }
0x125a   : > { %v3142_v35 = vpop.permute.xlu0 %3141 }
0x125b   : > { %5784 = vmatprep.subr.msk.mxu0 %vm627_vm1, %v3142_v35 }
0x125c   : > { %v3138_v62 = vpop.permute.xlu1 %3137 }
0x125e   : > { %v6073_v36 = vpop.eup %6072  ;;  %v3128_v2 = vpop.permute.xlu0 %3127 }
0x125f   : > { %v3017_v30 = vmul.f32 %v6073_v36, %v6065_v24 }
0x1260   : > { %v6075_v41 = vpop.eup %6074  ;;  %v3136_v3 = vpop.permute.xlu1 %3135 }
0x1261   : > { %5129 = vst.msk [vmem:[%s6417_s11 + $0x28] sm:$0xff] %vm262_vm0, %v3017_v30  ;;  %v3016_v37 = vmul.f32 %v6075_v41, %v6067_v17 }
0x1262   : > { %v6077_v43 = vpop.eup %6076  ;;  %v3132_v6 = vpop.permute.xlu0 %3131 }
0x1263   : > { %5778 = vmatprep.mubr.msk.f32.mxu0 %vm262_vm0, %v3016_v37  ;;  %5128 = vst.msk [vmem:[%s6417_s11 + $0x20] sm:$0xff] %vm262_vm0, %v3016_v37  ;;  %v3019_v46 = vmul.f32 %v6077_v43, %v6069_v27  ;;  %v5137_v27 = vld [vmem:[%s6382_s6 + $0x28] sm:$0xff] }
0x1264   : > { %v6079_v58 = vpop.eup %6078  ;;  %5779 = vmatmul.mubr.msk.f32.vlgmr.msra.gmra.mxu0 %vm262_vm0, %v3017_v30  ;;  %v3130_v11 = vpop.permute.xlu1 %3129  ;;  %v5139_v30 = vld [vmem:[%s6382_s6 + $0x38] sm:$0xff] }
0x1265   : > { %5785 = vmatpush3.xpose.msk.msra.mxu0 %vm627_vm1, %v3142_v35  ;;  %v3018_v0 = vmul.f32 %v6079_v58, %v6071_v34  ;;  %5131 = vst.msk [vmem:[%s6417_s11 + $0x38] sm:$0xff] %vm262_vm0, %v3019_v46  ;;  %v5136_v34 = vld [vmem:[%s6382_s6 + $0x20] sm:$0xff]  ;;  %v5138_v35 = vld [vmem:[%s6382_s6 + $0x30] sm:$0xff] }
0x1266   : > { %5786 = vmatprep.subr.msk.mxu0 %vm627_vm1, %v3140_v16 }
0x1267   : > { %5781 = vmatprep.mubr.msk.f32.mxu0 %vm262_vm0, %v3018_v0  ;;  %5130 = vst.msk [vmem:[%s6417_s11 + $0x30] sm:$0xff] %vm262_vm0, %v3018_v0 }
0x1268   : > { %5782 = vmatmul.mubr.msk.f32.gmra.mxu0 %vm262_vm0, %v3019_v46  ;;  %v3134_v9 = vpop.permute.xlu1 %3133 }
0x1269   : > { %5787 = vmatpush3.xpose.msk.msra.mxu0 %vm627_vm1, %v3140_v16  ;;  %5792 = vmatprep.mubr.msk.f32.mxu0 %vm627_vm1, %v3128_v2 }
0x126a   : > { %5788 = vmatprep.subr.msk.mxu0 %vm627_vm1, %v3138_v62 }
0x126d   : > { %5789 = vmatpush3.xpose.msk.msra.mxu0 %vm627_vm1, %v3138_v62 }
0x126e   : > { %5790 = vmatprep.subr.msk.mxu0 %vm627_vm1, %v3136_v3 }
0x1271   : > { %5791 = vmatpush3.xpose.msk.msra.mxu0 %vm627_vm1, %v3136_v3 }
0x1272   : > { %5820 = vmatprep.subr.mxu0 %v3122_v48 }
0x1274   : > { %5793 = vmatmul.mubr.msk.f32.vlgmr.msra.gmra.mxu0 %vm627_vm1, %v3130_v11 }
0x1275   : > { %5795 = vmatprep.mubr.msk.f32.mxu0 %vm627_vm1, %v3132_v6  ;;  %5821 = vmatpush3.msra.mxu0 %v3122_v48 }
0x1278   : > { %5796 = vmatmul.mubr.msk.f32.gmra.mxu0 %vm627_vm1, %v3134_v9 }
0x1324   : > { %v5780_v24 = vpop.f32.mrf.mxu0 }
0x1326   : > { %v3103_v15 = vpop.f32.mrf.mxu0 }
0x1327   : > { %5822 = vmatprep.mubr.msk.f32.mxu0 %vm627_vm1, %v3103_v15 }
0x1328   : > { %v5783_v17 = vpop.f32.mrf.mxu0  ;;  %5823 = vmatmul.mubr.msk.f32.vlgmr.msra.gmra.mxu0 %vm627_vm1, %v5780_v24 }
0x132a   : > { %v3113_v18 = vpop.f32.mrf.mxu0 }
0x132b   : > { %5825 = vmatprep.mubr.msk.f32.mxu0 %vm627_vm1, %v3113_v18 }
0x132c   : > { %5826 = vmatmul.mubr.msk.f32.gmra.mxu0 %vm627_vm1, %v5783_v17 }
0x1334   : > { %v5794_v31 = vpop.f32.mrf.mxu0 }
0x1335   : > { %v3231_v22 = vadd.f32 %v5794_v31, %v5137_v27 }
0x1336   : > { %v3225_v53 = vpop.f32.mrf.mxu0 }
0x1337   : > { %v3226_v60 = vadd.f32 %v5136_v34, %v3225_v53  ;;  %v3247_v14 = vsel %vm262_vm0, %v3231_v22, -inf }
0x1338   : > { %3248 = vmax.xlane.f32.xlu1 %v3247_v14  ;;  %v5797_v42 = vpop.f32.mrf.mxu0 }
0x1339   : > { %v3244_v36 = vsel %vm262_vm0, %v3226_v60, -inf  ;;  %v3241_v37 = vadd.f32 %v5797_v42, %v5139_v30 }
0x133a   : > { %3245 = vmax.xlane.f32.xlu0 %v3244_v36  ;;  %v3235_v16 = vpop.f32.mrf.mxu0 }
0x133b   : > { %v3236_v41 = vadd.f32 %v5138_v35, %v3235_v16  ;;  %v3253_v46 = vsel %vm262_vm0, %v3241_v37, -inf  ;;  %v3417_v16 = vld [vmem:[%s7377_s2 + $0x138] sm:$0xff] }
0x133d   : > { %v3250_v43 = vsel %vm262_vm0, %v3236_v41, -inf }
0x133e   : > { %3251 = vmax.xlane.f32.xlu0 %v3250_v43 }
0x1342   : > { %3254 = vmax.xlane.f32.xlu0 %v3253_v46 }
0x13c1   : > { %v3249_v58 = vpop.xlane.xlu1 %3248 }
0x13c2   : > { %v3257_v62 = vsub.f32 %v3231_v22, %v3249_v58 }
0x13c3   : > { %v3246_v0 = vpop.xlane.xlu0 %3245 }
0x13c4   : > { %v3262_v2 = vmul.f32 1.442695, %v3257_v62  ;;  %v3256_v3 = vsub.f32 %v3226_v60, %v3246_v0 }
0x13c6   : > { %6080 = vpow2.f32 %v3262_v2  ;;  %v3260_v11 = vmul.f32 1.442695, %v3256_v3 }
0x13c7   : > { %v3252_v6 = vpop.xlane.xlu0 %3251 }
0x13c8   : > { %6082 = vpow2.f32 %v3260_v11  ;;  %v3258_v9 = vsub.f32 %v3236_v41, %v3252_v6 }
0x13ca   : > { %v3264_v48 = vmul.f32 1.442695, %v3258_v9 }
0x13cb   : > { %v3255_v24 = vpop.xlane.xlu0 %3254 }
0x13cc   : > { %6084 = vpow2.f32 %v3264_v48  ;;  %v3259_v15 = vsub.f32 %v3241_v37, %v3255_v24 }
0x13ce   : > { %v3266_v17 = vmul.f32 1.442695, %v3259_v15 }
0x13d0   : > { %6086 = vpow2.f32 %v3266_v17 }
0x13d3   : > { %v6081_v18 = vpop.eup %6080 }
0x13d4   : > { %v3271_v27 = vsel %vm262_vm0, %v6081_v18, 0.0 }
0x13d5   : > { %v6083_v31 = vpop.eup %6082  ;;  %3272 = vadd.xlane.f32.xlu1 %v3271_v27 }
0x13d6   : > { %v3268_v34 = vsel %vm262_vm0, %v6083_v31, 0.0 }
0x13d7   : > { %3269 = vadd.xlane.f32.xlu0 %v3268_v34 }
0x13d9   : > { %v6085_v22 = vpop.eup %6084 }
0x13da   : > { %v3274_v53 = vsel %vm262_vm0, %v6085_v22, 0.0 }
0x13db   : > { %3275 = vadd.xlane.f32.xlu0 %v3274_v53 }
0x13dd   : > { %v6087_v60 = vpop.eup %6086 }
0x13de   : > { %v3277_v14 = vsel %vm262_vm0, %v6087_v60, 0.0 }
0x13df   : > { %3278 = vadd.xlane.f32.xlu1 %v3277_v14 }
0x13f0   : > { %3316 = vrot.lane.b32.xlu1 %v6859_v32, %s6158_s7 }
0x13f1   : > { %3318 = vrot.lane.b32.xlu0 %v6857_v1, %s6158_s7 }
0x13f4   : > { %3314 = vrot.lane.b32.xlu1 %v6863_v7, %s6158_s7 }
0x13f5   : > { %3630 = vrot.lane.b32.xlu0 %v6874_v63, %s6159_s14 }
0x13f8   : > { %3312 = vrot.lane.b32.xlu1 %v6867_v8, %s6158_s7 }
0x13f9   : > { %3626 = vrot.lane.b32.xlu0 %v6886_v12, %s6159_s14 }
0x13fc   : > { %3628 = vrot.lane.b32.xlu1 %v6878_v13, %s6159_s14 }
0x13fd   : > { %3616 = vrot.lane.b32.xlu0 %v6851_v28, %s6159_s14 }
0x1400   : > { %3624 = vrot.lane.b32.xlu1 %v6892_v21, %s6159_s14 }
0x1401   : > { %3620 = vrot.lane.b32.xlu0 %v6902_v20, %s6159_s14 }
0x1404   : > { %3618 = vrot.lane.b32.xlu1 %v6900_v5, %s6159_s14 }
0x1405   : > { %4022 = vrot.lane.b32.xlu0 %v6874_v63, %s6160_s15 }
0x1408   : > { %3622 = vrot.lane.b32.xlu1 %v6908_v10, %s6159_s14 }
0x1409   : > { %4018 = vrot.lane.b32.xlu0 %v6886_v12, %s6160_s15 }
0x140c   : > { %4020 = vrot.lane.b32.xlu1 %v6878_v13, %s6160_s15 }
0x140d   : > { %4008 = vrot.lane.b32.xlu0 %v6851_v28, %s6160_s15 }
0x1410   : > { %4016 = vrot.lane.b32.xlu1 %v6892_v21, %s6160_s15 }
0x1411   : > { %4012 = vrot.lane.b32.xlu0 %v6902_v20, %s6160_s15 }
0x1414   : > { %4010 = vrot.lane.b32.xlu1 %v6900_v5, %s6160_s15 }
0x1418   : > { %4014 = vrot.lane.b32.xlu1 %v6908_v10, %s6160_s15 }
0x145e   : > { %v3273_v12 = vpop.xlane.xlu1 %3272 }
0x1460   : > { %v3270_v63 = vpop.xlane.xlu0 %3269 }
0x1461   : > { %6088 = vrcp.f32 %v3270_v63 }
0x1462   : > { %6090 = vrcp.f32 %v3273_v12 }
0x1464   : > { %v3276_v42 = vpop.xlane.xlu0 %3275 }
0x1465   : > { %6092 = vrcp.f32 %v3276_v42 }
0x1468   : > { %v3279_v13 = vpop.xlane.xlu1 %3278  ;;  %v3319_v28 = vpop.permute.xlu0 %3318 }
0x1469   : > { %6094 = vrcp.f32 %v3279_v13  ;;  %5798 = vmatprep.subr.mxu1 %v3319_v28 }
0x146a   : > { %5799 = vmatpush3.msra.mxu1 %v3319_v28  ;;  %v5165_v28 = vld [vmem:[%s6382_s6 + $0x48] sm:$0xff] }
0x146c   : > { %v3317_v21 = vpop.permute.xlu1 %3316  ;;  %v3631_v46 = vpop.permute.xlu0 %3630 }
0x146d   : > { %5800 = vmatprep.subr.mxu1 %v3317_v21 }
0x146e   : > { %v6089_v20 = vpop.eup %6088  ;;  %5801 = vmatpush3.msra.mxu1 %v3317_v21 }
0x146f   : > { %v7023_v35 = vmul.f32 %v6089_v20, %v6083_v31  ;;  %v6091_v10 = vpop.eup %6090  ;;  %v5164_v20 = vld [vmem:[%s6382_s6 + $0x40] sm:$0xff] }
0x1470   : > { %v3315_v5 = vpop.permute.xlu1 %3314  ;;  %v7030_v41 = vmul.f32 %v6091_v10, %v6081_v18  ;;  %v3627_v62 = vpop.permute.xlu0 %3626 }
0x1471   : > { %5802 = vmatprep.subr.mxu1 %v3315_v5  ;;  %5806 = vmatprep.mubr.msk.f32.mxu1 %vm262_vm0, %v7023_v35 }
0x1472   : > { %5803 = vmatpush3.msra.mxu1 %v3315_v5  ;;  %v6093_v36 = vpop.eup %6092 }
0x1473   : > { %v7032_v43 = vmul.f32 %v6093_v36, %v6085_v22 }
0x1474   : > { %v3313_v30 = vpop.permute.xlu1 %3312  ;;  %v3617_v2 = vpop.permute.xlu0 %3616 }
0x1475   : > { %5804 = vmatprep.subr.mxu1 %v3313_v30 }
0x1476   : > { %v6095_v37 = vpop.eup %6094  ;;  %5805 = vmatpush3.msra.mxu1 %v3313_v30 }
0x1477   : > { %5807 = vmatmul.mubr.msk.f32.vlgmr.msra.gmra.mxu1 %vm262_vm0, %v7030_v41  ;;  %5812 = vmatprep.subr.mxu1 %v3417_v16  ;;  %v7039_v58 = vmul.f32 %v6095_v37, %v6087_v60  ;;  %v5166_v37 = vld [vmem:[%s6382_s6 + $0x50] sm:$0xff] }
0x1478   : > { %5809 = vmatprep.mubr.msk.f32.mxu1 %vm262_vm0, %v7032_v43  ;;  %5813 = vmatpush3.msra.mxu1 %v3417_v16  ;;  %v3629_v0 = vpop.permute.xlu1 %3628  ;;  %v3621_v48 = vpop.permute.xlu0 %3620 }
0x1479   : > { %5828 = vmatprep.subr.msk.mxu1 %vm627_vm1, %v3631_v46 }
0x147b   : > { %5810 = vmatmul.mubr.msk.f32.gmra.mxu1 %vm262_vm0, %v7039_v58 }
0x147c   : > { %v3625_v6 = vpop.permute.xlu1 %3624  ;;  %v4023_v17 = vpop.permute.xlu0 %4022 }
0x1480   : > { %v3619_v15 = vpop.permute.xlu1 %3618  ;;  %v4019_v27 = vpop.permute.xlu0 %4018 }
0x1484   : > { %v3623_v18 = vpop.permute.xlu1 %3622  ;;  %v4009_v34 = vpop.permute.xlu0 %4008 }
0x1488   : > { %v4021_v31 = vpop.permute.xlu1 %4020  ;;  %v4013_v60 = vpop.permute.xlu0 %4012 }
0x148c   : > { %v4017_v22 = vpop.permute.xlu1 %4016 }
0x1490   : > { %v4011_v53 = vpop.permute.xlu1 %4010 }
0x1494   : > { %v4015_v14 = vpop.permute.xlu1 %4014 }
0x1537   : > { %v5808_v3 = vpop.f32.mrf.mxu1 }
0x1539   : > { %v3398_v11 = vpop.f32.mrf.mxu1 }
0x153a   : > { %5814 = vmatprep.mubr.msk.f32.mxu1 %vm627_vm1, %v3398_v11 }
0x153b   : > { %v5811_v9 = vpop.f32.mrf.mxu1  ;;  %5815 = vmatmul.mubr.msk.f32.vlgmr.msra.gmra.mxu1 %vm627_vm1, %v5808_v3 }
0x153c   : > { %5829 = vmatpush3.xpose.msk.msra.mxu1 %vm627_vm1, %v3631_v46 }
0x153d   : > { %5830 = vmatprep.subr.msk.mxu1 %vm627_vm1, %v3629_v0  ;;  %v3408_v24 = vpop.f32.mrf.mxu1 }
0x153e   : > { %5817 = vmatprep.mubr.msk.f32.mxu1 %vm627_vm1, %v3408_v24 }
0x153f   : > { %5818 = vmatmul.mubr.msk.f32.gmra.mxu1 %vm627_vm1, %v5811_v9 }
0x1540   : > { %5831 = vmatpush3.xpose.msk.msra.mxu1 %vm627_vm1, %v3629_v0  ;;  %5836 = vmatprep.mubr.msk.f32.mxu1 %vm627_vm1, %v3617_v2 }
0x1541   : > { %5832 = vmatprep.subr.msk.mxu1 %vm627_vm1, %v3627_v62 }
0x1544   : > { %5833 = vmatpush3.xpose.msk.msra.mxu1 %vm627_vm1, %v3627_v62  ;;  %v5167_v62 = vld [vmem:[%s6382_s6 + $0x58] sm:$0xff] }
0x1545   : > { %5834 = vmatprep.subr.msk.mxu1 %vm627_vm1, %v3625_v6 }
0x1548   : > { %5835 = vmatpush3.xpose.msk.msra.mxu1 %vm627_vm1, %v3625_v6 }
0x1549   : > { %5864 = vmatprep.subr.msk.mxu1 %vm627_vm1, %v4023_v17 }
0x154b   : > { %5837 = vmatmul.mubr.msk.f32.vlgmr.msra.gmra.mxu1 %vm627_vm1, %v3619_v15 }
0x154c   : > { %5839 = vmatprep.mubr.msk.f32.mxu1 %vm627_vm1, %v3621_v48  ;;  %5865 = vmatpush3.xpose.msk.msra.mxu1 %vm627_vm1, %v4023_v17 }
0x154d   : > { %5866 = vmatprep.subr.msk.mxu1 %vm627_vm1, %v4021_v31 }
0x154f   : > { %5840 = vmatmul.mubr.msk.f32.gmra.mxu1 %vm627_vm1, %v3623_v18 }
0x1550   : > { %5867 = vmatpush3.xpose.msk.msra.mxu1 %vm627_vm1, %v4021_v31  ;;  %5872 = vmatprep.mubr.msk.f32.mxu1 %vm627_vm1, %v4009_v34 }
0x1551   : > { %5868 = vmatprep.subr.msk.mxu1 %vm627_vm1, %v4019_v27 }
0x1554   : > { %5869 = vmatpush3.xpose.msk.msra.mxu1 %vm627_vm1, %v4019_v27 }
0x1555   : > { %5870 = vmatprep.subr.msk.mxu1 %vm627_vm1, %v4017_v22 }
0x1558   : > { %5871 = vmatpush3.xpose.msk.msra.mxu1 %vm627_vm1, %v4017_v22 }
0x155b   : > { %5873 = vmatmul.mubr.msk.f32.vlgmr.msra.gmra.mxu1 %vm627_vm1, %v4011_v53 }
0x155c   : > { %5875 = vmatprep.mubr.msk.f32.mxu1 %vm627_vm1, %v4013_v60 }
0x155f   : > { %5876 = vmatmul.mubr.msk.f32.gmra.mxu1 %vm627_vm1, %v4015_v14 }
0x15fb   : > { %v7070_v63 = vpop.f32.mrf.mxu1 }
0x15fd   : > { %v7072_v12 = vpop.f32.mrf.mxu1 }
0x15ff   : > { %v7074_v42 = vpop.f32.mrf.mxu1 }
0x1601   : > { %v7076_v13 = vpop.f32.mrf.mxu1 }
0x160b   : > { %v5838_v21 = vpop.f32.mrf.mxu1 }
0x160c   : > { %v3720_v5 = vadd.f32 %v5838_v21, %v5165_v28 }
0x160d   : > { %v3714_v10 = vpop.f32.mrf.mxu1 }
0x160e   : > { %v3715_v36 = vadd.f32 %v5164_v20, %v3714_v10  ;;  %v3736_v30 = vsel %vm262_vm0, %v3720_v5, -inf }
0x160f   : > { %3737 = vmax.xlane.f32.xlu1 %v3736_v30  ;;  %v5841_v16 = vpop.f32.mrf.mxu1 }
0x1610   : > { %v3733_v46 = vsel %vm262_vm0, %v3715_v36, -inf  ;;  %v3730_v3 = vadd.f32 %v5841_v16, %v5167_v62 }
0x1611   : > { %3734 = vmax.xlane.f32.xlu0 %v3733_v46  ;;  %v3724_v0 = vpop.f32.mrf.mxu1  ;;  %v5188_v46 = vld [vmem:[%s6382_s6 + $0x60] sm:$0xff] }
0x1612   : > { %v3725_v2 = vadd.f32 %v5166_v37, %v3724_v0  ;;  %v3742_v6 = vsel %vm262_vm0, %v3730_v3, -inf }
0x1614   : > { %v3739_v11 = vsel %vm262_vm0, %v3725_v2, -inf }
0x1615   : > { %3740 = vmax.xlane.f32.xlu0 %v3739_v11 }
0x1619   : > { %3743 = vmax.xlane.f32.xlu0 %v3742_v6 }
0x161b   : > { %v5874_v16 = vpop.f32.mrf.mxu1 }
0x161d   : > { %v4106_v37 = vpop.f32.mrf.mxu1 }
0x161e   : > { %v4107_v0 = vadd.f32 %v5188_v46, %v4106_v37 }
0x161f   : > { %v5877_v62 = vpop.f32.mrf.mxu1 }
0x1620   : > { %v4125_v6 = vsel %vm262_vm0, %v4107_v0, -inf }
0x1698   : > { %v3738_v9 = vpop.xlane.xlu1 %3737 }
0x1699   : > { %v3746_v48 = vsub.f32 %v3720_v5, %v3738_v9  ;;  %v5191_v9 = vld [vmem:[%s6382_s6 + $0x78] sm:$0xff] }
0x169a   : > { %v3735_v24 = vpop.xlane.xlu0 %3734 }
0x169b   : > { %v3751_v15 = vmul.f32 1.442695, %v3746_v48  ;;  %v3745_v17 = vsub.f32 %v3715_v36, %v3735_v24  ;;  %v4122_v48 = vadd.f32 %v5877_v62, %v5191_v9 }
0x169d   : > { %6096 = vpow2.f32 %v3751_v15  ;;  %v3749_v18 = vmul.f32 1.442695, %v3745_v17  ;;  %v5189_v15 = vld [vmem:[%s6382_s6 + $0x68] sm:$0xff] }
0x169e   : > { %v3741_v27 = vpop.xlane.xlu0 %3740  ;;  %v4112_v17 = vadd.f32 %v5874_v16, %v5189_v15 }
0x169f   : > { %6098 = vpow2.f32 %v3749_v18  ;;  %v3747_v31 = vsub.f32 %v3725_v2, %v3741_v27  ;;  %v4116_v2 = vpop.f32.mrf.mxu1  ;;  %v4134_v18 = vsel %vm262_vm0, %v4122_v48, -inf }
0x16a0   : > { %v4128_v27 = vsel %vm262_vm0, %v4112_v17, -inf }
0x16a1   : > { %v3753_v34 = vmul.f32 1.442695, %v3747_v31 }
0x16a2   : > { %v3744_v22 = vpop.xlane.xlu0 %3743 }
0x16a3   : > { %6100 = vpow2.f32 %v3753_v34  ;;  %v3748_v53 = vsub.f32 %v3730_v3, %v3744_v22  ;;  %v5190_v3 = vld [vmem:[%s6382_s6 + $0x70] sm:$0xff] }
0x16a4   : > { %v4117_v11 = vadd.f32 %v5190_v3, %v4116_v2 }
0x16a5   : > { %v3755_v60 = vmul.f32 1.442695, %v3748_v53 }
0x16a6   : > { %v4131_v24 = vsel %vm262_vm0, %v4117_v11, -inf }
0x16a7   : > { %6102 = vpow2.f32 %v3755_v60 }
0x16aa   : > { %v6097_v14 = vpop.eup %6096 }
0x16ab   : > { %v3760_v28 = vsel %vm262_vm0, %v6097_v14, 0.0 }
0x16ac   : > { %v6099_v21 = vpop.eup %6098  ;;  %3761 = vadd.xlane.f32.xlu1 %v3760_v28 }
0x16ad   : > { %v3757_v20 = vsel %vm262_vm0, %v6099_v21, 0.0 }
0x16ae   : > { %3758 = vadd.xlane.f32.xlu0 %v3757_v20 }
0x16b0   : > { %v6101_v5 = vpop.eup %6100 }
0x16b1   : > { %v3763_v10 = vsel %vm262_vm0, %v6101_v5, 0.0 }
0x16b2   : > { %3764 = vadd.xlane.f32.xlu0 %v3763_v10 }
0x16b4   : > { %v6103_v36 = vpop.eup %6102 }
0x16b5   : > { %v3766_v30 = vsel %vm262_vm0, %v6103_v36, 0.0 }
0x16b6   : > { %3767 = vadd.xlane.f32.xlu1 %v3766_v30 }
0x16c7   : > { %3801 = vrot.lane.b32.xlu1 %v6859_v32, %s6159_s14 }
0x16c8   : > { %3803 = vrot.lane.b32.xlu0 %v6857_v1, %s6159_s14 }
0x16cb   : > { %3799 = vrot.lane.b32.xlu1 %v6863_v7, %s6159_s14 }
0x16cf   : > { %3797 = vrot.lane.b32.xlu1 %v6867_v8, %s6159_s14 }
0x16e7   : > { %4126 = vmax.xlane.f32.xlu0 %v4125_v6 }
0x16eb   : > { %4132 = vmax.xlane.f32.xlu0 %v4131_v24 }
0x16ef   : > { %4135 = vmax.xlane.f32.xlu0 %v4134_v18 }
0x16f3   : > { %4129 = vmax.xlane.f32.xlu1 %v4128_v27 }
0x1735   : > { %v3762_v34 = vpop.xlane.xlu1 %3761 }
0x1737   : > { %v3759_v31 = vpop.xlane.xlu0 %3758 }
0x1738   : > { %6104 = vrcp.f32 %v3759_v31 }
0x1739   : > { %6106 = vrcp.f32 %v3762_v34 }
0x173b   : > { %v3765_v22 = vpop.xlane.xlu0 %3764 }
0x173c   : > { %6108 = vrcp.f32 %v3765_v22 }
0x173f   : > { %v3768_v53 = vpop.xlane.xlu1 %3767  ;;  %v3804_v60 = vpop.permute.xlu0 %3803 }
0x1740   : > { %6110 = vrcp.f32 %v3768_v53  ;;  %5842 = vmatprep.subr.mxu0 %v3804_v60 }
0x1741   : > { %5843 = vmatpush3.msra.mxu0 %v3804_v60 }
0x1743   : > { %v3802_v28 = vpop.permute.xlu1 %3801 }
0x1744   : > { %5844 = vmatprep.subr.mxu0 %v3802_v28 }
0x1745   : > { %v6105_v20 = vpop.eup %6104  ;;  %5845 = vmatpush3.msra.mxu0 %v3802_v28 }
0x1746   : > { %v7106_v10 = vmul.f32 %v6105_v20, %v6099_v21  ;;  %v6107_v16 = vpop.eup %6106 }
0x1747   : > { %v3800_v30 = vpop.permute.xlu1 %3799  ;;  %v7110_v62 = vmul.f32 %v6107_v16, %v6097_v14  ;;  %v5824_v16 = vpop.f32.mrf.mxu0 }
0x1748   : > { %5846 = vmatprep.subr.mxu0 %v3800_v30  ;;  %5850 = vmatprep.mubr.msk.f32.mxu0 %vm262_vm0, %v7106_v10 }
0x1749   : > { %5847 = vmatpush3.msra.mxu0 %v3800_v30  ;;  %v6109_v37 = vpop.eup %6108 }
0x174a   : > { %v7112_v3 = vmul.f32 %v6109_v37, %v6101_v5  ;;  %v3593_v37 = vpop.f32.mrf.mxu0 }
0x174b   : > { %v3798_v46 = vpop.permute.xlu1 %3797 }
0x174c   : > { %5848 = vmatprep.subr.mxu0 %v3798_v46 }
0x174d   : > { %v6111_v2 = vpop.eup %6110  ;;  %5849 = vmatpush3.msra.mxu0 %v3798_v46  ;;  %v5827_v46 = vpop.f32.mrf.mxu0 }
0x174e   : > { %5851 = vmatmul.mubr.msk.f32.vlgmr.msra.gmra.mxu0 %vm262_vm0, %v7110_v62  ;;  %v7118_v21 = vmul.f32 %v6111_v2, %v6103_v36 }
0x174f   : > { %5853 = vmatprep.mubr.msk.f32.mxu0 %vm262_vm0, %v7112_v3  ;;  %v3603_v2 = vpop.f32.mrf.mxu0 }
0x1752   : > { %5854 = vmatmul.mubr.msk.f32.gmra.mxu0 %vm262_vm0, %v7118_v21 }
0x1770   : > { %v4127_v6 = vpop.xlane.xlu0 %4126 }
0x1771   : > { %v4137_v9 = vsub.f32 %v4107_v0, %v4127_v6 }
0x1773   : > { %v4141_v14 = vmul.f32 1.442695, %v4137_v9 }
0x1774   : > { %v4133_v24 = vpop.xlane.xlu0 %4132 }
0x1775   : > { %6112 = vpow2.f32 %v4141_v14  ;;  %v4139_v15 = vsub.f32 %v4117_v11, %v4133_v24 }
0x1777   : > { %v4145_v18 = vmul.f32 1.442695, %v4139_v15 }
0x1778   : > { %v4136_v5 = vpop.xlane.xlu0 %4135 }
0x1779   : > { %6114 = vpow2.f32 %v4145_v18  ;;  %v4140_v27 = vsub.f32 %v4122_v48, %v4136_v5  ;;  %v3902_v48 = vld [vmem:[%s7377_s2 + $0x140] sm:$0xff] }
0x177a   : > { %5856 = vmatprep.subr.mxu0 %v3902_v48 }
0x177b   : > { %v4147_v22 = vmul.f32 1.442695, %v4140_v27  ;;  %5857 = vmatpush3.msra.mxu0 %v3902_v48 }
0x177c   : > { %v4130_v31 = vpop.xlane.xlu1 %4129 }
0x177d   : > { %v4138_v34 = vsub.f32 %v4112_v17, %v4130_v31 }
0x177f   : > { %v4143_v53 = vmul.f32 1.442695, %v4138_v34 }
0x1781   : > { %6116 = vpow2.f32 %v4143_v53 }
0x1782   : > { %v6113_v36 = vpop.eup %6112  ;;  %6118 = vpow2.f32 %v4147_v22 }
0x1783   : > { %v4149_v60 = vsel %vm262_vm0, %v6113_v36, 0.0 }
0x1784   : > { %4150 = vadd.xlane.f32.xlu0 %v4149_v60 }
0x1786   : > { %v6115_v28 = vpop.eup %6114 }
0x1787   : > { %v4155_v0 = vsel %vm262_vm0, %v6115_v28, 0.0 }
0x1788   : > { %4156 = vadd.xlane.f32.xlu0 %v4155_v0 }
0x178e   : > { %v6117_v20 = vpop.eup %6116 }
0x178f   : > { %v4152_v11 = vsel %vm262_vm0, %v6117_v20, 0.0  ;;  %v6119_v17 = vpop.eup %6118 }
0x1790   : > { %4153 = vadd.xlane.f32.xlu1 %v4152_v11  ;;  %v4158_v30 = vsel %vm262_vm0, %v6119_v17, 0.0 }
0x1794   : > { %4159 = vadd.xlane.f32.xlu1 %v4158_v30  ;;  %v3594_v30 = vadd.f32 %v3593_v37, %v7072_v12 }
0x179e   : > { %4195 = vrot.lane.b32.xlu0 %v6857_v1, %s6160_s15 }
0x17a5   : > { %4193 = vrot.lane.b32.xlu1 %v6859_v32, %s6160_s15 }
0x17a9   : > { %4191 = vrot.lane.b32.xlu1 %v6863_v7, %s6160_s15 }
0x17ad   : > { %4189 = vrot.lane.b32.xlu1 %v6867_v8, %s6160_s15 }
0x180d   : > { %v4151_v6 = vpop.xlane.xlu0 %4150 }
0x180e   : > { %6120 = vrcp.f32 %v4151_v6  ;;  %v5852_v9 = vpop.f32.mrf.mxu0 }
0x1810   : > { %v3883_v14 = vpop.f32.mrf.mxu0 }
0x1811   : > { %5858 = vmatprep.mubr.msk.f32.mxu0 %vm627_vm1, %v3883_v14  ;;  %v4157_v1 = vpop.xlane.xlu0 %4156  ;;  %v3609_v14 = vadd.f32 %v5827_v46, %v7074_v42 }
0x1812   : > { %v5855_v24 = vpop.f32.mrf.mxu0  ;;  %5859 = vmatmul.mubr.msk.f32.vlgmr.msra.gmra.mxu0 %vm627_vm1, %v5852_v9 }
0x1814   : > { %v3893_v32 = vpop.f32.mrf.mxu0 }
0x1815   : > { %5861 = vmatprep.mubr.msk.f32.mxu0 %vm627_vm1, %v3893_v32  ;;  %v4196_v7 = vpop.permute.xlu0 %4195 }
0x1816   : > { %5862 = vmatmul.mubr.msk.f32.gmra.mxu0 %vm627_vm1, %v5855_v24  ;;  %5878 = vmatprep.subr.mxu0 %v4196_v7  ;;  %v3604_v24 = vadd.f32 %v3603_v2, %v7076_v13  ;;  %v7171_v13 = vld [vmem:[%s7377_s2 + $0x190] sm:$0xff] }
0x1817   : > { %5879 = vmatpush3.msra.mxu0 %v4196_v7 }
0x1819   : > { %v4154_v8 = vpop.xlane.xlu1 %4153 }
0x181a   : > { %6122 = vrcp.f32 %v4154_v8 }
0x181b   : > { %v6121_v15 = vpop.eup %6120  ;;  %6124 = vrcp.f32 %v4157_v1 }
0x181c   : > { %v7141_v18 = vmul.f32 %v6121_v15, %v6113_v36 }
0x181d   : > { %v4160_v5 = vpop.xlane.xlu1 %4159 }
0x181e   : > { %6126 = vrcp.f32 %v4160_v5  ;;  %5886 = vmatprep.mubr.msk.f32.mxu0 %vm262_vm0, %v7141_v18 }
0x1821   : > { %v4194_v27 = vpop.permute.xlu1 %4193 }
0x1822   : > { %5880 = vmatprep.subr.mxu0 %v4194_v27 }
0x1823   : > { %5881 = vmatpush3.msra.mxu0 %v4194_v27 }
0x1825   : > { %v4192_v31 = vpop.permute.xlu1 %4191 }
0x1826   : > { %5882 = vmatprep.subr.mxu0 %v4192_v31 }
0x1827   : > { %v6123_v34 = vpop.eup %6122  ;;  %5883 = vmatpush3.msra.mxu0 %v4192_v31 }
0x1828   : > { %v6125_v22 = vpop.eup %6124  ;;  %v7145_v60 = vmul.f32 %v6123_v34, %v6117_v20  ;;  %v4294_v20 = vld [vmem:[%s7377_s2 + $0x148] sm:$0xff] }
0x1829   : > { %v4190_v53 = vpop.permute.xlu1 %4189  ;;  %v7147_v36 = vmul.f32 %v6125_v22, %v6115_v28  ;;  %v3599_v28 = vadd.f32 %v5824_v16, %v7070_v63  ;;  %v4403_v16 = vrot.slane %v7171_v13, %v2168_v23 }
0x182a   : > { %5884 = vmatprep.subr.mxu0 %v4190_v53 }
0x182b   : > { %v6127_v0 = vpop.eup %6126  ;;  %5885 = vmatpush3.msra.mxu0 %v4190_v53 }
0x182c   : > { %5887 = vmatmul.mubr.msk.f32.vlgmr.msra.gmra.mxu0 %vm262_vm0, %v7145_v60  ;;  %v7153_v11 = vmul.f32 %v6127_v0, %v6119_v17  ;;  %5892 = vmatprep.subr.mxu0 %v4294_v20 }
0x182d   : > { %5889 = vmatprep.mubr.msk.f32.mxu0 %vm262_vm0, %v7147_v36  ;;  %5893 = vmatpush3.msra.mxu0 %v4294_v20 }
0x1830   : > { %5890 = vmatmul.mubr.msk.f32.gmra.mxu0 %vm262_vm0, %v7153_v11 }
0x18d2   : > { %v5860_v48 = vpop.f32.mrf.mxu0 }
0x18d3   : > { %v4001_v6 = vadd.f32 %v5860_v48, %v3599_v28 }
0x18d4   : > { %v3981_v9 = vpop.f32.mrf.mxu0 }
0x18d5   : > { %v4000_v17 = vadd.f32 %v3981_v9, %v3594_v30 }
0x18d6   : > { %v5863_v1 = vpop.f32.mrf.mxu0 }
0x18d7   : > { %v4003_v32 = vadd.f32 %v5863_v1, %v3609_v14 }
0x18d8   : > { %v3991_v7 = vpop.f32.mrf.mxu0 }
0x18d9   : > { %v4002_v8 = vadd.f32 %v3991_v7, %v3604_v24 }
0x18ec   : > { %v5888_v15 = vpop.f32.mrf.mxu0 }
0x18ee   : > { %v4275_v5 = vpop.f32.mrf.mxu0 }
0x18ef   : > { %5894 = vmatprep.mubr.msk.f32.mxu0 %vm627_vm1, %v4275_v5 }
0x18f0   : > { %v5891_v27 = vpop.f32.mrf.mxu0  ;;  %5895 = vmatmul.mubr.msk.f32.vlgmr.msra.gmra.mxu0 %vm627_vm1, %v5888_v15 }
0x18f2   : > { %v4285_v63 = vpop.f32.mrf.mxu0 }
0x18f3   : > { %5897 = vmatprep.mubr.msk.f32.mxu0 %vm627_vm1, %v4285_v63 }
0x18f4   : > { %5898 = vmatmul.mubr.msk.f32.gmra.mxu0 %vm627_vm1, %v5891_v27 }
0x19b0   : > { %v5896_v12 = vpop.f32.mrf.mxu0 }
0x19b1   : > { %v4393_v42 = vadd.f32 %v5896_v12, %v4001_v6 }
0x19b2   : > { %v4373_v37 = vpop.f32.mrf.mxu0 }
0x19b3   : > { %v4397_v46 = vadd.f32 %v4393_v42, %v6743_v25  ;;  %v4392_v2 = vadd.f32 %v4373_v37, %v4000_v17 }
0x19b4   : > { %v5899_v31 = vpop.f32.mrf.mxu0 }
0x19b5   : > { %v7177_v34 = vadd.f32 %v4403_v16, %v4397_v46  ;;  %v4396_v22 = vadd.f32 %v4392_v2, %v6746_v56  ;;  %v4395_v53 = vadd.f32 %v5899_v31, %v4003_v32 }
0x19b6   : > { %v4383_v0 = vpop.f32.mrf.mxu0 }
0x19b7   : > { %v7180_v20 = vadd.f32 %v4403_v16, %v4396_v22  ;;  %v4394_v28 = vadd.f32 %v4383_v0, %v4002_v8  ;;  %v4411_v48 = vsel %vm262_vm0, %v7177_v34, 0.0  ;;  %v4399_v23 = vadd.f32 %v4395_v53, %v6753_v29  ;;  %v4479_v53 = vld [vmem:[%s7378_s3 + $0x40] sm:$0xff]  ;;  %v4478_v0 = vld [vmem:[%s7378_s3 + $0x38] sm:$0xff] }
0x19b8   : > { %4412 = vadd.xlane.f32.xlu1 %v4411_v48  ;;  %5900 = vmatprep.subr.mxu1 %v4479_v53 }
0x19b9   : > { %v4398_v30 = vadd.f32 %v4394_v28, %v6756_v4  ;;  %v4408_v25 = vsel %vm262_vm0, %v7180_v20, 0.0  ;;  %v7190_v56 = vadd.f32 %v4403_v16, %v4399_v23  ;;  %5901 = vmatpush3.msra.mxu1 %v4479_v53 }
0x19ba   : > { %4409 = vadd.xlane.f32.xlu0 %v4408_v25  ;;  %5902 = vmatprep.subr.mxu1 %v4478_v0 }
0x19bb   : > { %v7188_v6 = vadd.f32 %v4403_v16, %v4398_v30  ;;  %v4417_v14 = vsel %vm262_vm0, %v7190_v56, 0.0  ;;  %5903 = vmatpush3.msra.mxu1 %v4478_v0 }
0x19bd   : > { %v4414_v9 = vsel %vm262_vm0, %v7188_v6, 0.0 }
0x19be   : > { %4415 = vadd.xlane.f32.xlu0 %v4414_v9 }
0x19c2   : > { %4418 = vadd.xlane.f32.xlu0 %v4417_v14 }
0x1a41   : > { %v4413_v17 = vpop.xlane.xlu1 %4412 }
0x1a42   : > { %v4421_v29 = vmul.f32 0.03125, %v4413_v17 }
0x1a43   : > { %v4410_v1 = vpop.xlane.xlu0 %4409 }
0x1a44   : > { %v7197_v4 = vsub.f32 %v7177_v34, %v4421_v29  ;;  %v4420_v24 = vmul.f32 0.03125, %v4410_v1 }
0x1a46   : > { %v7200_v32 = vsub.f32 %v7180_v20, %v4420_v24  ;;  %v4429_v7 = vmul.f32 %v7197_v4, %v7197_v4 }
0x1a47   : > { %v4416_v8 = vpop.xlane.xlu0 %4415 }
0x1a48   : > { %v4422_v15 = vmul.f32 0.03125, %v4416_v8  ;;  %v4435_v5 = vsel %vm262_vm0, %v4429_v7, 0.0  ;;  %v4428_v27 = vmul.f32 %v7200_v32, %v7200_v32 }
0x1a49   : > { %4436 = vadd.xlane.f32.xlu1 %v4435_v5 }
0x1a4a   : > { %v7208_v63 = vsub.f32 %v7188_v6, %v4422_v15  ;;  %v4432_v12 = vsel %vm262_vm0, %v4428_v27, 0.0 }
0x1a4b   : > { %4433 = vadd.xlane.f32.xlu0 %v4432_v12  ;;  %v4419_v42 = vpop.xlane.xlu0 %4418 }
0x1a4c   : > { %v4423_v16 = vmul.f32 0.03125, %v4419_v42  ;;  %v4430_v37 = vmul.f32 %v7208_v63, %v7208_v63 }
0x1a4e   : > { %v7214_v46 = vsub.f32 %v7190_v56, %v4423_v16  ;;  %v4438_v2 = vsel %vm262_vm0, %v4430_v37, 0.0 }
0x1a4f   : > { %4439 = vadd.xlane.f32.xlu0 %v4438_v2 }
0x1a50   : > { %v4431_v31 = vmul.f32 %v7214_v46, %v7214_v46 }
0x1a52   : > { %v4441_v22 = vsel %vm262_vm0, %v4431_v31, 0.0 }
0x1a53   : > { %4442 = vadd.xlane.f32.xlu1 %v4441_v22 }
0x1a64   : > { %1055 = vrot.lane.b32.xlu1 %v6508_v57, %s6161_s9  ;;  %v4476_v57 = vld [vmem:[%s7378_s3 + $0x28] sm:$0xff] }
0x1a65   : > { %1053 = vrot.lane.b32.xlu0 %v6501_v52, %s6161_s9  ;;  %v4477_v52 = vld [vmem:[%s7378_s3 + $0x30] sm:$0xff] }
0x1a66   : > { %5904 = vmatprep.subr.mxu1 %v4477_v52 }
0x1a67   : > { %5905 = vmatpush3.msra.mxu1 %v4477_v52  ;;  %v4625_v52 = vld [vmem:[%s7377_s2 + $0x188] sm:$0xff] }
0x1a68   : > { %1057 = vrot.lane.b32.xlu1 %v6510_v59, %s6161_s9  ;;  %5906 = vmatprep.subr.mxu1 %v4476_v57 }
0x1a69   : > { %3292 = vrot.lane.b32.xlu0 %v7023_v35, %s6161_s9  ;;  %5907 = vmatpush3.msra.mxu1 %v4476_v57  ;;  %v4624_v57 = vld [vmem:[%s7377_s2 + $0x180] sm:$0xff] }
0x1a6a   : > { %5914 = vmatprep.subr.mxu0 %v4625_v52 }
0x1a6b   : > { %5915 = vmatpush3.msra.mxu0 %v4625_v52  ;;  %v2503_v52 = vld [vmem:[%s7377_s2 + $0x198] sm:$0xff] }
0x1a6c   : > { %1059 = vrot.lane.b32.xlu1 %v6517_v61, %s6161_s9  ;;  %5916 = vmatprep.subr.mxu0 %v4624_v57 }
0x1a6d   : > { %3296 = vrot.lane.b32.xlu0 %v7032_v43, %s6161_s9  ;;  %5917 = vmatpush3.msra.mxu0 %v4624_v57 }
0x1a70   : > { %3294 = vrot.lane.b32.xlu1 %v7030_v41, %s6161_s9 }
0x1a71   : > { %1544 = vrot.lane.b32.xlu0 %v6584_v50, %s6162_s24 }
0x1a74   : > { %3298 = vrot.lane.b32.xlu1 %v7039_v58, %s6161_s9 }
0x1a75   : > { %1548 = vrot.lane.b32.xlu0 %v6590_v54, %s6162_s24 }
0x1a78   : > { %1546 = vrot.lane.b32.xlu1 %v6588_v38, %s6162_s24 }
0x1a79   : > { %3781 = vrot.lane.b32.xlu0 %v7106_v10, %s6162_s24 }
0x1a7c   : > { %1550 = vrot.lane.b32.xlu1 %v6596_v55, %s6162_s24 }
0x1a7d   : > { %3785 = vrot.lane.b32.xlu0 %v7112_v3, %s6162_s24  ;;  %v4463_v3 = vrot.slane %v7171_v13, %v2228_v47  ;;  %v4471_v47 = vrot.slane %v7171_v13, %v2236_v33 }
0x1a80   : > { %3783 = vrot.lane.b32.xlu1 %v7110_v62, %s6162_s24 }
0x1a81   : > { %1938 = vrot.lane.b32.xlu0 %v6619_v45, %s6163_s25 }
0x1a84   : > { %3787 = vrot.lane.b32.xlu1 %v7118_v21, %s6162_s24 }
0x1a85   : > { %1942 = vrot.lane.b32.xlu0 %v6625_v39, %s6163_s25 }
0x1a88   : > { %1940 = vrot.lane.b32.xlu1 %v6623_v19, %s6163_s25 }
0x1a89   : > { %4173 = vrot.lane.b32.xlu0 %v7141_v18, %s6163_s25 }
0x1a8c   : > { %1944 = vrot.lane.b32.xlu1 %v6631_v40, %s6163_s25 }
0x1a8d   : > { %4177 = vrot.lane.b32.xlu0 %v7147_v36, %s6163_s25 }
0x1a90   : > { %4175 = vrot.lane.b32.xlu1 %v7145_v60, %s6163_s25 }
0x1a94   : > { %4179 = vrot.lane.b32.xlu1 %v7153_v11, %s6163_s25  ;;  %s5008_s25 = sshll.u32 %s7382_s19, 2 }
0x1a95   : > { %s250_s27 = scalar_lea.vmem %s7379_s4, %s5008_s25 }
0x1ad2   : > { %v4437_v59 = vpop.xlane.xlu1 %4436 }
0x1ad3   : > { %v4445_v61 = vmul.f32 0.03125, %v4437_v59  ;;  %v4623_v59 = vld [vmem:[%s7377_s2 + $0x178] sm:$0xff] }
0x1ad4   : > { %v4434_v50 = vpop.xlane.xlu0 %4433  ;;  %5918 = vmatprep.subr.mxu0 %v4623_v59 }
0x1ad5   : > { %v4449_v38 = vadd.f32 1e-05, %v4445_v61  ;;  %v4444_v54 = vmul.f32 0.03125, %v4434_v50  ;;  %5919 = vmatpush3.msra.mxu0 %v4623_v59  ;;  %v4622_v61 = vld [vmem:[%s7377_s2 + $0x170] sm:$0xff]  ;;  %v4621_v50 = vld [vmem:[%s7377_s2 + $0x168] sm:$0xff]  ;;  %v4739_v59 = vand.u32 127, %v316_v44 }
0x1ad6   : > { %5920 = vmatprep.subr.mxu0 %v4622_v61 }
0x1ad7   : > { %6128 = vrsqrt.f32 %v4449_v38  ;;  %v4448_v55 = vadd.f32 1e-05, %v4444_v54  ;;  %5921 = vmatpush3.msra.mxu0 %v4622_v61  ;;  %v4620_v38 = vld [vmem:[%s7377_s2 + $0x160] sm:$0xff]  ;;  %v4619_v54 = vld [vmem:[%s7377_s2 + $0x158] sm:$0xff] }
0x1ad8   : > { %v4440_v45 = vpop.xlane.xlu0 %4439  ;;  %5922 = vmatprep.subr.mxu0 %v4621_v50 }
0x1ad9   : > { %6130 = vrsqrt.f32 %v4448_v55  ;;  %v4446_v19 = vmul.f32 0.03125, %v4440_v45  ;;  %5923 = vmatpush3.msra.mxu0 %v4621_v50  ;;  %v4618_v55 = vld [vmem:[%s7377_s2 + $0x150] sm:$0xff]  ;;  %v5212_v45 = vld [vmem:[%s7378_s3 + $0x48] ss:$0 sm:$0xff] }
0x1ada   : > { %5924 = vmatprep.subr.mxu0 %v4620_v38 }
0x1adb   : > { %v4450_v39 = vadd.f32 1e-05, %v4446_v19  ;;  %5925 = vmatpush3.msra.mxu0 %v4620_v38  ;;  %v4730_v38 = vrot.slane %v2503_v52, %v6271_v51 }
0x1adc   : > { %v4443_v40 = vpop.xlane.xlu1 %4442  ;;  %v1054_v35 = vpop.permute.xlu0 %1053  ;;  %5926 = vmatprep.subr.mxu0 %v4619_v54 }
0x1add   : > { %6132 = vrsqrt.f32 %v4450_v39  ;;  %v4447_v41 = vmul.f32 0.03125, %v4443_v40  ;;  %1066 = vst.msk [vmem:[%s6417_s11] sm:$0xff] %vm1065_vm3, %v1054_v35  ;;  %5927 = vmatpush3.msra.mxu0 %v4619_v54 }
0x1ade   : > { %5928 = vmatprep.subr.mxu0 %v4618_v55 }
0x1adf   : > { %v4451_v43 = vadd.f32 1e-05, %v4447_v41  ;;  %5929 = vmatpush3.msra.mxu0 %v4618_v55 }
0x1ae0   : > { %v1056_v58 = vpop.permute.xlu1 %1055  ;;  %v3293_v10 = vpop.permute.xlu0 %3292 }
0x1ae1   : > { %6134 = vrsqrt.f32 %v4451_v43  ;;  %1067 = vst.msk [vmem:[%s6417_s11 + $0x8] sm:$0xff] %vm1065_vm3, %v1056_v58  ;;  %5148 = vst.msk [vmem:[%s6417_s11 + $0x20] sm:$0xff] %vm1065_vm3, %v3293_v10 }
0x1ae4   : > { %v6129_v62 = vpop.eup %6128  ;;  %v1058_v21 = vpop.permute.xlu1 %1057 }
0x1ae5   : > { %v3297_v18 = vpop.permute.xlu0 %3296  ;;  %v4457_v60 = vmul.f32 %v6129_v62, %v7197_v4  ;;  %1068 = vst.msk [vmem:[%s6417_s11 + $0x10] sm:$0xff] %vm1065_vm3, %v1058_v21 }
0x1ae6   : > { %5150 = vst.msk [vmem:[%s6417_s11 + $0x30] sm:$0xff] %vm1065_vm3, %v3297_v18  ;;  %v6131_v36 = vpop.eup %6130 }
0x1ae7   : > { %v4456_v11 = vmul.f32 %v6131_v36, %v7200_v32  ;;  %v4465_v28 = vmul.f32 %v4463_v3, %v4457_v60 }
0x1ae8   : > { %v1060_v48 = vpop.permute.xlu1 %1059 }
0x1ae9   : > { %v1545_v23 = vpop.permute.xlu0 %1544  ;;  %1069 = vst.msk [vmem:[%s6417_s11 + $0x18] sm:$0xff] %vm1065_vm3, %v1060_v48  ;;  %v4464_v30 = vmul.f32 %v4463_v3, %v4456_v11  ;;  %v4473_v1 = vadd.f32 %v4471_v47, %v4465_v28 }
0x1aea   : > { %1557 = vst.msk [vmem:[%s6417_s11] sm:$0xff] %vm1556_vm4, %v1545_v23  ;;  %v6133_v25 = vpop.eup %6132 }
0x1aeb   : > { %v4472_v9 = vadd.f32 %v4471_v47, %v4464_v30  ;;  %v4458_v14 = vmul.f32 %v6133_v25, %v7208_v63 }
0x1aec   : > { %v3295_v17 = vpop.permute.xlu1 %3294 }
0x1aed   : > { %v1549_v29 = vpop.permute.xlu0 %1548  ;;  %5149 = vst.msk [vmem:[%s6417_s11 + $0x28] sm:$0xff] %vm1065_vm3, %v3295_v17  ;;  %5908 = vmatprep.mubr.msk.f32.mxu1 %vm262_vm0, %v4472_v9  ;;  %v4466_v33 = vmul.f32 %v4463_v3, %v4458_v14 }
0x1aee   : > { %1559 = vst.msk [vmem:[%s6417_s11 + $0x10] sm:$0xff] %vm1556_vm4, %v1549_v29  ;;  %v6135_v13 = vpop.eup %6134  ;;  %5909 = vmatmul.mubr.msk.f32.vlgmr.msra.gmra.mxu1 %vm262_vm0, %v4473_v1 }
0x1aef   : > { %v4474_v4 = vadd.f32 %v4471_v47, %v4466_v33  ;;  %v4459_v24 = vmul.f32 %v6135_v13, %v7214_v46 }
0x1af0   : > { %v3299_v32 = vpop.permute.xlu1 %3298 }
0x1af1   : > { %v3782_v7 = vpop.permute.xlu0 %3781  ;;  %5151 = vst.msk [vmem:[%s6417_s11 + $0x38] sm:$0xff] %vm1065_vm3, %v3299_v32  ;;  %5911 = vmatprep.mubr.msk.f32.mxu1 %vm262_vm0, %v4474_v4  ;;  %v4467_v8 = vmul.f32 %v4463_v3, %v4459_v24 }
0x1af2   : > { %5176 = vst.msk [vmem:[%s6417_s11 + $0x20] sm:$0xff] %vm1556_vm4, %v3782_v7 }
0x1af3   : > { %v4475_v15 = vadd.f32 %v4471_v47, %v4467_v8 }
0x1af4   : > { %v1547_v5 = vpop.permute.xlu1 %1546 }
0x1af5   : > { %v3786_v27 = vpop.permute.xlu0 %3785  ;;  %1558 = vst.msk [vmem:[%s6417_s11 + $0x8] sm:$0xff] %vm1556_vm4, %v1547_v5  ;;  %5912 = vmatmul.mubr.msk.f32.gmra.mxu1 %vm262_vm0, %v4475_v15 }
0x1af6   : > { %5178 = vst.msk [vmem:[%s6417_s11 + $0x30] sm:$0xff] %vm1556_vm4, %v3786_v27 }
0x1af8   : > { %v1551_v63 = vpop.permute.xlu1 %1550 }
0x1af9   : > { %v1939_v12 = vpop.permute.xlu0 %1938  ;;  %1560 = vst.msk [vmem:[%s6417_s11 + $0x18] sm:$0xff] %vm1556_vm4, %v1551_v63 }
0x1afa   : > { %1951 = vst.msk [vmem:[%s6417_s11] sm:$0xff] %vm1950_vm5, %v1939_v12 }
0x1afc   : > { %v3784_v42 = vpop.permute.xlu1 %3783 }
0x1afd   : > { %v1943_v16 = vpop.permute.xlu0 %1942  ;;  %5177 = vst.msk [vmem:[%s6417_s11 + $0x28] sm:$0xff] %vm1556_vm4, %v3784_v42 }
0x1afe   : > { %1953 = vst.msk [vmem:[%s6417_s11 + $0x10] sm:$0xff] %vm1950_vm5, %v1943_v16 }
0x1b00   : > { %v3788_v37 = vpop.permute.xlu1 %3787 }
0x1b01   : > { %v4174_v46 = vpop.permute.xlu0 %4173  ;;  %5179 = vst.msk [vmem:[%s6417_s11 + $0x38] sm:$0xff] %vm1556_vm4, %v3788_v37 }
0x1b02   : > { %5200 = vst.msk [vmem:[%s6417_s11 + $0x20] sm:$0xff] %vm1950_vm5, %v4174_v46 }
0x1b04   : > { %v1941_v2 = vpop.permute.xlu1 %1940 }
0x1b05   : > { %v4178_v31 = vpop.permute.xlu0 %4177  ;;  %1952 = vst.msk [vmem:[%s6417_s11 + $0x8] sm:$0xff] %vm1950_vm5, %v1941_v2 }
0x1b06   : > { %5202 = vst.msk [vmem:[%s6417_s11 + $0x30] sm:$0xff] %vm1950_vm5, %v4178_v31 }
0x1b08   : > { %v1945_v22 = vpop.permute.xlu1 %1944 }
0x1b09   : > { %1954 = vst.msk [vmem:[%s6417_s11 + $0x18] sm:$0xff] %vm1950_vm5, %v1945_v22  ;;  %v6164_v22 = vmov 0.0  }
0x1b0a   : > { %5936 = vmatprep.subr.mxu1 %v6164_v22  ;;  %5944 = vmatprep.mubr.msk.f32.mxu1 %vm6165_vm6, %v6164_v22 }
0x1b0c   : > { %v4176_v53 = vpop.permute.xlu1 %4175 }
0x1b0d   : > { %5201 = vst.msk [vmem:[%s6417_s11 + $0x28] sm:$0xff] %vm1950_vm5, %v4176_v53 }
0x1b10   : > { %v4180_v0 = vpop.permute.xlu1 %4179 }
0x1b11   : > { %5203 = vst.msk [vmem:[%s6417_s11 + $0x38] sm:$0xff] %vm1950_vm5, %v4180_v0  ;;  %v4740_v0 = vmul.u32 8, %v6268_v49 }
0x1b13   : > { %v4742_v61 = vadd.s32 8, %v4740_v0  ;;  %vm4741_vm7 = vcmp.ge.s32.totalorder %v4739_v59, %v4740_v0 }
0x1b15   : > { %vm4743_vm8 = vcmp.lt.s32.totalorder %v4739_v59, %v4742_v61 }
0x1b16   : > { %vm4744_vm9 = vmand %vm4741_vm7, %vm4743_vm8 }
0x1bae   : > { %v5910_v19 = vpop.f32.mrf.mxu1 }
0x1baf   : > { %v4569_v39 = vadd.f32 %v5910_v19, %v5212_v45 }
0x1bb0   : > { %v4563_v40 = vpop.f32.mrf.mxu1 }
0x1bb1   : > { %v4587_v35 = vmul.f32 0.044715, %v4569_v39  ;;  %v4564_v41 = vadd.f32 %v5212_v45, %v4563_v40  ;;  %v4583_v15 = vmul.f32 0.5, %v4569_v39 }
0x1bb3   : > { %v4591_v43 = vmul.f32 %v4587_v35, %v4569_v39  ;;  %v4586_v58 = vmul.f32 0.044715, %v4564_v41  ;;  %v4582_v7 = vmul.f32 0.5, %v4564_v41 }
0x1bb5   : > { %v4595_v10 = vmul.f32 %v4591_v43, %v4569_v39  ;;  %v4590_v62 = vmul.f32 %v4586_v58, %v4564_v41  ;;  %v5913_v3 = vpop.f32.mrf.mxu1 }
0x1bb6   : > { %v4579_v21 = vadd.f32 %v5913_v3, %v5212_v45 }
0x1bb7   : > { %v4599_v18 = vadd.f32 %v4595_v10, %v4569_v39  ;;  %v4594_v60 = vmul.f32 %v4590_v62, %v4564_v41  ;;  %v4573_v36 = vpop.f32.mrf.mxu1 }
0x1bb8   : > { %v4589_v11 = vmul.f32 0.044715, %v4579_v21  ;;  %v4574_v28 = vadd.f32 %v5212_v45, %v4573_v36  ;;  %v4585_v46 = vmul.f32 0.5, %v4579_v21 }
0x1bb9   : > { %v4603_v48 = vmul.f32 0.7978846, %v4599_v18  ;;  %v4598_v23 = vadd.f32 %v4594_v60, %v4564_v41 }
0x1bba   : > { %v4593_v47 = vmul.f32 %v4589_v11, %v4579_v21  ;;  %v4588_v30 = vmul.f32 0.044715, %v4574_v28  ;;  %v4584_v16 = vmul.f32 0.5, %v4574_v28 }
0x1bbb   : > { %6136 = vtanh.f32 %v4603_v48  ;;  %v4602_v25 = vmul.f32 0.7978846, %v4598_v23 }
0x1bbc   : > { %v4597_v9 = vmul.f32 %v4593_v47, %v4579_v21  ;;  %v4592_v14 = vmul.f32 %v4588_v30, %v4574_v28 }
0x1bbd   : > { %6138 = vtanh.f32 %v4602_v25 }
0x1bbe   : > { %v4601_v17 = vadd.f32 %v4597_v9, %v4579_v21  ;;  %v4596_v29 = vmul.f32 %v4592_v14, %v4574_v28 }
0x1bc0   : > { %v4600_v1 = vadd.f32 %v4596_v29, %v4574_v28  ;;  %v4605_v33 = vmul.f32 0.7978846, %v4601_v17 }
0x1bc2   : > { %v4604_v13 = vmul.f32 0.7978846, %v4600_v1  ;;  %6140 = vtanh.f32 %v4605_v33 }
0x1bc4   : > { %6142 = vtanh.f32 %v4604_v13 }
0x1bc8   : > { %v6137_v4 = vpop.eup %6136 }
0x1bc9   : > { %v4611_v32 = vadd.f32 1.0, %v6137_v4 }
0x1bca   : > { %v6139_v24 = vpop.eup %6138 }
0x1bcb   : > { %v4610_v8 = vadd.f32 1.0, %v6139_v24  ;;  %v4615_v27 = vmul.f32 %v4611_v32, %v4583_v15 }
0x1bcd   : > { %v4614_v5 = vmul.f32 %v4610_v8, %v4582_v7 }
0x1bcf   : > { %v6141_v63 = vpop.eup %6140  ;;  %5930 = vmatprep.mubr.msk.f32.mxu0 %vm2392_vm2, %v4614_v5 }
0x1bd0   : > { %5931 = vmatmul.mubr.msk.f32.vlgmr.msra.gmra.mxu0 %vm2392_vm2, %v4615_v27  ;;  %v4613_v42 = vadd.f32 1.0, %v6141_v63 }
0x1bd1   : > { %v6143_v12 = vpop.eup %6142 }
0x1bd2   : > { %v4612_v37 = vadd.f32 1.0, %v6143_v12  ;;  %v4617_v31 = vmul.f32 %v4613_v42, %v4585_v46 }
0x1bd4   : > { %v4616_v2 = vmul.f32 %v4612_v37, %v4584_v16 }
0x1bd6   : > { %5933 = vmatprep.mubr.msk.f32.mxu0 %vm2392_vm2, %v4616_v2 }
0x1bd7   : > { %5934 = vmatmul.mubr.msk.f32.gmra.mxu0 %vm2392_vm2, %v4617_v31 }
0x1c90   : > { %v5932_v53 = vpop.f32.mrf.mxu0 }
0x1c91   : > { %v4724_v45 = vadd.f32 %v5932_v53, %v7177_v34  ;;  %v4735_v34 = vld [vmem:[%s7377_s2 + $0x1a0] sm:$0xff] }
0x1c92   : > { %v4704_v57 = vpop.f32.mrf.mxu0  ;;  %v4822_v35 = vrot.slane %v4735_v34, %v6328_v26 }
0x1c93   : > { %v4723_v39 = vadd.f32 %v4704_v57, %v7180_v20  ;;  %v4732_v44 = vadd.f32 %v4730_v38, %v4724_v45 }
0x1c95   : > { %v4731_v51 = vadd.f32 %v4730_v38, %v4723_v39 }
0x1c97   : > { %v5935_v50 = vpop.f32.mrf.mxu0 }
0x1c98   : > { %v4726_v54 = vadd.f32 %v5935_v50, %v7190_v56  ;;  %v4745_v56 = vsel %vm4744_vm9, 0.125, %v6164_v22 }
0x1c99   : > { %v4714_v55 = vpop.f32.mrf.mxu0 }
0x1c9a   : > { %v4734_v19 = vadd.f32 %v4730_v38, %v4726_v54  ;;  %v4725_v49 = vadd.f32 %v4714_v55, %v7188_v6 }
0x1c9c   : > { %v4733_v40 = vadd.f32 %v4730_v38, %v4725_v49  ;;  %5937 = vmatpush3.msra.mxu1 %v4734_v19 }
0x1c9d   : > { %5938 = vmatprep.subr.mxu1 %v6164_v22 }
0x1c9e   : > { %5939 = vmatpush3.msra.mxu1 %v4733_v40 }
0x1c9f   : > { %5940 = vmatprep.subr.mxu1 %v6164_v22 }
0x1ca0   : > { %5941 = vmatpush3.msra.mxu1 %v4732_v44 }
0x1ca1   : > { %5942 = vmatprep.subr.mxu1 %v6164_v22 }
0x1ca2   : > { %5943 = vmatpush3.msra.mxu1 %v4731_v51 }
0x1ca3   : > { %5945 = vmatmul.mubr.msk.f32.vlgmr.msra.gmra.mxu1 %vm262_vm0, %v4745_v56  ;;  %5947 = vmatprep.subr.mxu1 %v6164_v22 }
0x1ca4   : > { %5948 = vmatpush3.xpose.msk.msra.mxu1 %vm262_vm0, %v4735_v34  ;;  %5949 = vmatprep.mubr.msk.f32.mxu1 %vm6165_vm6, %v6164_v22 }
0x1d63   : > { %v4815_v20 = vpop.f32.mrf.mxu1 }
0x1d64   : > { %5950 = vmatmul.mubr.msk.f32.vlgmr.msra.gmra.mxu1 %vm262_vm0, %v4815_v20 }
0x1d65   : > { %v5946_v6 = vpop.f32.mrf.mxu1 }
0x1e24   : > { %v4895_v41 = vpop.f32.mrf.mxu1 }
0x1e25   : > { %v4896_v43 = vadd.f32 %v4895_v41, %v4822_v35 }
0x1e26   : > { %v5951_v58 = vpop.f32.mrf.mxu1 }
0x1e27   : > { %4900 = vst.msk [vmem:[%s250_s27] sm:$0xf] %vm4899_vm10, %v4896_v43 }
0x1e28 PF: > { %s16_s18 = sadd.s32 1, %s6156_s18  }
0x1e29   : > { %p13_p4 = scmp.ge.s32.totalorder %s16_s18, 4  }
0x1e2b   :  { %15 = sbr.rel (!%p13_p4) target bundleno = 1 (0x1), region = 85 }

</bundles_post_ra>
